<compile_context>
chip_gen: v6e
topology: v6e:2x2x1
jax: 0.10.0
libtpu: 0.0.40
codegen_flags: <defaults>
</compile_context>

<pallas_src>
import functools

import jax
import jax.numpy as jnp
from jax.experimental import pallas as pl
from jax.experimental.pallas import tpu as pltpu


# ---------------------------------------------------------------------------
# Single fused kernel: input linear -> encoder layer -> decoder layer ->
# pooling -> output linear.  Grid is over batch; each instance handles one
# batch element entirely in VMEM.
# ---------------------------------------------------------------------------
def _winner_kernel(
    # per-batch activations
    x_enc_ref, x_dec_ref,
    # shared input block
    in_w_ref, in_b_ref,
    # encoder layer
    e_wqkv_ref, e_bqkv_ref, e_wo_ref, e_bo_ref, e_ln1g_ref, e_ln1b_ref,
    e_w1_ref, e_b1_ref, e_w2_ref, e_b2_ref, e_ln2g_ref, e_ln2b_ref,
    # decoder layer: self attn
    d_wqkv_ref, d_bqkv_ref, d_wos_ref, d_bos_ref, d_ln1g_ref, d_ln1b_ref,
    # decoder layer: cross attn
    d_wq_ref, d_bq_ref, d_wkv_ref, d_bkv_ref, d_woc_ref, d_boc_ref,
    d_ln2g_ref, d_ln2b_ref,
    # decoder layer: ffn
    d_w1_ref, d_b1_ref, d_w2_ref, d_b2_ref, d_ln3g_ref, d_ln3b_ref,
    # output block (lane-padded)
    out_w_ref, out_b_ref,
    # output
    o_ref,
    *, nhead, eps, pooling_method):
    f32 = jnp.float32
    E = in_w_ref.shape[1]
    dh = E // nhead
    scale = 1.0 / float(dh) ** 0.5

    def layernorm(y, g_ref, b_ref):
        mu = jnp.mean(y, axis=-1, keepdims=True)
        yc = y - mu
        var = jnp.mean(yc * yc, axis=-1, keepdims=True)
        return yc * jax.lax.rsqrt(var + eps) * g_ref[...] + b_ref[...]

    def attention(q, k, v, wo_ref, bo_ref):
        # Per-head softmax attention.  Instead of concatenating the per-head
        # contexts back to (Sq, E) (a lane-relayout chain), each head's
        # (Sq, dh) context is multiplied by the matching dh-row slice of W_o
        # and accumulated -- mathematically identical to concat + W_o.
        acc = None
        for h in range(nhead):                     # static, fully unrolled
            lo = h * dh
            qh = q[:, lo:lo + dh]
            kh = k[:, lo:lo + dh]
            vh = v[:, lo:lo + dh]
            s = jnp.dot(qh, kh.T, preferred_element_type=f32) * scale
            m = jnp.max(s, axis=-1, keepdims=True)
            p = jnp.exp(s - m)
            denom = jnp.sum(p, axis=-1, keepdims=True)
            p = p * pl.reciprocal(denom, approx=False)     # exact softmax
            ctx = jnp.dot(p, vh, preferred_element_type=f32)        # (Sq, dh)
            contrib = jnp.dot(ctx, wo_ref[lo:lo + dh, :],
                              preferred_element_type=f32)           # (Sq, E)
            acc = contrib if acc is None else acc + contrib
        return acc + bo_ref[...]

    def ffn(x, w1_ref, b1_ref, w2_ref, b2_ref):
        h = jnp.dot(x, w1_ref[...], preferred_element_type=f32) + b1_ref[...]
        h = jnp.maximum(h, 0.0)
        return jnp.dot(h, w2_ref[...], preferred_element_type=f32) + b2_ref[...]

    # ---- shared inputblock --------------------------------------------------
    enc = jnp.dot(x_enc_ref[0].astype(f32), in_w_ref[...],
                  preferred_element_type=f32) + in_b_ref[...]
    dec = jnp.dot(x_dec_ref[0].astype(f32), in_w_ref[...],
                  preferred_element_type=f32) + in_b_ref[...]

    # ---- encoder layer (post-norm, like nn.TransformerEncoderLayer) --------
    qkv = jnp.dot(enc, e_wqkv_ref[...], preferred_element_type=f32) + e_bqkv_ref[...]
    q, k, v = qkv[:, :E], qkv[:, E:2 * E], qkv[:, 2 * E:]
    x = layernorm(enc + attention(q, k, v, e_wo_ref, e_bo_ref),
                  e_ln1g_ref, e_ln1b_ref)
    memory = layernorm(x + ffn(x, e_w1_ref, e_b1_ref, e_w2_ref, e_b2_ref),
                       e_ln2g_ref, e_ln2b_ref)

    # ---- decoder layer (post-norm, like nn.TransformerDecoderLayer) --------
    qkv = jnp.dot(dec, d_wqkv_ref[...], preferred_element_type=f32) + d_bqkv_ref[...]
    q, k, v = qkv[:, :E], qkv[:, E:2 * E], qkv[:, 2 * E:]
    x = layernorm(dec + attention(q, k, v, d_wos_ref, d_bos_ref),
                  d_ln1g_ref, d_ln1b_ref)

    qc = jnp.dot(x, d_wq_ref[...], preferred_element_type=f32) + d_bq_ref[...]
    kvc = jnp.dot(memory, d_wkv_ref[...], preferred_element_type=f32) + d_bkv_ref[...]
    kc, vc = kvc[:, :E], kvc[:, E:]
    x = layernorm(x + attention(qc, kc, vc, d_woc_ref, d_boc_ref),
                  d_ln2g_ref, d_ln2b_ref)

    logits = layernorm(x + ffn(x, d_w1_ref, d_b1_ref, d_w2_ref, d_b2_ref),
                       d_ln3g_ref, d_ln3b_ref)

    # ---- pooling + outputblock (only the pooled row is projected) ----------
    if pooling_method == "first":
        pooled = logits[0:1, :]                 # == logits[0, :, :] seq-first
    else:                                       # "average"
        pooled = jnp.mean(logits, axis=0, keepdims=True)

    out = jnp.dot(pooled, out_w_ref[...], preferred_element_type=f32) + out_b_ref[...]
    o_ref[0] = out.astype(o_ref.dtype)


# ---------------------------------------------------------------------------
# Forward pass (mirrors WinnerTransformer.forward; inputs are seq-first (S,B,F))
# ---------------------------------------------------------------------------
def winner_transformer_forward(params, x_enc, x_dec, *, nhead, num_classes,
                               pooling_method="first"):
    if pooling_method not in ("first", "average"):
        raise ValueError(pooling_method)

    S_e, B, F = x_enc.shape
    S_d = x_dec.shape[0]
    E = params["in_w"].shape[1]
    C_pad = params["out_w"].shape[1]

    # seq-first -> batch-first once; everything downstream is transpose-free.
    xe = jnp.transpose(x_enc, (1, 0, 2))        # (B, S_e, F)
    xd = jnp.transpose(x_dec, (1, 0, 2))        # (B, S_d, F)

    pe, pd = params["enc"], params["dec"]
    sa_e, sa_d, ca_d = pe["self_attn"], pd["self_attn"], pd["cross_attn"]

    # flat weight list in the exact order of the kernel signature
    weight_args = [
        params["in_w"], params["in_b"],
        sa_e["wqkv"], sa_e["bqkv"], sa_e["wo"], sa_e["bo"],
        pe["ln1_g"], pe["ln1_b"],
        pe["ff_w1"], pe["ff_b1"], pe["ff_w2"], pe["ff_b2"],
        pe["ln2_g"], pe["ln2_b"],
        sa_d["wqkv"], sa_d["bqkv"], sa_d["wo"], sa_d["bo"],
        pd["ln1_g"], pd["ln1_b"],
        ca_d["wq"], ca_d["bq"], ca_d["wkv"], ca_d["bkv"], ca_d["wo"], ca_d["bo"],
        pd["ln2_g"], pd["ln2_b"],
        pd["ff_w1"], pd["ff_b1"], pd["ff_w2"], pd["ff_b2"],
        pd["ln3_g"], pd["ln3_b"],
        params["out_w"], params["out_b"],
    ]

    def wspec(a):
        # pinned, constant-index, full-size weight block (all weights are 2D)
        return pl.BlockSpec(a.shape, lambda b: (0, 0))

    in_specs = (
        [pl.BlockSpec((1, S_e, F), lambda b: (b, 0, 0)),
         pl.BlockSpec((1, S_d, F), lambda b: (b, 0, 0))]
        + [wspec(a) for a in weight_args]
    )

    dim_ff = pe["ff_w1"].shape[1]
    flops = 2 * B * (
        (S_e + S_d) * F * E                       # shared input linear
        + (S_e + S_d) * E * 3 * E                 # self-attn QKV projections
        + S_d * E * E + S_e * E * 2 * E           # cross-attn Q and K|V proj
        + 2 * E * (S_e * S_e + S_d * S_d + S_d * S_e)   # scores + p@v (all heads)
        + (S_e + 2 * S_d) * E * E                 # attention output projections
        + 2 * (S_e + S_d) * E * dim_ff            # FFNs
        + E * C_pad                               # output block (pooled row)
    )
    trans = B * nhead * (S_e * S_e + S_d * S_d + S_d * S_e)
    bytes_acc = 4 * (B * (S_e + S_d) * F + B * C_pad
                     + sum(int(w.size) for w in weight_args))

    out = pl.pallas_call(
        functools.partial(_winner_kernel, nhead=nhead, eps=1e-5,
                          pooling_method=pooling_method),
        out_shape=jax.ShapeDtypeStruct((B, 1, C_pad), x_enc.dtype),
        grid=(B,),
        in_specs=in_specs,
        out_specs=pl.BlockSpec((1, 1, C_pad), lambda b: (b, 0, 0)),
        compiler_params=pltpu.CompilerParams(
            dimension_semantics=("parallel",),
            vmem_limit_bytes=32 * 1024 * 1024),
        cost_estimate=pl.CostEstimate(flops=flops, transcendentals=trans,
                                      bytes_accessed=bytes_acc),
    )(xe, xd, *weight_args)

    return out[:, 0, :num_classes]


# ---------------------------------------------------------------------------
# Deterministic parameter initialization (biases / LN params stored as (1, N),
# output weights stored pre-padded to a lane-dense 128-wide matrix).
# ---------------------------------------------------------------------------
def _lin_init(key, fan_in, fan_out, scale=0.05):
    kw, kb = jax.random.split(key)
    w = scale * jax.random.normal(kw, (fan_in, fan_out), jnp.float32)
    b = scale * jax.random.normal(kb, (fan_out,), jnp.float32)
    return w, b


def _self_attn_init(key, d_model):
    ks = jax.random.split(key, 4)
    wq, bq = _lin_init(ks[0], d_model, d_model)
    wk, bk = _lin_init(ks[1], d_model, d_model)
    wv, bv = _lin_init(ks[2], d_model, d_model)
    wo, bo = _lin_init(ks[3], d_model, d_model)
    return dict(wqkv=jnp.concatenate([wq, wk, wv], axis=1),          # (E, 3E)
                bqkv=jnp.concatenate([bq, bk, bv]).reshape(1, 3 * d_model),
                wo=wo, bo=bo.reshape(1, d_model))


def _cross_attn_init(key, d_model):
    ks = jax.random.split(key, 4)
    wq, bq = _lin_init(ks[0], d_model, d_model)
    wk, bk = _lin_init(ks[1], d_model, d_model)
    wv, bv = _lin_init(ks[2], d_model, d_model)
    wo, bo = _lin_init(ks[3], d_model, d_model)
    return dict(wq=wq, bq=bq.reshape(1, d_model),
                wkv=jnp.concatenate([wk, wv], axis=1),               # (E, 2E)
                bkv=jnp.concatenate([bk, bv]).reshape(1, 2 * d_model),
                wo=wo, bo=bo.reshape(1, d_model))


def init_params(key, in_features, d_model, dim_ff, num_classes):
    ks = jax.random.split(key, 10)
    ones = jnp.ones((1, d_model), jnp.float32)
    zeros = jnp.zeros((1, d_model), jnp.float32)

    in_w, in_b = _lin_init(ks[0], in_features, d_model)

    # output block: pad columns to a lane-dense multiple of 128 ONCE, here.
    c_pad = ((num_classes + 127) // 128) * 128
    ow, ob = _lin_init(ks[1], d_model, num_classes)
    out_w = jnp.zeros((d_model, c_pad), jnp.float32).at[:, :num_classes].set(ow)
    out_b = jnp.zeros((1, c_pad), jnp.float32).at[0, :num_classes].set(ob)

    e_w1, e_b1 = _lin_init(ks[2], d_model, dim_ff)
    e_w2, e_b2 = _lin_init(ks[3], dim_ff, d_model)
    enc = dict(self_attn=_self_attn_init(ks[4], d_model),
               ff_w1=e_w1, ff_b1=e_b1.reshape(1, dim_ff),
               ff_w2=e_w2, ff_b2=e_b2.reshape(1, d_model),
               ln1_g=ones, ln1_b=zeros, ln2_g=ones, ln2_b=zeros)

    d_w1, d_b1 = _lin_init(ks[5], d_model, dim_ff)
    d_w2, d_b2 = _lin_init(ks[6], dim_ff, d_model)
    dec = dict(self_attn=_self_attn_init(ks[7], d_model),
               cross_attn=_cross_attn_init(ks[8], d_model),
               ff_w1=d_w1, ff_b1=d_b1.reshape(1, dim_ff),
               ff_w2=d_w2, ff_b2=d_b2.reshape(1, d_model),
               ln1_g=ones, ln1_b=zeros, ln2_g=ones, ln2_b=zeros,
               ln3_g=ones, ln3_b=zeros)

    return dict(in_w=in_w, in_b=in_b.reshape(1, d_model),
                out_w=out_w, out_b=out_b, enc=enc, dec=dec)


# ---------------------------------------------------------------------------
if __name__ == "__main__":
    # small, lane-friendly shapes (E = nhead*dh = 128 puts heads on lanes)
    S_ENC, S_DEC, BATCH = 8, 8, 2
    IN_FEATURES, D_MODEL, NHEAD, DIM_FF, NUM_CLASSES = 16, 128, 4, 256, 10

    key = jax.random.PRNGKey(0)
    k_par, k_enc, k_dec = jax.random.split(key, 3)

    params = init_params(k_par, IN_FEATURES, D_MODEL, DIM_FF, NUM_CLASSES)
    x_enc = jax.random.normal(k_enc, (S_ENC, BATCH, IN_FEATURES), jnp.float32)
    x_dec = jax.random.normal(k_dec, (S_DEC, BATCH, IN_FEATURES), jnp.float32)

    fwd = jax.jit(functools.partial(winner_transformer_forward,
                                    nhead=NHEAD, num_classes=NUM_CLASSES,
                                    pooling_method="first"))
    out = jax.block_until_ready(fwd(params, x_enc, x_dec))

    assert out.shape == (BATCH, NUM_CLASSES), out.shape
    assert bool(jnp.all(jnp.isfinite(out)))
    print("KERNEL_OK")
</pallas_src>

<mosaic_0001>
module attributes {stable_mosaic.version = 11 : i64} {
  func.func @_winner_kernel(%arg0: i32, %arg1: memref<1x8x16xf32, #tpu.memory_space<vmem>>, %arg2: memref<1x8x16xf32, #tpu.memory_space<vmem>>, %arg3: memref<16x128xf32, #tpu.memory_space<vmem>>, %arg4: memref<1x128xf32, #tpu.memory_space<vmem>>, %arg5: memref<128x384xf32, #tpu.memory_space<vmem>>, %arg6: memref<1x384xf32, #tpu.memory_space<vmem>>, %arg7: memref<128x128xf32, #tpu.memory_space<vmem>>, %arg8: memref<1x128xf32, #tpu.memory_space<vmem>>, %arg9: memref<1x128xf32, #tpu.memory_space<vmem>>, %arg10: memref<1x128xf32, #tpu.memory_space<vmem>>, %arg11: memref<128x256xf32, #tpu.memory_space<vmem>>, %arg12: memref<1x256xf32, #tpu.memory_space<vmem>>, %arg13: memref<256x128xf32, #tpu.memory_space<vmem>>, %arg14: memref<1x128xf32, #tpu.memory_space<vmem>>, %arg15: memref<1x128xf32, #tpu.memory_space<vmem>>, %arg16: memref<1x128xf32, #tpu.memory_space<vmem>>, %arg17: memref<128x384xf32, #tpu.memory_space<vmem>>, %arg18: memref<1x384xf32, #tpu.memory_space<vmem>>, %arg19: memref<128x128xf32, #tpu.memory_space<vmem>>, %arg20: memref<1x128xf32, #tpu.memory_space<vmem>>, %arg21: memref<1x128xf32, #tpu.memory_space<vmem>>, %arg22: memref<1x128xf32, #tpu.memory_space<vmem>>, %arg23: memref<128x128xf32, #tpu.memory_space<vmem>>, %arg24: memref<1x128xf32, #tpu.memory_space<vmem>>, %arg25: memref<128x256xf32, #tpu.memory_space<vmem>>, %arg26: memref<1x256xf32, #tpu.memory_space<vmem>>, %arg27: memref<128x128xf32, #tpu.memory_space<vmem>>, %arg28: memref<1x128xf32, #tpu.memory_space<vmem>>, %arg29: memref<1x128xf32, #tpu.memory_space<vmem>>, %arg30: memref<1x128xf32, #tpu.memory_space<vmem>>, %arg31: memref<128x256xf32, #tpu.memory_space<vmem>>, %arg32: memref<1x256xf32, #tpu.memory_space<vmem>>, %arg33: memref<256x128xf32, #tpu.memory_space<vmem>>, %arg34: memref<1x128xf32, #tpu.memory_space<vmem>>, %arg35: memref<1x128xf32, #tpu.memory_space<vmem>>, %arg36: memref<1x128xf32, #tpu.memory_space<vmem>>, %arg37: memref<128x128xf32, #tpu.memory_space<vmem>>, %arg38: memref<1x128xf32, #tpu.memory_space<vmem>>, %arg39: memref<1x1x128xf32, #tpu.memory_space<vmem>>) attributes {dimension_semantics = [#tpu.dimension_semantics<parallel>], iteration_bounds = array<i64: 2>, scalar_prefetch = 0 : i64, scratch_operands = 0 : i64, tpu.core_type = #tpu.core_type<tc>, window_params = [{transform_indices = @transform_0, window_bounds = array<i64: 1, 8, 16>}, {transform_indices = @transform_1, window_bounds = array<i64: 1, 8, 16>}, {pipeline_mode = #tpu.pipeline_mode<synchronous>, transform_indices = @transform_2, window_bounds = array<i64: 16, 128>}, {pipeline_mode = #tpu.pipeline_mode<synchronous>, transform_indices = @transform_3, window_bounds = array<i64: 1, 128>}, {pipeline_mode = #tpu.pipeline_mode<synchronous>, transform_indices = @transform_4, window_bounds = array<i64: 128, 384>}, {pipeline_mode = #tpu.pipeline_mode<synchronous>, transform_indices = @transform_5, window_bounds = array<i64: 1, 384>}, {pipeline_mode = #tpu.pipeline_mode<synchronous>, transform_indices = @transform_6, window_bounds = array<i64: 128, 128>}, {pipeline_mode = #tpu.pipeline_mode<synchronous>, transform_indices = @transform_7, window_bounds = array<i64: 1, 128>}, {pipeline_mode = #tpu.pipeline_mode<synchronous>, transform_indices = @transform_8, window_bounds = array<i64: 1, 128>}, {pipeline_mode = #tpu.pipeline_mode<synchronous>, transform_indices = @transform_9, window_bounds = array<i64: 1, 128>}, {pipeline_mode = #tpu.pipeline_mode<synchronous>, transform_indices = @transform_10, window_bounds = array<i64: 128, 256>}, {pipeline_mode = #tpu.pipeline_mode<synchronous>, transform_indices = @transform_11, window_bounds = array<i64: 1, 256>}, {pipeline_mode = #tpu.pipeline_mode<synchronous>, transform_indices = @transform_12, window_bounds = array<i64: 256, 128>}, {pipeline_mode = #tpu.pipeline_mode<synchronous>, transform_indices = @transform_13, window_bounds = array<i64: 1, 128>}, {pipeline_mode = #tpu.pipeline_mode<synchronous>, transform_indices = @transform_14, window_bounds = array<i64: 1, 128>}, {pipeline_mode = #tpu.pipeline_mode<synchronous>, transform_indices = @transform_15, window_bounds = array<i64: 1, 128>}, {pipeline_mode = #tpu.pipeline_mode<synchronous>, transform_indices = @transform_16, window_bounds = array<i64: 128, 384>}, {pipeline_mode = #tpu.pipeline_mode<synchronous>, transform_indices = @transform_17, window_bounds = array<i64: 1, 384>}, {pipeline_mode = #tpu.pipeline_mode<synchronous>, transform_indices = @transform_18, window_bounds = array<i64: 128, 128>}, {pipeline_mode = #tpu.pipeline_mode<synchronous>, transform_indices = @transform_19, window_bounds = array<i64: 1, 128>}, {pipeline_mode = #tpu.pipeline_mode<synchronous>, transform_indices = @transform_20, window_bounds = array<i64: 1, 128>}, {pipeline_mode = #tpu.pipeline_mode<synchronous>, transform_indices = @transform_21, window_bounds = array<i64: 1, 128>}, {pipeline_mode = #tpu.pipeline_mode<synchronous>, transform_indices = @transform_22, window_bounds = array<i64: 128, 128>}, {pipeline_mode = #tpu.pipeline_mode<synchronous>, transform_indices = @transform_23, window_bounds = array<i64: 1, 128>}, {pipeline_mode = #tpu.pipeline_mode<synchronous>, transform_indices = @transform_24, window_bounds = array<i64: 128, 256>}, {pipeline_mode = #tpu.pipeline_mode<synchronous>, transform_indices = @transform_25, window_bounds = array<i64: 1, 256>}, {pipeline_mode = #tpu.pipeline_mode<synchronous>, transform_indices = @transform_26, window_bounds = array<i64: 128, 128>}, {pipeline_mode = #tpu.pipeline_mode<synchronous>, transform_indices = @transform_27, window_bounds = array<i64: 1, 128>}, {pipeline_mode = #tpu.pipeline_mode<synchronous>, transform_indices = @transform_28, window_bounds = array<i64: 1, 128>}, {pipeline_mode = #tpu.pipeline_mode<synchronous>, transform_indices = @transform_29, window_bounds = array<i64: 1, 128>}, {pipeline_mode = #tpu.pipeline_mode<synchronous>, transform_indices = @transform_30, window_bounds = array<i64: 128, 256>}, {pipeline_mode = #tpu.pipeline_mode<synchronous>, transform_indices = @transform_31, window_bounds = array<i64: 1, 256>}, {pipeline_mode = #tpu.pipeline_mode<synchronous>, transform_indices = @transform_32, window_bounds = array<i64: 256, 128>}, {pipeline_mode = #tpu.pipeline_mode<synchronous>, transform_indices = @transform_33, window_bounds = array<i64: 1, 128>}, {pipeline_mode = #tpu.pipeline_mode<synchronous>, transform_indices = @transform_34, window_bounds = array<i64: 1, 128>}, {pipeline_mode = #tpu.pipeline_mode<synchronous>, transform_indices = @transform_35, window_bounds = array<i64: 1, 128>}, {pipeline_mode = #tpu.pipeline_mode<synchronous>, transform_indices = @transform_36, window_bounds = array<i64: 128, 128>}, {pipeline_mode = #tpu.pipeline_mode<synchronous>, transform_indices = @transform_37, window_bounds = array<i64: 1, 128>}, {transform_indices = @transform_38, window_bounds = array<i64: 1, 1, 128>}]} {
    %c0 = arith.constant 0 : index
    %c0_0 = arith.constant 0 : index
    %c0_1 = arith.constant 0 : index
    %0 = vector.load %arg1[%c0, %c0_0, %c0_1] : memref<1x8x16xf32, #tpu.memory_space<vmem>>, vector<1x8x16xf32>
    %1 = vector.shape_cast %0 : vector<1x8x16xf32> to vector<8x16xf32>
    %c0_2 = arith.constant 0 : index
    %c0_3 = arith.constant 0 : index
    %2 = vector.load %arg3[%c0_2, %c0_3] : memref<16x128xf32, #tpu.memory_space<vmem>>, vector<16x128xf32>
    %cst = arith.constant dense<0.000000e+00> : vector<8x128xf32>
    %3 = tpu.matmul %1, %2, %cst {dimension_numbers = #tpu.dot_dimension_numbers<[1], [0], [0], [1], [0, 0, 1, 1], [], []>} : vector<8x16xf32>, vector<16x128xf32>, vector<8x128xf32> -> vector<8x128xf32>
    %c0_4 = arith.constant 0 : index
    %c0_5 = arith.constant 0 : index
    %4 = vector.load %arg4[%c0_4, %c0_5] : memref<1x128xf32, #tpu.memory_space<vmem>>, vector<1x128xf32>
    %5 = vector.broadcast %4 : vector<1x128xf32> to vector<8x128xf32>
    %6 = arith.addf %3, %5 : vector<8x128xf32>
    %c0_6 = arith.constant 0 : index
    %c0_7 = arith.constant 0 : index
    %c0_8 = arith.constant 0 : index
    %7 = vector.load %arg2[%c0_6, %c0_7, %c0_8] : memref<1x8x16xf32, #tpu.memory_space<vmem>>, vector<1x8x16xf32>
    %8 = vector.shape_cast %7 : vector<1x8x16xf32> to vector<8x16xf32>
    %c0_9 = arith.constant 0 : index
    %c0_10 = arith.constant 0 : index
    %9 = vector.load %arg3[%c0_9, %c0_10] : memref<16x128xf32, #tpu.memory_space<vmem>>, vector<16x128xf32>
    %cst_11 = arith.constant dense<0.000000e+00> : vector<8x128xf32>
    %10 = tpu.matmul %8, %9, %cst_11 {dimension_numbers = #tpu.dot_dimension_numbers<[1], [0], [0], [1], [0, 0, 1, 1], [], []>} : vector<8x16xf32>, vector<16x128xf32>, vector<8x128xf32> -> vector<8x128xf32>
    %c0_12 = arith.constant 0 : index
    %c0_13 = arith.constant 0 : index
    %11 = vector.load %arg4[%c0_12, %c0_13] : memref<1x128xf32, #tpu.memory_space<vmem>>, vector<1x128xf32>
    %12 = vector.broadcast %11 : vector<1x128xf32> to vector<8x128xf32>
    %13 = arith.addf %10, %12 : vector<8x128xf32>
    %c0_14 = arith.constant 0 : index
    %c0_15 = arith.constant 0 : index
    %14 = vector.load %arg5[%c0_14, %c0_15] : memref<128x384xf32, #tpu.memory_space<vmem>>, vector<128x384xf32>
    %cst_16 = arith.constant dense<0.000000e+00> : vector<8x384xf32>
    %15 = tpu.matmul %6, %14, %cst_16 {dimension_numbers = #tpu.dot_dimension_numbers<[1], [0], [0], [1], [0, 0, 1, 1], [], []>} : vector<8x128xf32>, vector<128x384xf32>, vector<8x384xf32> -> vector<8x384xf32>
    %c0_17 = arith.constant 0 : index
    %c0_18 = arith.constant 0 : index
    %16 = vector.load %arg6[%c0_17, %c0_18] : memref<1x384xf32, #tpu.memory_space<vmem>>, vector<1x384xf32>
    %17 = vector.broadcast %16 : vector<1x384xf32> to vector<8x384xf32>
    %18 = arith.addf %15, %17 : vector<8x384xf32>
    %19 = vector.extract_strided_slice %18 {offsets = [0, 0], sizes = [8, 128], strides = [1, 1]} : vector<8x384xf32> to vector<8x128xf32>
    %20 = vector.extract_strided_slice %18 {offsets = [0, 128], sizes = [8, 128], strides = [1, 1]} : vector<8x384xf32> to vector<8x128xf32>
    %21 = vector.extract_strided_slice %18 {offsets = [0, 256], sizes = [8, 128], strides = [1, 1]} : vector<8x384xf32> to vector<8x128xf32>
    %22 = vector.extract_strided_slice %19 {offsets = [0, 0], sizes = [8, 32], strides = [1, 1]} : vector<8x128xf32> to vector<8x32xf32>
    %23 = vector.extract_strided_slice %20 {offsets = [0, 0], sizes = [8, 32], strides = [1, 1]} : vector<8x128xf32> to vector<8x32xf32>
    %24 = vector.extract_strided_slice %21 {offsets = [0, 0], sizes = [8, 32], strides = [1, 1]} : vector<8x128xf32> to vector<8x32xf32>
    %25 = tpu.transpose %23, [1, 0] : vector<8x32xf32> -> vector<32x8xf32>
    %cst_19 = arith.constant dense<0.000000e+00> : vector<8x8xf32>
    %26 = tpu.matmul %22, %25, %cst_19 {dimension_numbers = #tpu.dot_dimension_numbers<[1], [0], [0], [1], [0, 0, 1, 1], [], []>} : vector<8x32xf32>, vector<32x8xf32>, vector<8x8xf32> -> vector<8x8xf32>
    %cst_20 = arith.constant 0.176776692 : f32
    %27 = vector.broadcast %cst_20 : f32 to vector<8x8xf32>
    %28 = arith.mulf %26, %27 : vector<8x8xf32>
    %cst_21 = arith.constant dense<0xFF800000> : vector<8xf32>
    %29 = vector.multi_reduction <maximumf>, %28, %cst_21 [1] : vector<8x8xf32> to vector<8xf32>
    %30 = vector.shape_cast %29 : vector<8xf32> to vector<8x1xf32>
    %31 = vector.broadcast %30 : vector<8x1xf32> to vector<8x8xf32>
    %32 = arith.subf %28, %31 : vector<8x8xf32>
    %33 = math.exp %32 : vector<8x8xf32>
    %cst_22 = arith.constant dense<0.000000e+00> : vector<8xf32>
    %34 = vector.multi_reduction <add>, %33, %cst_22 [1] : vector<8x8xf32> to vector<8xf32>
    %35 = vector.shape_cast %34 : vector<8xf32> to vector<8x1xf32>
    %36 = tpu.reciprocal %35 : vector<8x1xf32> -> vector<8x1xf32>
    %37 = vector.broadcast %36 : vector<8x1xf32> to vector<8x8xf32>
    %38 = arith.mulf %33, %37 : vector<8x8xf32>
    %cst_23 = arith.constant dense<0.000000e+00> : vector<8x32xf32>
    %39 = tpu.matmul %38, %24, %cst_23 {dimension_numbers = #tpu.dot_dimension_numbers<[1], [0], [0], [1], [0, 0, 1, 1], [], []>} : vector<8x8xf32>, vector<8x32xf32>, vector<8x32xf32> -> vector<8x32xf32>
    %c0_24 = arith.constant 0 : index
    %c0_25 = arith.constant 0 : index
    %40 = vector.load %arg7[%c0_24, %c0_25] : memref<128x128xf32, #tpu.memory_space<vmem>>, vector<32x128xf32>
    %cst_26 = arith.constant dense<0.000000e+00> : vector<8x128xf32>
    %41 = tpu.matmul %39, %40, %cst_26 {dimension_numbers = #tpu.dot_dimension_numbers<[1], [0], [0], [1], [0, 0, 1, 1], [], []>} : vector<8x32xf32>, vector<32x128xf32>, vector<8x128xf32> -> vector<8x128xf32>
    %42 = vector.extract_strided_slice %19 {offsets = [0, 32], sizes = [8, 32], strides = [1, 1]} : vector<8x128xf32> to vector<8x32xf32>
    %43 = vector.extract_strided_slice %20 {offsets = [0, 32], sizes = [8, 32], strides = [1, 1]} : vector<8x128xf32> to vector<8x32xf32>
    %44 = vector.extract_strided_slice %21 {offsets = [0, 32], sizes = [8, 32], strides = [1, 1]} : vector<8x128xf32> to vector<8x32xf32>
    %45 = tpu.transpose %43, [1, 0] : vector<8x32xf32> -> vector<32x8xf32>
    %cst_27 = arith.constant dense<0.000000e+00> : vector<8x8xf32>
    %46 = tpu.matmul %42, %45, %cst_27 {dimension_numbers = #tpu.dot_dimension_numbers<[1], [0], [0], [1], [0, 0, 1, 1], [], []>} : vector<8x32xf32>, vector<32x8xf32>, vector<8x8xf32> -> vector<8x8xf32>
    %cst_28 = arith.constant 0.176776692 : f32
    %47 = vector.broadcast %cst_28 : f32 to vector<8x8xf32>
    %48 = arith.mulf %46, %47 : vector<8x8xf32>
    %cst_29 = arith.constant dense<0xFF800000> : vector<8xf32>
    %49 = vector.multi_reduction <maximumf>, %48, %cst_29 [1] : vector<8x8xf32> to vector<8xf32>
    %50 = vector.shape_cast %49 : vector<8xf32> to vector<8x1xf32>
    %51 = vector.broadcast %50 : vector<8x1xf32> to vector<8x8xf32>
    %52 = arith.subf %48, %51 : vector<8x8xf32>
    %53 = math.exp %52 : vector<8x8xf32>
    %cst_30 = arith.constant dense<0.000000e+00> : vector<8xf32>
    %54 = vector.multi_reduction <add>, %53, %cst_30 [1] : vector<8x8xf32> to vector<8xf32>
    %55 = vector.shape_cast %54 : vector<8xf32> to vector<8x1xf32>
    %56 = tpu.reciprocal %55 : vector<8x1xf32> -> vector<8x1xf32>
    %57 = vector.broadcast %56 : vector<8x1xf32> to vector<8x8xf32>
    %58 = arith.mulf %53, %57 : vector<8x8xf32>
    %cst_31 = arith.constant dense<0.000000e+00> : vector<8x32xf32>
    %59 = tpu.matmul %58, %44, %cst_31 {dimension_numbers = #tpu.dot_dimension_numbers<[1], [0], [0], [1], [0, 0, 1, 1], [], []>} : vector<8x8xf32>, vector<8x32xf32>, vector<8x32xf32> -> vector<8x32xf32>
    %c32 = arith.constant 32 : index
    %c0_32 = arith.constant 0 : index
    %60 = vector.load %arg7[%c32, %c0_32] : memref<128x128xf32, #tpu.memory_space<vmem>>, vector<32x128xf32>
    %cst_33 = arith.constant dense<0.000000e+00> : vector<8x128xf32>
    %61 = tpu.matmul %59, %60, %cst_33 {dimension_numbers = #tpu.dot_dimension_numbers<[1], [0], [0], [1], [0, 0, 1, 1], [], []>} : vector<8x32xf32>, vector<32x128xf32>, vector<8x128xf32> -> vector<8x128xf32>
    %62 = arith.addf %41, %61 : vector<8x128xf32>
    %63 = vector.extract_strided_slice %19 {offsets = [0, 64], sizes = [8, 32], strides = [1, 1]} : vector<8x128xf32> to vector<8x32xf32>
    %64 = vector.extract_strided_slice %20 {offsets = [0, 64], sizes = [8, 32], strides = [1, 1]} : vector<8x128xf32> to vector<8x32xf32>
    %65 = vector.extract_strided_slice %21 {offsets = [0, 64], sizes = [8, 32], strides = [1, 1]} : vector<8x128xf32> to vector<8x32xf32>
    %66 = tpu.transpose %64, [1, 0] : vector<8x32xf32> -> vector<32x8xf32>
    %cst_34 = arith.constant dense<0.000000e+00> : vector<8x8xf32>
    %67 = tpu.matmul %63, %66, %cst_34 {dimension_numbers = #tpu.dot_dimension_numbers<[1], [0], [0], [1], [0, 0, 1, 1], [], []>} : vector<8x32xf32>, vector<32x8xf32>, vector<8x8xf32> -> vector<8x8xf32>
    %cst_35 = arith.constant 0.176776692 : f32
    %68 = vector.broadcast %cst_35 : f32 to vector<8x8xf32>
    %69 = arith.mulf %67, %68 : vector<8x8xf32>
    %cst_36 = arith.constant dense<0xFF800000> : vector<8xf32>
    %70 = vector.multi_reduction <maximumf>, %69, %cst_36 [1] : vector<8x8xf32> to vector<8xf32>
    %71 = vector.shape_cast %70 : vector<8xf32> to vector<8x1xf32>
    %72 = vector.broadcast %71 : vector<8x1xf32> to vector<8x8xf32>
    %73 = arith.subf %69, %72 : vector<8x8xf32>
    %74 = math.exp %73 : vector<8x8xf32>
    %cst_37 = arith.constant dense<0.000000e+00> : vector<8xf32>
    %75 = vector.multi_reduction <add>, %74, %cst_37 [1] : vector<8x8xf32> to vector<8xf32>
    %76 = vector.shape_cast %75 : vector<8xf32> to vector<8x1xf32>
    %77 = tpu.reciprocal %76 : vector<8x1xf32> -> vector<8x1xf32>
    %78 = vector.broadcast %77 : vector<8x1xf32> to vector<8x8xf32>
    %79 = arith.mulf %74, %78 : vector<8x8xf32>
    %cst_38 = arith.constant dense<0.000000e+00> : vector<8x32xf32>
    %80 = tpu.matmul %79, %65, %cst_38 {dimension_numbers = #tpu.dot_dimension_numbers<[1], [0], [0], [1], [0, 0, 1, 1], [], []>} : vector<8x8xf32>, vector<8x32xf32>, vector<8x32xf32> -> vector<8x32xf32>
    %c64 = arith.constant 64 : index
    %c0_39 = arith.constant 0 : index
    %81 = vector.load %arg7[%c64, %c0_39] : memref<128x128xf32, #tpu.memory_space<vmem>>, vector<32x128xf32>
    %cst_40 = arith.constant dense<0.000000e+00> : vector<8x128xf32>
    %82 = tpu.matmul %80, %81, %cst_40 {dimension_numbers = #tpu.dot_dimension_numbers<[1], [0], [0], [1], [0, 0, 1, 1], [], []>} : vector<8x32xf32>, vector<32x128xf32>, vector<8x128xf32> -> vector<8x128xf32>
    %83 = arith.addf %62, %82 : vector<8x128xf32>
    %84 = vector.extract_strided_slice %19 {offsets = [0, 96], sizes = [8, 32], strides = [1, 1]} : vector<8x128xf32> to vector<8x32xf32>
    %85 = vector.extract_strided_slice %20 {offsets = [0, 96], sizes = [8, 32], strides = [1, 1]} : vector<8x128xf32> to vector<8x32xf32>
    %86 = vector.extract_strided_slice %21 {offsets = [0, 96], sizes = [8, 32], strides = [1, 1]} : vector<8x128xf32> to vector<8x32xf32>
    %87 = tpu.transpose %85, [1, 0] : vector<8x32xf32> -> vector<32x8xf32>
    %cst_41 = arith.constant dense<0.000000e+00> : vector<8x8xf32>
    %88 = tpu.matmul %84, %87, %cst_41 {dimension_numbers = #tpu.dot_dimension_numbers<[1], [0], [0], [1], [0, 0, 1, 1], [], []>} : vector<8x32xf32>, vector<32x8xf32>, vector<8x8xf32> -> vector<8x8xf32>
    %cst_42 = arith.constant 0.176776692 : f32
    %89 = vector.broadcast %cst_42 : f32 to vector<8x8xf32>
    %90 = arith.mulf %88, %89 : vector<8x8xf32>
    %cst_43 = arith.constant dense<0xFF800000> : vector<8xf32>
    %91 = vector.multi_reduction <maximumf>, %90, %cst_43 [1] : vector<8x8xf32> to vector<8xf32>
    %92 = vector.shape_cast %91 : vector<8xf32> to vector<8x1xf32>
    %93 = vector.broadcast %92 : vector<8x1xf32> to vector<8x8xf32>
    %94 = arith.subf %90, %93 : vector<8x8xf32>
    %95 = math.exp %94 : vector<8x8xf32>
    %cst_44 = arith.constant dense<0.000000e+00> : vector<8xf32>
    %96 = vector.multi_reduction <add>, %95, %cst_44 [1] : vector<8x8xf32> to vector<8xf32>
    %97 = vector.shape_cast %96 : vector<8xf32> to vector<8x1xf32>
    %98 = tpu.reciprocal %97 : vector<8x1xf32> -> vector<8x1xf32>
    %99 = vector.broadcast %98 : vector<8x1xf32> to vector<8x8xf32>
    %100 = arith.mulf %95, %99 : vector<8x8xf32>
    %cst_45 = arith.constant dense<0.000000e+00> : vector<8x32xf32>
    %101 = tpu.matmul %100, %86, %cst_45 {dimension_numbers = #tpu.dot_dimension_numbers<[1], [0], [0], [1], [0, 0, 1, 1], [], []>} : vector<8x8xf32>, vector<8x32xf32>, vector<8x32xf32> -> vector<8x32xf32>
    %c96 = arith.constant 96 : index
    %c0_46 = arith.constant 0 : index
    %102 = vector.load %arg7[%c96, %c0_46] : memref<128x128xf32, #tpu.memory_space<vmem>>, vector<32x128xf32>
    %cst_47 = arith.constant dense<0.000000e+00> : vector<8x128xf32>
    %103 = tpu.matmul %101, %102, %cst_47 {dimension_numbers = #tpu.dot_dimension_numbers<[1], [0], [0], [1], [0, 0, 1, 1], [], []>} : vector<8x32xf32>, vector<32x128xf32>, vector<8x128xf32> -> vector<8x128xf32>
    %104 = arith.addf %83, %103 : vector<8x128xf32>
    %c0_48 = arith.constant 0 : index
    %c0_49 = arith.constant 0 : index
    %105 = vector.load %arg8[%c0_48, %c0_49] : memref<1x128xf32, #tpu.memory_space<vmem>>, vector<1x128xf32>
    %106 = vector.broadcast %105 : vector<1x128xf32> to vector<8x128xf32>
    %107 = arith.addf %104, %106 : vector<8x128xf32>
    %108 = arith.addf %6, %107 : vector<8x128xf32>
    %cst_50 = arith.constant dense<0.000000e+00> : vector<8xf32>
    %109 = vector.multi_reduction <add>, %108, %cst_50 [1] : vector<8x128xf32> to vector<8xf32>
    %110 = vector.shape_cast %109 : vector<8xf32> to vector<8x1xf32>
    %cst_51 = arith.constant 1.280000e+02 : f32
    %111 = vector.broadcast %cst_51 : f32 to vector<8x1xf32>
    %112 = arith.divf %110, %111 : vector<8x1xf32>
    %113 = vector.broadcast %112 : vector<8x1xf32> to vector<8x128xf32>
    %114 = arith.subf %108, %113 : vector<8x128xf32>
    %115 = arith.mulf %114, %114 : vector<8x128xf32>
    %cst_52 = arith.constant dense<0.000000e+00> : vector<8xf32>
    %116 = vector.multi_reduction <add>, %115, %cst_52 [1] : vector<8x128xf32> to vector<8xf32>
    %117 = vector.shape_cast %116 : vector<8xf32> to vector<8x1xf32>
    %cst_53 = arith.constant 1.280000e+02 : f32
    %118 = vector.broadcast %cst_53 : f32 to vector<8x1xf32>
    %119 = arith.divf %117, %118 : vector<8x1xf32>
    %cst_54 = arith.constant 9.99999974E-6 : f32
    %120 = vector.broadcast %cst_54 : f32 to vector<8x1xf32>
    %121 = arith.addf %119, %120 : vector<8x1xf32>
    %122 = math.rsqrt %121 : vector<8x1xf32>
    %123 = vector.broadcast %122 : vector<8x1xf32> to vector<8x128xf32>
    %124 = arith.mulf %114, %123 : vector<8x128xf32>
    %c0_55 = arith.constant 0 : index
    %c0_56 = arith.constant 0 : index
    %125 = vector.load %arg9[%c0_55, %c0_56] : memref<1x128xf32, #tpu.memory_space<vmem>>, vector<1x128xf32>
    %126 = vector.broadcast %125 : vector<1x128xf32> to vector<8x128xf32>
    %127 = arith.mulf %124, %126 : vector<8x128xf32>
    %c0_57 = arith.constant 0 : index
    %c0_58 = arith.constant 0 : index
    %128 = vector.load %arg10[%c0_57, %c0_58] : memref<1x128xf32, #tpu.memory_space<vmem>>, vector<1x128xf32>
    %129 = vector.broadcast %128 : vector<1x128xf32> to vector<8x128xf32>
    %130 = arith.addf %127, %129 : vector<8x128xf32>
    %c0_59 = arith.constant 0 : index
    %c0_60 = arith.constant 0 : index
    %131 = vector.load %arg11[%c0_59, %c0_60] : memref<128x256xf32, #tpu.memory_space<vmem>>, vector<128x256xf32>
    %cst_61 = arith.constant dense<0.000000e+00> : vector<8x256xf32>
    %132 = tpu.matmul %130, %131, %cst_61 {dimension_numbers = #tpu.dot_dimension_numbers<[1], [0], [0], [1], [0, 0, 1, 1], [], []>} : vector<8x128xf32>, vector<128x256xf32>, vector<8x256xf32> -> vector<8x256xf32>
    %c0_62 = arith.constant 0 : index
    %c0_63 = arith.constant 0 : index
    %133 = vector.load %arg12[%c0_62, %c0_63] : memref<1x256xf32, #tpu.memory_space<vmem>>, vector<1x256xf32>
    %134 = vector.broadcast %133 : vector<1x256xf32> to vector<8x256xf32>
    %135 = arith.addf %132, %134 : vector<8x256xf32>
    %cst_64 = arith.constant 0.000000e+00 : f32
    %136 = vector.broadcast %cst_64 : f32 to vector<8x256xf32>
    %137 = arith.maximumf %135, %136 : vector<8x256xf32>
    %c0_65 = arith.constant 0 : index
    %c0_66 = arith.constant 0 : index
    %138 = vector.load %arg13[%c0_65, %c0_66] : memref<256x128xf32, #tpu.memory_space<vmem>>, vector<256x128xf32>
    %cst_67 = arith.constant dense<0.000000e+00> : vector<8x128xf32>
    %139 = tpu.matmul %137, %138, %cst_67 {dimension_numbers = #tpu.dot_dimension_numbers<[1], [0], [0], [1], [0, 0, 1, 1], [], []>} : vector<8x256xf32>, vector<256x128xf32>, vector<8x128xf32> -> vector<8x128xf32>
    %c0_68 = arith.constant 0 : index
    %c0_69 = arith.constant 0 : index
    %140 = vector.load %arg14[%c0_68, %c0_69] : memref<1x128xf32, #tpu.memory_space<vmem>>, vector<1x128xf32>
    %141 = vector.broadcast %140 : vector<1x128xf32> to vector<8x128xf32>
    %142 = arith.addf %139, %141 : vector<8x128xf32>
    %143 = arith.addf %130, %142 : vector<8x128xf32>
    %cst_70 = arith.constant dense<0.000000e+00> : vector<8xf32>
    %144 = vector.multi_reduction <add>, %143, %cst_70 [1] : vector<8x128xf32> to vector<8xf32>
    %145 = vector.shape_cast %144 : vector<8xf32> to vector<8x1xf32>
    %cst_71 = arith.constant 1.280000e+02 : f32
    %146 = vector.broadcast %cst_71 : f32 to vector<8x1xf32>
    %147 = arith.divf %145, %146 : vector<8x1xf32>
    %148 = vector.broadcast %147 : vector<8x1xf32> to vector<8x128xf32>
    %149 = arith.subf %143, %148 : vector<8x128xf32>
    %150 = arith.mulf %149, %149 : vector<8x128xf32>
    %cst_72 = arith.constant dense<0.000000e+00> : vector<8xf32>
    %151 = vector.multi_reduction <add>, %150, %cst_72 [1] : vector<8x128xf32> to vector<8xf32>
    %152 = vector.shape_cast %151 : vector<8xf32> to vector<8x1xf32>
    %cst_73 = arith.constant 1.280000e+02 : f32
    %153 = vector.broadcast %cst_73 : f32 to vector<8x1xf32>
    %154 = arith.divf %152, %153 : vector<8x1xf32>
    %cst_74 = arith.constant 9.99999974E-6 : f32
    %155 = vector.broadcast %cst_74 : f32 to vector<8x1xf32>
    %156 = arith.addf %154, %155 : vector<8x1xf32>
    %157 = math.rsqrt %156 : vector<8x1xf32>
    %158 = vector.broadcast %157 : vector<8x1xf32> to vector<8x128xf32>
    %159 = arith.mulf %149, %158 : vector<8x128xf32>
    %c0_75 = arith.constant 0 : index
    %c0_76 = arith.constant 0 : index
    %160 = vector.load %arg15[%c0_75, %c0_76] : memref<1x128xf32, #tpu.memory_space<vmem>>, vector<1x128xf32>
    %161 = vector.broadcast %160 : vector<1x128xf32> to vector<8x128xf32>
    %162 = arith.mulf %159, %161 : vector<8x128xf32>
    %c0_77 = arith.constant 0 : index
    %c0_78 = arith.constant 0 : index
    %163 = vector.load %arg16[%c0_77, %c0_78] : memref<1x128xf32, #tpu.memory_space<vmem>>, vector<1x128xf32>
    %164 = vector.broadcast %163 : vector<1x128xf32> to vector<8x128xf32>
    %165 = arith.addf %162, %164 : vector<8x128xf32>
    %c0_79 = arith.constant 0 : index
    %c0_80 = arith.constant 0 : index
    %166 = vector.load %arg17[%c0_79, %c0_80] : memref<128x384xf32, #tpu.memory_space<vmem>>, vector<128x384xf32>
    %cst_81 = arith.constant dense<0.000000e+00> : vector<8x384xf32>
    %167 = tpu.matmul %13, %166, %cst_81 {dimension_numbers = #tpu.dot_dimension_numbers<[1], [0], [0], [1], [0, 0, 1, 1], [], []>} : vector<8x128xf32>, vector<128x384xf32>, vector<8x384xf32> -> vector<8x384xf32>
    %c0_82 = arith.constant 0 : index
    %c0_83 = arith.constant 0 : index
    %168 = vector.load %arg18[%c0_82, %c0_83] : memref<1x384xf32, #tpu.memory_space<vmem>>, vector<1x384xf32>
    %169 = vector.broadcast %168 : vector<1x384xf32> to vector<8x384xf32>
    %170 = arith.addf %167, %169 : vector<8x384xf32>
    %171 = vector.extract_strided_slice %170 {offsets = [0, 0], sizes = [8, 128], strides = [1, 1]} : vector<8x384xf32> to vector<8x128xf32>
    %172 = vector.extract_strided_slice %170 {offsets = [0, 128], sizes = [8, 128], strides = [1, 1]} : vector<8x384xf32> to vector<8x128xf32>
    %173 = vector.extract_strided_slice %170 {offsets = [0, 256], sizes = [8, 128], strides = [1, 1]} : vector<8x384xf32> to vector<8x128xf32>
    %174 = vector.extract_strided_slice %171 {offsets = [0, 0], sizes = [8, 32], strides = [1, 1]} : vector<8x128xf32> to vector<8x32xf32>
    %175 = vector.extract_strided_slice %172 {offsets = [0, 0], sizes = [8, 32], strides = [1, 1]} : vector<8x128xf32> to vector<8x32xf32>
    %176 = vector.extract_strided_slice %173 {offsets = [0, 0], sizes = [8, 32], strides = [1, 1]} : vector<8x128xf32> to vector<8x32xf32>
    %177 = tpu.transpose %175, [1, 0] : vector<8x32xf32> -> vector<32x8xf32>
    %cst_84 = arith.constant dense<0.000000e+00> : vector<8x8xf32>
    %178 = tpu.matmul %174, %177, %cst_84 {dimension_numbers = #tpu.dot_dimension_numbers<[1], [0], [0], [1], [0, 0, 1, 1], [], []>} : vector<8x32xf32>, vector<32x8xf32>, vector<8x8xf32> -> vector<8x8xf32>
    %cst_85 = arith.constant 0.176776692 : f32
    %179 = vector.broadcast %cst_85 : f32 to vector<8x8xf32>
    %180 = arith.mulf %178, %179 : vector<8x8xf32>
    %cst_86 = arith.constant dense<0xFF800000> : vector<8xf32>
    %181 = vector.multi_reduction <maximumf>, %180, %cst_86 [1] : vector<8x8xf32> to vector<8xf32>
    %182 = vector.shape_cast %181 : vector<8xf32> to vector<8x1xf32>
    %183 = vector.broadcast %182 : vector<8x1xf32> to vector<8x8xf32>
    %184 = arith.subf %180, %183 : vector<8x8xf32>
    %185 = math.exp %184 : vector<8x8xf32>
    %cst_87 = arith.constant dense<0.000000e+00> : vector<8xf32>
    %186 = vector.multi_reduction <add>, %185, %cst_87 [1] : vector<8x8xf32> to vector<8xf32>
    %187 = vector.shape_cast %186 : vector<8xf32> to vector<8x1xf32>
    %188 = tpu.reciprocal %187 : vector<8x1xf32> -> vector<8x1xf32>
    %189 = vector.broadcast %188 : vector<8x1xf32> to vector<8x8xf32>
    %190 = arith.mulf %185, %189 : vector<8x8xf32>
    %cst_88 = arith.constant dense<0.000000e+00> : vector<8x32xf32>
    %191 = tpu.matmul %190, %176, %cst_88 {dimension_numbers = #tpu.dot_dimension_numbers<[1], [0], [0], [1], [0, 0, 1, 1], [], []>} : vector<8x8xf32>, vector<8x32xf32>, vector<8x32xf32> -> vector<8x32xf32>
    %c0_89 = arith.constant 0 : index
    %c0_90 = arith.constant 0 : index
    %192 = vector.load %arg19[%c0_89, %c0_90] : memref<128x128xf32, #tpu.memory_space<vmem>>, vector<32x128xf32>
    %cst_91 = arith.constant dense<0.000000e+00> : vector<8x128xf32>
    %193 = tpu.matmul %191, %192, %cst_91 {dimension_numbers = #tpu.dot_dimension_numbers<[1], [0], [0], [1], [0, 0, 1, 1], [], []>} : vector<8x32xf32>, vector<32x128xf32>, vector<8x128xf32> -> vector<8x128xf32>
    %194 = vector.extract_strided_slice %171 {offsets = [0, 32], sizes = [8, 32], strides = [1, 1]} : vector<8x128xf32> to vector<8x32xf32>
    %195 = vector.extract_strided_slice %172 {offsets = [0, 32], sizes = [8, 32], strides = [1, 1]} : vector<8x128xf32> to vector<8x32xf32>
    %196 = vector.extract_strided_slice %173 {offsets = [0, 32], sizes = [8, 32], strides = [1, 1]} : vector<8x128xf32> to vector<8x32xf32>
    %197 = tpu.transpose %195, [1, 0] : vector<8x32xf32> -> vector<32x8xf32>
    %cst_92 = arith.constant dense<0.000000e+00> : vector<8x8xf32>
    %198 = tpu.matmul %194, %197, %cst_92 {dimension_numbers = #tpu.dot_dimension_numbers<[1], [0], [0], [1], [0, 0, 1, 1], [], []>} : vector<8x32xf32>, vector<32x8xf32>, vector<8x8xf32> -> vector<8x8xf32>
    %cst_93 = arith.constant 0.176776692 : f32
    %199 = vector.broadcast %cst_93 : f32 to vector<8x8xf32>
    %200 = arith.mulf %198, %199 : vector<8x8xf32>
    %cst_94 = arith.constant dense<0xFF800000> : vector<8xf32>
    %201 = vector.multi_reduction <maximumf>, %200, %cst_94 [1] : vector<8x8xf32> to vector<8xf32>
    %202 = vector.shape_cast %201 : vector<8xf32> to vector<8x1xf32>
    %203 = vector.broadcast %202 : vector<8x1xf32> to vector<8x8xf32>
    %204 = arith.subf %200, %203 : vector<8x8xf32>
    %205 = math.exp %204 : vector<8x8xf32>
    %cst_95 = arith.constant dense<0.000000e+00> : vector<8xf32>
    %206 = vector.multi_reduction <add>, %205, %cst_95 [1] : vector<8x8xf32> to vector<8xf32>
    %207 = vector.shape_cast %206 : vector<8xf32> to vector<8x1xf32>
    %208 = tpu.reciprocal %207 : vector<8x1xf32> -> vector<8x1xf32>
    %209 = vector.broadcast %208 : vector<8x1xf32> to vector<8x8xf32>
    %210 = arith.mulf %205, %209 : vector<8x8xf32>
    %cst_96 = arith.constant dense<0.000000e+00> : vector<8x32xf32>
    %211 = tpu.matmul %210, %196, %cst_96 {dimension_numbers = #tpu.dot_dimension_numbers<[1], [0], [0], [1], [0, 0, 1, 1], [], []>} : vector<8x8xf32>, vector<8x32xf32>, vector<8x32xf32> -> vector<8x32xf32>
    %c32_97 = arith.constant 32 : index
    %c0_98 = arith.constant 0 : index
    %212 = vector.load %arg19[%c32_97, %c0_98] : memref<128x128xf32, #tpu.memory_space<vmem>>, vector<32x128xf32>
    %cst_99 = arith.constant dense<0.000000e+00> : vector<8x128xf32>
    %213 = tpu.matmul %211, %212, %cst_99 {dimension_numbers = #tpu.dot_dimension_numbers<[1], [0], [0], [1], [0, 0, 1, 1], [], []>} : vector<8x32xf32>, vector<32x128xf32>, vector<8x128xf32> -> vector<8x128xf32>
    %214 = arith.addf %193, %213 : vector<8x128xf32>
    %215 = vector.extract_strided_slice %171 {offsets = [0, 64], sizes = [8, 32], strides = [1, 1]} : vector<8x128xf32> to vector<8x32xf32>
    %216 = vector.extract_strided_slice %172 {offsets = [0, 64], sizes = [8, 32], strides = [1, 1]} : vector<8x128xf32> to vector<8x32xf32>
    %217 = vector.extract_strided_slice %173 {offsets = [0, 64], sizes = [8, 32], strides = [1, 1]} : vector<8x128xf32> to vector<8x32xf32>
    %218 = tpu.transpose %216, [1, 0] : vector<8x32xf32> -> vector<32x8xf32>
    %cst_100 = arith.constant dense<0.000000e+00> : vector<8x8xf32>
    %219 = tpu.matmul %215, %218, %cst_100 {dimension_numbers = #tpu.dot_dimension_numbers<[1], [0], [0], [1], [0, 0, 1, 1], [], []>} : vector<8x32xf32>, vector<32x8xf32>, vector<8x8xf32> -> vector<8x8xf32>
    %cst_101 = arith.constant 0.176776692 : f32
    %220 = vector.broadcast %cst_101 : f32 to vector<8x8xf32>
    %221 = arith.mulf %219, %220 : vector<8x8xf32>
    %cst_102 = arith.constant dense<0xFF800000> : vector<8xf32>
    %222 = vector.multi_reduction <maximumf>, %221, %cst_102 [1] : vector<8x8xf32> to vector<8xf32>
    %223 = vector.shape_cast %222 : vector<8xf32> to vector<8x1xf32>
    %224 = vector.broadcast %223 : vector<8x1xf32> to vector<8x8xf32>
    %225 = arith.subf %221, %224 : vector<8x8xf32>
    %226 = math.exp %225 : vector<8x8xf32>
    %cst_103 = arith.constant dense<0.000000e+00> : vector<8xf32>
    %227 = vector.multi_reduction <add>, %226, %cst_103 [1] : vector<8x8xf32> to vector<8xf32>
    %228 = vector.shape_cast %227 : vector<8xf32> to vector<8x1xf32>
    %229 = tpu.reciprocal %228 : vector<8x1xf32> -> vector<8x1xf32>
    %230 = vector.broadcast %229 : vector<8x1xf32> to vector<8x8xf32>
    %231 = arith.mulf %226, %230 : vector<8x8xf32>
    %cst_104 = arith.constant dense<0.000000e+00> : vector<8x32xf32>
    %232 = tpu.matmul %231, %217, %cst_104 {dimension_numbers = #tpu.dot_dimension_numbers<[1], [0], [0], [1], [0, 0, 1, 1], [], []>} : vector<8x8xf32>, vector<8x32xf32>, vector<8x32xf32> -> vector<8x32xf32>
    %c64_105 = arith.constant 64 : index
    %c0_106 = arith.constant 0 : index
    %233 = vector.load %arg19[%c64_105, %c0_106] : memref<128x128xf32, #tpu.memory_space<vmem>>, vector<32x128xf32>
    %cst_107 = arith.constant dense<0.000000e+00> : vector<8x128xf32>
    %234 = tpu.matmul %232, %233, %cst_107 {dimension_numbers = #tpu.dot_dimension_numbers<[1], [0], [0], [1], [0, 0, 1, 1], [], []>} : vector<8x32xf32>, vector<32x128xf32>, vector<8x128xf32> -> vector<8x128xf32>
    %235 = arith.addf %214, %234 : vector<8x128xf32>
    %236 = vector.extract_strided_slice %171 {offsets = [0, 96], sizes = [8, 32], strides = [1, 1]} : vector<8x128xf32> to vector<8x32xf32>
    %237 = vector.extract_strided_slice %172 {offsets = [0, 96], sizes = [8, 32], strides = [1, 1]} : vector<8x128xf32> to vector<8x32xf32>
    %238 = vector.extract_strided_slice %173 {offsets = [0, 96], sizes = [8, 32], strides = [1, 1]} : vector<8x128xf32> to vector<8x32xf32>
    %239 = tpu.transpose %237, [1, 0] : vector<8x32xf32> -> vector<32x8xf32>
    %cst_108 = arith.constant dense<0.000000e+00> : vector<8x8xf32>
    %240 = tpu.matmul %236, %239, %cst_108 {dimension_numbers = #tpu.dot_dimension_numbers<[1], [0], [0], [1], [0, 0, 1, 1], [], []>} : vector<8x32xf32>, vector<32x8xf32>, vector<8x8xf32> -> vector<8x8xf32>
    %cst_109 = arith.constant 0.176776692 : f32
    %241 = vector.broadcast %cst_109 : f32 to vector<8x8xf32>
    %242 = arith.mulf %240, %241 : vector<8x8xf32>
    %cst_110 = arith.constant dense<0xFF800000> : vector<8xf32>
    %243 = vector.multi_reduction <maximumf>, %242, %cst_110 [1] : vector<8x8xf32> to vector<8xf32>
    %244 = vector.shape_cast %243 : vector<8xf32> to vector<8x1xf32>
    %245 = vector.broadcast %244 : vector<8x1xf32> to vector<8x8xf32>
    %246 = arith.subf %242, %245 : vector<8x8xf32>
    %247 = math.exp %246 : vector<8x8xf32>
    %cst_111 = arith.constant dense<0.000000e+00> : vector<8xf32>
    %248 = vector.multi_reduction <add>, %247, %cst_111 [1] : vector<8x8xf32> to vector<8xf32>
    %249 = vector.shape_cast %248 : vector<8xf32> to vector<8x1xf32>
    %250 = tpu.reciprocal %249 : vector<8x1xf32> -> vector<8x1xf32>
    %251 = vector.broadcast %250 : vector<8x1xf32> to vector<8x8xf32>
    %252 = arith.mulf %247, %251 : vector<8x8xf32>
    %cst_112 = arith.constant dense<0.000000e+00> : vector<8x32xf32>
    %253 = tpu.matmul %252, %238, %cst_112 {dimension_numbers = #tpu.dot_dimension_numbers<[1], [0], [0], [1], [0, 0, 1, 1], [], []>} : vector<8x8xf32>, vector<8x32xf32>, vector<8x32xf32> -> vector<8x32xf32>
    %c96_113 = arith.constant 96 : index
    %c0_114 = arith.constant 0 : index
    %254 = vector.load %arg19[%c96_113, %c0_114] : memref<128x128xf32, #tpu.memory_space<vmem>>, vector<32x128xf32>
    %cst_115 = arith.constant dense<0.000000e+00> : vector<8x128xf32>
    %255 = tpu.matmul %253, %254, %cst_115 {dimension_numbers = #tpu.dot_dimension_numbers<[1], [0], [0], [1], [0, 0, 1, 1], [], []>} : vector<8x32xf32>, vector<32x128xf32>, vector<8x128xf32> -> vector<8x128xf32>
    %256 = arith.addf %235, %255 : vector<8x128xf32>
    %c0_116 = arith.constant 0 : index
    %c0_117 = arith.constant 0 : index
    %257 = vector.load %arg20[%c0_116, %c0_117] : memref<1x128xf32, #tpu.memory_space<vmem>>, vector<1x128xf32>
    %258 = vector.broadcast %257 : vector<1x128xf32> to vector<8x128xf32>
    %259 = arith.addf %256, %258 : vector<8x128xf32>
    %260 = arith.addf %13, %259 : vector<8x128xf32>
    %cst_118 = arith.constant dense<0.000000e+00> : vector<8xf32>
    %261 = vector.multi_reduction <add>, %260, %cst_118 [1] : vector<8x128xf32> to vector<8xf32>
    %262 = vector.shape_cast %261 : vector<8xf32> to vector<8x1xf32>
    %cst_119 = arith.constant 1.280000e+02 : f32
    %263 = vector.broadcast %cst_119 : f32 to vector<8x1xf32>
    %264 = arith.divf %262, %263 : vector<8x1xf32>
    %265 = vector.broadcast %264 : vector<8x1xf32> to vector<8x128xf32>
    %266 = arith.subf %260, %265 : vector<8x128xf32>
    %267 = arith.mulf %266, %266 : vector<8x128xf32>
    %cst_120 = arith.constant dense<0.000000e+00> : vector<8xf32>
    %268 = vector.multi_reduction <add>, %267, %cst_120 [1] : vector<8x128xf32> to vector<8xf32>
    %269 = vector.shape_cast %268 : vector<8xf32> to vector<8x1xf32>
    %cst_121 = arith.constant 1.280000e+02 : f32
    %270 = vector.broadcast %cst_121 : f32 to vector<8x1xf32>
    %271 = arith.divf %269, %270 : vector<8x1xf32>
    %cst_122 = arith.constant 9.99999974E-6 : f32
    %272 = vector.broadcast %cst_122 : f32 to vector<8x1xf32>
    %273 = arith.addf %271, %272 : vector<8x1xf32>
    %274 = math.rsqrt %273 : vector<8x1xf32>
    %275 = vector.broadcast %274 : vector<8x1xf32> to vector<8x128xf32>
    %276 = arith.mulf %266, %275 : vector<8x128xf32>
    %c0_123 = arith.constant 0 : index
    %c0_124 = arith.constant 0 : index
    %277 = vector.load %arg21[%c0_123, %c0_124] : memref<1x128xf32, #tpu.memory_space<vmem>>, vector<1x128xf32>
    %278 = vector.broadcast %277 : vector<1x128xf32> to vector<8x128xf32>
    %279 = arith.mulf %276, %278 : vector<8x128xf32>
    %c0_125 = arith.constant 0 : index
    %c0_126 = arith.constant 0 : index
    %280 = vector.load %arg22[%c0_125, %c0_126] : memref<1x128xf32, #tpu.memory_space<vmem>>, vector<1x128xf32>
    %281 = vector.broadcast %280 : vector<1x128xf32> to vector<8x128xf32>
    %282 = arith.addf %279, %281 : vector<8x128xf32>
    %c0_127 = arith.constant 0 : index
    %c0_128 = arith.constant 0 : index
    %283 = vector.load %arg23[%c0_127, %c0_128] : memref<128x128xf32, #tpu.memory_space<vmem>>, vector<128x128xf32>
    %cst_129 = arith.constant dense<0.000000e+00> : vector<8x128xf32>
    %284 = tpu.matmul %282, %283, %cst_129 {dimension_numbers = #tpu.dot_dimension_numbers<[1], [0], [0], [1], [0, 0, 1, 1], [], []>} : vector<8x128xf32>, vector<128x128xf32>, vector<8x128xf32> -> vector<8x128xf32>
    %c0_130 = arith.constant 0 : index
    %c0_131 = arith.constant 0 : index
    %285 = vector.load %arg24[%c0_130, %c0_131] : memref<1x128xf32, #tpu.memory_space<vmem>>, vector<1x128xf32>
    %286 = vector.broadcast %285 : vector<1x128xf32> to vector<8x128xf32>
    %287 = arith.addf %284, %286 : vector<8x128xf32>
    %c0_132 = arith.constant 0 : index
    %c0_133 = arith.constant 0 : index
    %288 = vector.load %arg25[%c0_132, %c0_133] : memref<128x256xf32, #tpu.memory_space<vmem>>, vector<128x256xf32>
    %cst_134 = arith.constant dense<0.000000e+00> : vector<8x256xf32>
    %289 = tpu.matmul %165, %288, %cst_134 {dimension_numbers = #tpu.dot_dimension_numbers<[1], [0], [0], [1], [0, 0, 1, 1], [], []>} : vector<8x128xf32>, vector<128x256xf32>, vector<8x256xf32> -> vector<8x256xf32>
    %c0_135 = arith.constant 0 : index
    %c0_136 = arith.constant 0 : index
    %290 = vector.load %arg26[%c0_135, %c0_136] : memref<1x256xf32, #tpu.memory_space<vmem>>, vector<1x256xf32>
    %291 = vector.broadcast %290 : vector<1x256xf32> to vector<8x256xf32>
    %292 = arith.addf %289, %291 : vector<8x256xf32>
    %293 = vector.extract_strided_slice %292 {offsets = [0, 0], sizes = [8, 128], strides = [1, 1]} : vector<8x256xf32> to vector<8x128xf32>
    %294 = vector.extract_strided_slice %292 {offsets = [0, 128], sizes = [8, 128], strides = [1, 1]} : vector<8x256xf32> to vector<8x128xf32>
    %295 = vector.extract_strided_slice %287 {offsets = [0, 0], sizes = [8, 32], strides = [1, 1]} : vector<8x128xf32> to vector<8x32xf32>
    %296 = vector.extract_strided_slice %293 {offsets = [0, 0], sizes = [8, 32], strides = [1, 1]} : vector<8x128xf32> to vector<8x32xf32>
    %297 = vector.extract_strided_slice %294 {offsets = [0, 0], sizes = [8, 32], strides = [1, 1]} : vector<8x128xf32> to vector<8x32xf32>
    %298 = tpu.transpose %296, [1, 0] : vector<8x32xf32> -> vector<32x8xf32>
    %cst_137 = arith.constant dense<0.000000e+00> : vector<8x8xf32>
    %299 = tpu.matmul %295, %298, %cst_137 {dimension_numbers = #tpu.dot_dimension_numbers<[1], [0], [0], [1], [0, 0, 1, 1], [], []>} : vector<8x32xf32>, vector<32x8xf32>, vector<8x8xf32> -> vector<8x8xf32>
    %cst_138 = arith.constant 0.176776692 : f32
    %300 = vector.broadcast %cst_138 : f32 to vector<8x8xf32>
    %301 = arith.mulf %299, %300 : vector<8x8xf32>
    %cst_139 = arith.constant dense<0xFF800000> : vector<8xf32>
    %302 = vector.multi_reduction <maximumf>, %301, %cst_139 [1] : vector<8x8xf32> to vector<8xf32>
    %303 = vector.shape_cast %302 : vector<8xf32> to vector<8x1xf32>
    %304 = vector.broadcast %303 : vector<8x1xf32> to vector<8x8xf32>
    %305 = arith.subf %301, %304 : vector<8x8xf32>
    %306 = math.exp %305 : vector<8x8xf32>
    %cst_140 = arith.constant dense<0.000000e+00> : vector<8xf32>
    %307 = vector.multi_reduction <add>, %306, %cst_140 [1] : vector<8x8xf32> to vector<8xf32>
    %308 = vector.shape_cast %307 : vector<8xf32> to vector<8x1xf32>
    %309 = tpu.reciprocal %308 : vector<8x1xf32> -> vector<8x1xf32>
    %310 = vector.broadcast %309 : vector<8x1xf32> to vector<8x8xf32>
    %311 = arith.mulf %306, %310 : vector<8x8xf32>
    %cst_141 = arith.constant dense<0.000000e+00> : vector<8x32xf32>
    %312 = tpu.matmul %311, %297, %cst_141 {dimension_numbers = #tpu.dot_dimension_numbers<[1], [0], [0], [1], [0, 0, 1, 1], [], []>} : vector<8x8xf32>, vector<8x32xf32>, vector<8x32xf32> -> vector<8x32xf32>
    %c0_142 = arith.constant 0 : index
    %c0_143 = arith.constant 0 : index
    %313 = vector.load %arg27[%c0_142, %c0_143] : memref<128x128xf32, #tpu.memory_space<vmem>>, vector<32x128xf32>
    %cst_144 = arith.constant dense<0.000000e+00> : vector<8x128xf32>
    %314 = tpu.matmul %312, %313, %cst_144 {dimension_numbers = #tpu.dot_dimension_numbers<[1], [0], [0], [1], [0, 0, 1, 1], [], []>} : vector<8x32xf32>, vector<32x128xf32>, vector<8x128xf32> -> vector<8x128xf32>
    %315 = vector.extract_strided_slice %287 {offsets = [0, 32], sizes = [8, 32], strides = [1, 1]} : vector<8x128xf32> to vector<8x32xf32>
    %316 = vector.extract_strided_slice %293 {offsets = [0, 32], sizes = [8, 32], strides = [1, 1]} : vector<8x128xf32> to vector<8x32xf32>
    %317 = vector.extract_strided_slice %294 {offsets = [0, 32], sizes = [8, 32], strides = [1, 1]} : vector<8x128xf32> to vector<8x32xf32>
    %318 = tpu.transpose %316, [1, 0] : vector<8x32xf32> -> vector<32x8xf32>
    %cst_145 = arith.constant dense<0.000000e+00> : vector<8x8xf32>
    %319 = tpu.matmul %315, %318, %cst_145 {dimension_numbers = #tpu.dot_dimension_numbers<[1], [0], [0], [1], [0, 0, 1, 1], [], []>} : vector<8x32xf32>, vector<32x8xf32>, vector<8x8xf32> -> vector<8x8xf32>
    %cst_146 = arith.constant 0.176776692 : f32
    %320 = vector.broadcast %cst_146 : f32 to vector<8x8xf32>
    %321 = arith.mulf %319, %320 : vector<8x8xf32>
    %cst_147 = arith.constant dense<0xFF800000> : vector<8xf32>
    %322 = vector.multi_reduction <maximumf>, %321, %cst_147 [1] : vector<8x8xf32> to vector<8xf32>
    %323 = vector.shape_cast %322 : vector<8xf32> to vector<8x1xf32>
    %324 = vector.broadcast %323 : vector<8x1xf32> to vector<8x8xf32>
    %325 = arith.subf %321, %324 : vector<8x8xf32>
    %326 = math.exp %325 : vector<8x8xf32>
    %cst_148 = arith.constant dense<0.000000e+00> : vector<8xf32>
    %327 = vector.multi_reduction <add>, %326, %cst_148 [1] : vector<8x8xf32> to vector<8xf32>
    %328 = vector.shape_cast %327 : vector<8xf32> to vector<8x1xf32>
    %329 = tpu.reciprocal %328 : vector<8x1xf32> -> vector<8x1xf32>
    %330 = vector.broadcast %329 : vector<8x1xf32> to vector<8x8xf32>
    %331 = arith.mulf %326, %330 : vector<8x8xf32>
    %cst_149 = arith.constant dense<0.000000e+00> : vector<8x32xf32>
    %332 = tpu.matmul %331, %317, %cst_149 {dimension_numbers = #tpu.dot_dimension_numbers<[1], [0], [0], [1], [0, 0, 1, 1], [], []>} : vector<8x8xf32>, vector<8x32xf32>, vector<8x32xf32> -> vector<8x32xf32>
    %c32_150 = arith.constant 32 : index
    %c0_151 = arith.constant 0 : index
    %333 = vector.load %arg27[%c32_150, %c0_151] : memref<128x128xf32, #tpu.memory_space<vmem>>, vector<32x128xf32>
    %cst_152 = arith.constant dense<0.000000e+00> : vector<8x128xf32>
    %334 = tpu.matmul %332, %333, %cst_152 {dimension_numbers = #tpu.dot_dimension_numbers<[1], [0], [0], [1], [0, 0, 1, 1], [], []>} : vector<8x32xf32>, vector<32x128xf32>, vector<8x128xf32> -> vector<8x128xf32>
    %335 = arith.addf %314, %334 : vector<8x128xf32>
    %336 = vector.extract_strided_slice %287 {offsets = [0, 64], sizes = [8, 32], strides = [1, 1]} : vector<8x128xf32> to vector<8x32xf32>
    %337 = vector.extract_strided_slice %293 {offsets = [0, 64], sizes = [8, 32], strides = [1, 1]} : vector<8x128xf32> to vector<8x32xf32>
    %338 = vector.extract_strided_slice %294 {offsets = [0, 64], sizes = [8, 32], strides = [1, 1]} : vector<8x128xf32> to vector<8x32xf32>
    %339 = tpu.transpose %337, [1, 0] : vector<8x32xf32> -> vector<32x8xf32>
    %cst_153 = arith.constant dense<0.000000e+00> : vector<8x8xf32>
    %340 = tpu.matmul %336, %339, %cst_153 {dimension_numbers = #tpu.dot_dimension_numbers<[1], [0], [0], [1], [0, 0, 1, 1], [], []>} : vector<8x32xf32>, vector<32x8xf32>, vector<8x8xf32> -> vector<8x8xf32>
    %cst_154 = arith.constant 0.176776692 : f32
    %341 = vector.broadcast %cst_154 : f32 to vector<8x8xf32>
    %342 = arith.mulf %340, %341 : vector<8x8xf32>
    %cst_155 = arith.constant dense<0xFF800000> : vector<8xf32>
    %343 = vector.multi_reduction <maximumf>, %342, %cst_155 [1] : vector<8x8xf32> to vector<8xf32>
    %344 = vector.shape_cast %343 : vector<8xf32> to vector<8x1xf32>
    %345 = vector.broadcast %344 : vector<8x1xf32> to vector<8x8xf32>
    %346 = arith.subf %342, %345 : vector<8x8xf32>
    %347 = math.exp %346 : vector<8x8xf32>
    %cst_156 = arith.constant dense<0.000000e+00> : vector<8xf32>
    %348 = vector.multi_reduction <add>, %347, %cst_156 [1] : vector<8x8xf32> to vector<8xf32>
    %349 = vector.shape_cast %348 : vector<8xf32> to vector<8x1xf32>
    %350 = tpu.reciprocal %349 : vector<8x1xf32> -> vector<8x1xf32>
    %351 = vector.broadcast %350 : vector<8x1xf32> to vector<8x8xf32>
    %352 = arith.mulf %347, %351 : vector<8x8xf32>
    %cst_157 = arith.constant dense<0.000000e+00> : vector<8x32xf32>
    %353 = tpu.matmul %352, %338, %cst_157 {dimension_numbers = #tpu.dot_dimension_numbers<[1], [0], [0], [1], [0, 0, 1, 1], [], []>} : vector<8x8xf32>, vector<8x32xf32>, vector<8x32xf32> -> vector<8x32xf32>
    %c64_158 = arith.constant 64 : index
    %c0_159 = arith.constant 0 : index
    %354 = vector.load %arg27[%c64_158, %c0_159] : memref<128x128xf32, #tpu.memory_space<vmem>>, vector<32x128xf32>
    %cst_160 = arith.constant dense<0.000000e+00> : vector<8x128xf32>
    %355 = tpu.matmul %353, %354, %cst_160 {dimension_numbers = #tpu.dot_dimension_numbers<[1], [0], [0], [1], [0, 0, 1, 1], [], []>} : vector<8x32xf32>, vector<32x128xf32>, vector<8x128xf32> -> vector<8x128xf32>
    %356 = arith.addf %335, %355 : vector<8x128xf32>
    %357 = vector.extract_strided_slice %287 {offsets = [0, 96], sizes = [8, 32], strides = [1, 1]} : vector<8x128xf32> to vector<8x32xf32>
    %358 = vector.extract_strided_slice %293 {offsets = [0, 96], sizes = [8, 32], strides = [1, 1]} : vector<8x128xf32> to vector<8x32xf32>
    %359 = vector.extract_strided_slice %294 {offsets = [0, 96], sizes = [8, 32], strides = [1, 1]} : vector<8x128xf32> to vector<8x32xf32>
    %360 = tpu.transpose %358, [1, 0] : vector<8x32xf32> -> vector<32x8xf32>
    %cst_161 = arith.constant dense<0.000000e+00> : vector<8x8xf32>
    %361 = tpu.matmul %357, %360, %cst_161 {dimension_numbers = #tpu.dot_dimension_numbers<[1], [0], [0], [1], [0, 0, 1, 1], [], []>} : vector<8x32xf32>, vector<32x8xf32>, vector<8x8xf32> -> vector<8x8xf32>
    %cst_162 = arith.constant 0.176776692 : f32
    %362 = vector.broadcast %cst_162 : f32 to vector<8x8xf32>
    %363 = arith.mulf %361, %362 : vector<8x8xf32>
    %cst_163 = arith.constant dense<0xFF800000> : vector<8xf32>
    %364 = vector.multi_reduction <maximumf>, %363, %cst_163 [1] : vector<8x8xf32> to vector<8xf32>
    %365 = vector.shape_cast %364 : vector<8xf32> to vector<8x1xf32>
    %366 = vector.broadcast %365 : vector<8x1xf32> to vector<8x8xf32>
    %367 = arith.subf %363, %366 : vector<8x8xf32>
    %368 = math.exp %367 : vector<8x8xf32>
    %cst_164 = arith.constant dense<0.000000e+00> : vector<8xf32>
    %369 = vector.multi_reduction <add>, %368, %cst_164 [1] : vector<8x8xf32> to vector<8xf32>
    %370 = vector.shape_cast %369 : vector<8xf32> to vector<8x1xf32>
    %371 = tpu.reciprocal %370 : vector<8x1xf32> -> vector<8x1xf32>
    %372 = vector.broadcast %371 : vector<8x1xf32> to vector<8x8xf32>
    %373 = arith.mulf %368, %372 : vector<8x8xf32>
    %cst_165 = arith.constant dense<0.000000e+00> : vector<8x32xf32>
    %374 = tpu.matmul %373, %359, %cst_165 {dimension_numbers = #tpu.dot_dimension_numbers<[1], [0], [0], [1], [0, 0, 1, 1], [], []>} : vector<8x8xf32>, vector<8x32xf32>, vector<8x32xf32> -> vector<8x32xf32>
    %c96_166 = arith.constant 96 : index
    %c0_167 = arith.constant 0 : index
    %375 = vector.load %arg27[%c96_166, %c0_167] : memref<128x128xf32, #tpu.memory_space<vmem>>, vector<32x128xf32>
    %cst_168 = arith.constant dense<0.000000e+00> : vector<8x128xf32>
    %376 = tpu.matmul %374, %375, %cst_168 {dimension_numbers = #tpu.dot_dimension_numbers<[1], [0], [0], [1], [0, 0, 1, 1], [], []>} : vector<8x32xf32>, vector<32x128xf32>, vector<8x128xf32> -> vector<8x128xf32>
    %377 = arith.addf %356, %376 : vector<8x128xf32>
    %c0_169 = arith.constant 0 : index
    %c0_170 = arith.constant 0 : index
    %378 = vector.load %arg28[%c0_169, %c0_170] : memref<1x128xf32, #tpu.memory_space<vmem>>, vector<1x128xf32>
    %379 = vector.broadcast %378 : vector<1x128xf32> to vector<8x128xf32>
    %380 = arith.addf %377, %379 : vector<8x128xf32>
    %381 = arith.addf %282, %380 : vector<8x128xf32>
    %cst_171 = arith.constant dense<0.000000e+00> : vector<8xf32>
    %382 = vector.multi_reduction <add>, %381, %cst_171 [1] : vector<8x128xf32> to vector<8xf32>
    %383 = vector.shape_cast %382 : vector<8xf32> to vector<8x1xf32>
    %cst_172 = arith.constant 1.280000e+02 : f32
    %384 = vector.broadcast %cst_172 : f32 to vector<8x1xf32>
    %385 = arith.divf %383, %384 : vector<8x1xf32>
    %386 = vector.broadcast %385 : vector<8x1xf32> to vector<8x128xf32>
    %387 = arith.subf %381, %386 : vector<8x128xf32>
    %388 = arith.mulf %387, %387 : vector<8x128xf32>
    %cst_173 = arith.constant dense<0.000000e+00> : vector<8xf32>
    %389 = vector.multi_reduction <add>, %388, %cst_173 [1] : vector<8x128xf32> to vector<8xf32>
    %390 = vector.shape_cast %389 : vector<8xf32> to vector<8x1xf32>
    %cst_174 = arith.constant 1.280000e+02 : f32
    %391 = vector.broadcast %cst_174 : f32 to vector<8x1xf32>
    %392 = arith.divf %390, %391 : vector<8x1xf32>
    %cst_175 = arith.constant 9.99999974E-6 : f32
    %393 = vector.broadcast %cst_175 : f32 to vector<8x1xf32>
    %394 = arith.addf %392, %393 : vector<8x1xf32>
    %395 = math.rsqrt %394 : vector<8x1xf32>
    %396 = vector.broadcast %395 : vector<8x1xf32> to vector<8x128xf32>
    %397 = arith.mulf %387, %396 : vector<8x128xf32>
    %c0_176 = arith.constant 0 : index
    %c0_177 = arith.constant 0 : index
    %398 = vector.load %arg29[%c0_176, %c0_177] : memref<1x128xf32, #tpu.memory_space<vmem>>, vector<1x128xf32>
    %399 = vector.broadcast %398 : vector<1x128xf32> to vector<8x128xf32>
    %400 = arith.mulf %397, %399 : vector<8x128xf32>
    %c0_178 = arith.constant 0 : index
    %c0_179 = arith.constant 0 : index
    %401 = vector.load %arg30[%c0_178, %c0_179] : memref<1x128xf32, #tpu.memory_space<vmem>>, vector<1x128xf32>
    %402 = vector.broadcast %401 : vector<1x128xf32> to vector<8x128xf32>
    %403 = arith.addf %400, %402 : vector<8x128xf32>
    %c0_180 = arith.constant 0 : index
    %c0_181 = arith.constant 0 : index
    %404 = vector.load %arg31[%c0_180, %c0_181] : memref<128x256xf32, #tpu.memory_space<vmem>>, vector<128x256xf32>
    %cst_182 = arith.constant dense<0.000000e+00> : vector<8x256xf32>
    %405 = tpu.matmul %403, %404, %cst_182 {dimension_numbers = #tpu.dot_dimension_numbers<[1], [0], [0], [1], [0, 0, 1, 1], [], []>} : vector<8x128xf32>, vector<128x256xf32>, vector<8x256xf32> -> vector<8x256xf32>
    %c0_183 = arith.constant 0 : index
    %c0_184 = arith.constant 0 : index
    %406 = vector.load %arg32[%c0_183, %c0_184] : memref<1x256xf32, #tpu.memory_space<vmem>>, vector<1x256xf32>
    %407 = vector.broadcast %406 : vector<1x256xf32> to vector<8x256xf32>
    %408 = arith.addf %405, %407 : vector<8x256xf32>
    %cst_185 = arith.constant 0.000000e+00 : f32
    %409 = vector.broadcast %cst_185 : f32 to vector<8x256xf32>
    %410 = arith.maximumf %408, %409 : vector<8x256xf32>
    %c0_186 = arith.constant 0 : index
    %c0_187 = arith.constant 0 : index
    %411 = vector.load %arg33[%c0_186, %c0_187] : memref<256x128xf32, #tpu.memory_space<vmem>>, vector<256x128xf32>
    %cst_188 = arith.constant dense<0.000000e+00> : vector<8x128xf32>
    %412 = tpu.matmul %410, %411, %cst_188 {dimension_numbers = #tpu.dot_dimension_numbers<[1], [0], [0], [1], [0, 0, 1, 1], [], []>} : vector<8x256xf32>, vector<256x128xf32>, vector<8x128xf32> -> vector<8x128xf32>
    %c0_189 = arith.constant 0 : index
    %c0_190 = arith.constant 0 : index
    %413 = vector.load %arg34[%c0_189, %c0_190] : memref<1x128xf32, #tpu.memory_space<vmem>>, vector<1x128xf32>
    %414 = vector.broadcast %413 : vector<1x128xf32> to vector<8x128xf32>
    %415 = arith.addf %412, %414 : vector<8x128xf32>
    %416 = arith.addf %403, %415 : vector<8x128xf32>
    %cst_191 = arith.constant dense<0.000000e+00> : vector<8xf32>
    %417 = vector.multi_reduction <add>, %416, %cst_191 [1] : vector<8x128xf32> to vector<8xf32>
    %418 = vector.shape_cast %417 : vector<8xf32> to vector<8x1xf32>
    %cst_192 = arith.constant 1.280000e+02 : f32
    %419 = vector.broadcast %cst_192 : f32 to vector<8x1xf32>
    %420 = arith.divf %418, %419 : vector<8x1xf32>
    %421 = vector.broadcast %420 : vector<8x1xf32> to vector<8x128xf32>
    %422 = arith.subf %416, %421 : vector<8x128xf32>
    %423 = arith.mulf %422, %422 : vector<8x128xf32>
    %cst_193 = arith.constant dense<0.000000e+00> : vector<8xf32>
    %424 = vector.multi_reduction <add>, %423, %cst_193 [1] : vector<8x128xf32> to vector<8xf32>
    %425 = vector.shape_cast %424 : vector<8xf32> to vector<8x1xf32>
    %cst_194 = arith.constant 1.280000e+02 : f32
    %426 = vector.broadcast %cst_194 : f32 to vector<8x1xf32>
    %427 = arith.divf %425, %426 : vector<8x1xf32>
    %cst_195 = arith.constant 9.99999974E-6 : f32
    %428 = vector.broadcast %cst_195 : f32 to vector<8x1xf32>
    %429 = arith.addf %427, %428 : vector<8x1xf32>
    %430 = math.rsqrt %429 : vector<8x1xf32>
    %431 = vector.broadcast %430 : vector<8x1xf32> to vector<8x128xf32>
    %432 = arith.mulf %422, %431 : vector<8x128xf32>
    %c0_196 = arith.constant 0 : index
    %c0_197 = arith.constant 0 : index
    %433 = vector.load %arg35[%c0_196, %c0_197] : memref<1x128xf32, #tpu.memory_space<vmem>>, vector<1x128xf32>
    %434 = vector.broadcast %433 : vector<1x128xf32> to vector<8x128xf32>
    %435 = arith.mulf %432, %434 : vector<8x128xf32>
    %c0_198 = arith.constant 0 : index
    %c0_199 = arith.constant 0 : index
    %436 = vector.load %arg36[%c0_198, %c0_199] : memref<1x128xf32, #tpu.memory_space<vmem>>, vector<1x128xf32>
    %437 = vector.broadcast %436 : vector<1x128xf32> to vector<8x128xf32>
    %438 = arith.addf %435, %437 : vector<8x128xf32>
    %439 = vector.extract_strided_slice %438 {offsets = [0, 0], sizes = [1, 128], strides = [1, 1]} : vector<8x128xf32> to vector<1x128xf32>
    %c0_200 = arith.constant 0 : index
    %c0_201 = arith.constant 0 : index
    %440 = vector.load %arg37[%c0_200, %c0_201] : memref<128x128xf32, #tpu.memory_space<vmem>>, vector<128x128xf32>
    %cst_202 = arith.constant dense<0.000000e+00> : vector<1x128xf32>
    %441 = tpu.matmul %439, %440, %cst_202 {dimension_numbers = #tpu.dot_dimension_numbers<[1], [0], [0], [1], [0, 0, 1, 1], [], []>} : vector<1x128xf32>, vector<128x128xf32>, vector<1x128xf32> -> vector<1x128xf32>
    %c0_203 = arith.constant 0 : index
    %c0_204 = arith.constant 0 : index
    %442 = vector.load %arg38[%c0_203, %c0_204] : memref<1x128xf32, #tpu.memory_space<vmem>>, vector<1x128xf32>
    %443 = arith.addf %441, %442 : vector<1x128xf32>
    %c0_205 = arith.constant 0 : index
    %c0_206 = arith.constant 0 : index
    %c0_207 = arith.constant 0 : index
    %444 = vector.load %arg39[%c0_205, %c0_206, %c0_207] : memref<1x1x128xf32, #tpu.memory_space<vmem>>, vector<1x1x128xf32>
    %445 = vector.shape_cast %444 : vector<1x1x128xf32> to vector<1x128xf32>
    %446 = vector.shape_cast %443 : vector<1x128xf32> to vector<1x1x128xf32>
    tpu.vector_store %arg39[%c0_205, %c0_206, %c0_207], %446 {strides = array<i32>} : memref<1x1x128xf32, #tpu.memory_space<vmem>>, vector<1x1x128xf32>,
    return
  }
  func.func @transform_0(%arg0: i32) -> (i32, i32, i32) {
    %c0_i32 = arith.constant 0 : i32
    %c0_i32_0 = arith.constant 0 : i32
    %c0_i32_1 = arith.constant 0 : i32
    return %arg0, %c0_i32, %c0_i32_0 : i32, i32, i32
  }
  func.func @transform_1(%arg0: i32) -> (i32, i32, i32) {
    %c0_i32 = arith.constant 0 : i32
    %c0_i32_0 = arith.constant 0 : i32
    %c0_i32_1 = arith.constant 0 : i32
    return %arg0, %c0_i32, %c0_i32_0 : i32, i32, i32
  }
  func.func @transform_2(%arg0: i32) -> (i32, i32) {
    %c0_i32 = arith.constant 0 : i32
    %c0_i32_0 = arith.constant 0 : i32
    %c0_i32_1 = arith.constant 0 : i32
    return %c0_i32, %c0_i32_0 : i32, i32
  }
  func.func @transform_3(%arg0: i32) -> (i32, i32) {
    %c0_i32 = arith.constant 0 : i32
    %c0_i32_0 = arith.constant 0 : i32
    %c0_i32_1 = arith.constant 0 : i32
    return %c0_i32, %c0_i32_0 : i32, i32
  }
  func.func @transform_4(%arg0: i32) -> (i32, i32) {
    %c0_i32 = arith.constant 0 : i32
    %c0_i32_0 = arith.constant 0 : i32
    %c0_i32_1 = arith.constant 0 : i32
    return %c0_i32, %c0_i32_0 : i32, i32
  }
  func.func @transform_5(%arg0: i32) -> (i32, i32) {
    %c0_i32 = arith.constant 0 : i32
    %c0_i32_0 = arith.constant 0 : i32
    %c0_i32_1 = arith.constant 0 : i32
    return %c0_i32, %c0_i32_0 : i32, i32
  }
  func.func @transform_6(%arg0: i32) -> (i32, i32) {
    %c0_i32 = arith.constant 0 : i32
    %c0_i32_0 = arith.constant 0 : i32
    %c0_i32_1 = arith.constant 0 : i32
    return %c0_i32, %c0_i32_0 : i32, i32
  }
  func.func @transform_7(%arg0: i32) -> (i32, i32) {
    %c0_i32 = arith.constant 0 : i32
    %c0_i32_0 = arith.constant 0 : i32
    %c0_i32_1 = arith.constant 0 : i32
    return %c0_i32, %c0_i32_0 : i32, i32
  }
  func.func @transform_8(%arg0: i32) -> (i32, i32) {
    %c0_i32 = arith.constant 0 : i32
    %c0_i32_0 = arith.constant 0 : i32
    %c0_i32_1 = arith.constant 0 : i32
    return %c0_i32, %c0_i32_0 : i32, i32
  }
  func.func @transform_9(%arg0: i32) -> (i32, i32) {
    %c0_i32 = arith.constant 0 : i32
    %c0_i32_0 = arith.constant 0 : i32
    %c0_i32_1 = arith.constant 0 : i32
    return %c0_i32, %c0_i32_0 : i32, i32
  }
  func.func @transform_10(%arg0: i32) -> (i32, i32) {
    %c0_i32 = arith.constant 0 : i32
    %c0_i32_0 = arith.constant 0 : i32
    %c0_i32_1 = arith.constant 0 : i32
    return %c0_i32, %c0_i32_0 : i32, i32
  }
  func.func @transform_11(%arg0: i32) -> (i32, i32) {
    %c0_i32 = arith.constant 0 : i32
    %c0_i32_0 = arith.constant 0 : i32
    %c0_i32_1 = arith.constant 0 : i32
    return %c0_i32, %c0_i32_0 : i32, i32
  }
  func.func @transform_12(%arg0: i32) -> (i32, i32) {
    %c0_i32 = arith.constant 0 : i32
    %c0_i32_0 = arith.constant 0 : i32
    %c0_i32_1 = arith.constant 0 : i32
    return %c0_i32, %c0_i32_0 : i32, i32
  }
  func.func @transform_13(%arg0: i32) -> (i32, i32) {
    %c0_i32 = arith.constant 0 : i32
    %c0_i32_0 = arith.constant 0 : i32
    %c0_i32_1 = arith.constant 0 : i32
    return %c0_i32, %c0_i32_0 : i32, i32
  }
  func.func @transform_14(%arg0: i32) -> (i32, i32) {
    %c0_i32 = arith.constant 0 : i32
    %c0_i32_0 = arith.constant 0 : i32
    %c0_i32_1 = arith.constant 0 : i32
    return %c0_i32, %c0_i32_0 : i32, i32
  }
  func.func @transform_15(%arg0: i32) -> (i32, i32) {
    %c0_i32 = arith.constant 0 : i32
    %c0_i32_0 = arith.constant 0 : i32
    %c0_i32_1 = arith.constant 0 : i32
    return %c0_i32, %c0_i32_0 : i32, i32
  }
  func.func @transform_16(%arg0: i32) -> (i32, i32) {
    %c0_i32 = arith.constant 0 : i32
    %c0_i32_0 = arith.constant 0 : i32
    %c0_i32_1 = arith.constant 0 : i32
    return %c0_i32, %c0_i32_0 : i32, i32
  }
  func.func @transform_17(%arg0: i32) -> (i32, i32) {
    %c0_i32 = arith.constant 0 : i32
    %c0_i32_0 = arith.constant 0 : i32
    %c0_i32_1 = arith.constant 0 : i32
    return %c0_i32, %c0_i32_0 : i32, i32
  }
  func.func @transform_18(%arg0: i32) -> (i32, i32) {
    %c0_i32 = arith.constant 0 : i32
    %c0_i32_0 = arith.constant 0 : i32
    %c0_i32_1 = arith.constant 0 : i32
    return %c0_i32, %c0_i32_0 : i32, i32
  }
  func.func @transform_19(%arg0: i32) -> (i32, i32) {
    %c0_i32 = arith.constant 0 : i32
    %c0_i32_0 = arith.constant 0 : i32
    %c0_i32_1 = arith.constant 0 : i32
    return %c0_i32, %c0_i32_0 : i32, i32
  }
  func.func @transform_20(%arg0: i32) -> (i32, i32) {
    %c0_i32 = arith.constant 0 : i32
    %c0_i32_0 = arith.constant 0 : i32
    %c0_i32_1 = arith.constant 0 : i32
    return %c0_i32, %c0_i32_0 : i32, i32
  }
  func.func @transform_21(%arg0: i32) -> (i32, i32) {
    %c0_i32 = arith.constant 0 : i32
    %c0_i32_0 = arith.constant 0 : i32
    %c0_i32_1 = arith.constant 0 : i32
    return %c0_i32, %c0_i32_0 : i32, i32
  }
  func.func @transform_22(%arg0: i32) -> (i32, i32) {
    %c0_i32 = arith.constant 0 : i32
    %c0_i32_0 = arith.constant 0 : i32
    %c0_i32_1 = arith.constant 0 : i32
    return %c0_i32, %c0_i32_0 : i32, i32
  }
  func.func @transform_23(%arg0: i32) -> (i32, i32) {
    %c0_i32 = arith.constant 0 : i32
    %c0_i32_0 = arith.constant 0 : i32
    %c0_i32_1 = arith.constant 0 : i32
    return %c0_i32, %c0_i32_0 : i32, i32
  }
  func.func @transform_24(%arg0: i32) -> (i32, i32) {
    %c0_i32 = arith.constant 0 : i32
    %c0_i32_0 = arith.constant 0 : i32
    %c0_i32_1 = arith.constant 0 : i32
    return %c0_i32, %c0_i32_0 : i32, i32
  }
  func.func @transform_25(%arg0: i32) -> (i32, i32) {
    %c0_i32 = arith.constant 0 : i32
    %c0_i32_0 = arith.constant 0 : i32
    %c0_i32_1 = arith.constant 0 : i32
    return %c0_i32, %c0_i32_0 : i32, i32
  }
  func.func @transform_26(%arg0: i32) -> (i32, i32) {
    %c0_i32 = arith.constant 0 : i32
    %c0_i32_0 = arith.constant 0 : i32
    %c0_i32_1 = arith.constant 0 : i32
    return %c0_i32, %c0_i32_0 : i32, i32
  }
  func.func @transform_27(%arg0: i32) -> (i32, i32) {
    %c0_i32 = arith.constant 0 : i32
    %c0_i32_0 = arith.constant 0 : i32
    %c0_i32_1 = arith.constant 0 : i32
    return %c0_i32, %c0_i32_0 : i32, i32
  }
  func.func @transform_28(%arg0: i32) -> (i32, i32) {
    %c0_i32 = arith.constant 0 : i32
    %c0_i32_0 = arith.constant 0 : i32
    %c0_i32_1 = arith.constant 0 : i32
    return %c0_i32, %c0_i32_0 : i32, i32
  }
  func.func @transform_29(%arg0: i32) -> (i32, i32) {
    %c0_i32 = arith.constant 0 : i32
    %c0_i32_0 = arith.constant 0 : i32
    %c0_i32_1 = arith.constant 0 : i32
    return %c0_i32, %c0_i32_0 : i32, i32
  }
  func.func @transform_30(%arg0: i32) -> (i32, i32) {
    %c0_i32 = arith.constant 0 : i32
    %c0_i32_0 = arith.constant 0 : i32
    %c0_i32_1 = arith.constant 0 : i32
    return %c0_i32, %c0_i32_0 : i32, i32
  }
  func.func @transform_31(%arg0: i32) -> (i32, i32) {
    %c0_i32 = arith.constant 0 : i32
    %c0_i32_0 = arith.constant 0 : i32
    %c0_i32_1 = arith.constant 0 : i32
    return %c0_i32, %c0_i32_0 : i32, i32
  }
  func.func @transform_32(%arg0: i32) -> (i32, i32) {
    %c0_i32 = arith.constant 0 : i32
    %c0_i32_0 = arith.constant 0 : i32
    %c0_i32_1 = arith.constant 0 : i32
    return %c0_i32, %c0_i32_0 : i32, i32
  }
  func.func @transform_33(%arg0: i32) -> (i32, i32) {
    %c0_i32 = arith.constant 0 : i32
    %c0_i32_0 = arith.constant 0 : i32
    %c0_i32_1 = arith.constant 0 : i32
    return %c0_i32, %c0_i32_0 : i32, i32
  }
  func.func @transform_34(%arg0: i32) -> (i32, i32) {
    %c0_i32 = arith.constant 0 : i32
    %c0_i32_0 = arith.constant 0 : i32
    %c0_i32_1 = arith.constant 0 : i32
    return %c0_i32, %c0_i32_0 : i32, i32
  }
  func.func @transform_35(%arg0: i32) -> (i32, i32) {
    %c0_i32 = arith.constant 0 : i32
    %c0_i32_0 = arith.constant 0 : i32
    %c0_i32_1 = arith.constant 0 : i32
    return %c0_i32, %c0_i32_0 : i32, i32
  }
  func.func @transform_36(%arg0: i32) -> (i32, i32) {
    %c0_i32 = arith.constant 0 : i32
    %c0_i32_0 = arith.constant 0 : i32
    %c0_i32_1 = arith.constant 0 : i32
    return %c0_i32, %c0_i32_0 : i32, i32
  }
  func.func @transform_37(%arg0: i32) -> (i32, i32) {
    %c0_i32 = arith.constant 0 : i32
    %c0_i32_0 = arith.constant 0 : i32
    %c0_i32_1 = arith.constant 0 : i32
    return %c0_i32, %c0_i32_0 : i32, i32
  }
  func.func @transform_38(%arg0: i32) -> (i32, i32, i32) {
    %c0_i32 = arith.constant 0 : i32
    %c0_i32_0 = arith.constant 0 : i32
    %c0_i32_1 = arith.constant 0 : i32
    return %arg0, %c0_i32, %c0_i32_0 : i32, i32, i32
  }
}

</mosaic_0001>

<bundles_post_ra>
// kernel: winner_transformer_forward.1
= control target key start
LH: loop header
LB: loop body
LE: loop exit
PB: predicated region body
PF: predicated region fallthrough
CT: control target
= control target key end

     0   :  { %s8591_s6 = smov 1   ;;  %s8592_s10 = smov 2   ;;  %s9725_s0 = inlined_call_operand.smem [shape: u32[39], index: -1, kind: input, shape index: {}] }
   0x1   :  { %s8683_s5 = sld [smem:[%s9725_s0]]   ;;  %s8593_s14 = smov 3  }
   0x2   :  { %s8688_s9 = sld [smem:[%s9725_s0 + %s8591_s6]]   ;;  %s8594_s18 = smov 4  }
   0x3   :  { %s8693_s13 = sld [smem:[%s9725_s0 + %s8592_s10]]   ;;  %s8595_s22 = smov 5  }
   0x4   :  { %s8698_s17 = sld [smem:[%s9725_s0 + %s8593_s14]]   ;;  %s8596_s26 = smov 6  }
   0x5   :  { %s8703_s21 = sld [smem:[%s9725_s0 + %s8594_s18]]   ;;  %s8597_s30 = smov 7  }
   0x6   :  { %s8708_s25 = sld [smem:[%s9725_s0 + %s8595_s22]]   ;;  %s8598_s4 = smov 8  }
   0x7   :  { %9742 = sst [smem:[#allocation75_spill]] %s8683_s5  ;;  %s8599_s10 = smov 9  }
   0x8   :  { %9743 = sst [smem:[#allocation76_spill]] %s8688_s9  ;;  %s8600_s15 = smov 10  }
   0x9   :  { %9744 = sst [smem:[#allocation77_spill]] %s8693_s13  ;;  %s8601_s20 = smov 11  }
   0xa   :  { %9745 = sst [smem:[#allocation78_spill]] %s8698_s17  ;;  %s8603_s1 = smov 13  }
   0xb   :  { %9746 = sst [smem:[#allocation79_spill]] %s8703_s21  ;;  %s8604_s7 = smov 14  }
   0xc   :  { %9747 = sst [smem:[#allocation80_spill]] %s8708_s25  ;;  %s8606_s22 = smov 16  }
   0xd   :  { %s8713_s29 = sld [smem:[%s9725_s0 + %s8596_s26]]   ;;  %s8602_s26 = smov 12  }
   0xe   :  { %s8718_s3 = sld [smem:[%s9725_s0 + %s8597_s30]]   ;;  %s8607_s28 = smov 17  }
   0xf   :  { %s8723_s8 = sld [smem:[%s9725_s0 + %s8598_s4]]  }
  0x10   :  { %s8728_s14 = sld [smem:[%s9725_s0 + %s8599_s10]]  }
  0x11   :  { %s8733_s19 = sld [smem:[%s9725_s0 + %s8600_s15]]   ;;  %s8605_s15 = smov 15  }
  0x12   :  { %s8738_s24 = sld [smem:[%s9725_s0 + %s8601_s20]]  }
  0x13   :  { %s8743_s30 = sld [smem:[%s9725_s0 + %s8602_s26]]  }
  0x14   :  { %9748 = sst [smem:[#allocation81_spill]] %s8718_s3 }
  0x15   :  { %9749 = sst [smem:[#allocation82_spill]] %s8723_s8 }
  0x16   :  { %9750 = sst [smem:[#allocation83_spill]] %s8728_s14 }
  0x17   :  { %s8748_s6 = sld [smem:[%s9725_s0 + %s8603_s1]]  }
  0x18   :  { %9751 = sst [smem:[#allocation84_spill]] %s8738_s24 }
  0x19   :  { %s8753_s12 = sld [smem:[%s9725_s0 + %s8604_s7]]   ;;  %s8608_s7 = smov 18  }
  0x1a   :  { %s8758_s20 = sld [smem:[%s9725_s0 + %s8605_s15]]   ;;  %s8609_s15 = smov 19  }
  0x1b   :  { %s8763_s27 = sld [smem:[%s9725_s0 + %s8606_s22]]   ;;  %s8610_s22 = smov 20  }
  0x1c   :  { %s8768_s4 = sld [smem:[%s9725_s0 + %s8607_s28]]   ;;  %s8611_s28 = smov 21  }
  0x1d   :  { %9752 = sst [smem:[#allocation85_spill]] %s8748_s6 }
  0x1e   :  { %s8773_s25 = sld [smem:[%s9725_s0 + %s8608_s7]]   ;;  %s8612_s7 = smov 22  }
  0x1f   :  { %s8778_s9 = sld [smem:[%s9725_s0 + %s8609_s15]]   ;;  %s8613_s15 = smov 23  }
  0x20   :  { %9753 = sst [smem:[#allocation86_spill]] %s8758_s20 }
  0x21   :  { %s8783_s5 = sld [smem:[%s9725_s0 + %s8610_s22]]   ;;  %s8614_s22 = smov 24  }
  0x22   :  { %9754 = sst [smem:[#allocation87_spill]] %s8768_s4 }
  0x23   :  { %s8788_s4 = sld [smem:[%s9725_s0 + %s8611_s28]]   ;;  %s8615_s28 = smov 25  }
  0x24   :  { %s8793_s20 = sld [smem:[%s9725_s0 + %s8612_s7]]   ;;  %s8616_s7 = smov 26  }
  0x25   :  { %9755 = sst [smem:[#allocation88_spill]] %s8778_s9 }
  0x26   :  { %s8798_s9 = sld [smem:[%s9725_s0 + %s8613_s15]]   ;;  %s8617_s15 = smov 27  }
  0x27   :  { %9756 = sst [smem:[#allocation89_spill]] %s8783_s5 }
  0x28   :  { %s8803_s6 = sld [smem:[%s9725_s0 + %s8614_s22]]   ;;  %s8618_s22 = smov 28  }
  0x29   :  { %9757 = sst [smem:[#allocation90_spill]] %s8788_s4 }
  0x2a   :  { %s8808_s4 = sld [smem:[%s9725_s0 + %s8615_s28]]   ;;  %s8619_s28 = smov 29  }
  0x2b   :  { %s8813_s24 = sld [smem:[%s9725_s0 + %s8616_s7]]   ;;  %s8620_s7 = smov 30  }
  0x2c   :  { %9758 = sst [smem:[#allocation91_spill]] %s8798_s9 }
  0x2d   :  { %s8818_s9 = sld [smem:[%s9725_s0 + %s8617_s15]]   ;;  %s8621_s15 = smov 31  }
  0x2e   :  { %s8823_s14 = sld [smem:[%s9725_s0 + %s8618_s22]]   ;;  %s8622_s22 = smov 32  }
  0x2f   :  { %s8833_s3 = sld [smem:[%s9725_s0 + %s8620_s7]]   ;;  %s8624_s7 = smov 34  }
  0x30   :  { %9759 = sst [smem:[#allocation92_spill]] %s8808_s4 }
  0x31   :  { %s8828_s4 = sld [smem:[%s9725_s0 + %s8619_s28]]   ;;  %s8623_s28 = smov 33  }
  0x32   :  { %s8843_s21 = sld [smem:[%s9725_s0 + %s8622_s22]]   ;;  %s8626_s22 = smov 36  }
  0x33   :  { %9760 = sst [smem:[#allocation93_spill]] %s8818_s9 }
  0x34   :  { %s8838_s9 = sld [smem:[%s9725_s0 + %s8621_s15]]   ;;  %s8625_s15 = smov 35  }
  0x35   :  { %s8853_s13 = sld [smem:[%s9725_s0 + %s8624_s7]]   ;;  %s8628_s7 = smov 38  }
  0x37   :  { %9761 = sst [smem:[#allocation94_spill]] %s8828_s4 }
  0x38   :  { %9763 = sst [smem:[#allocation96_spill]] %s8843_s21 }
  0x39   :  { %s8848_s4 = sld [smem:[%s9725_s0 + %s8623_s28]]   ;;  %s8627_s28 = smov 37  }
  0x3a   :  { %9762 = sst [smem:[#allocation95_spill]] %s8838_s9 }
  0x3b   :  { %9765 = sst [smem:[#allocation98_spill]] %s8853_s13 }
  0x3c   :  { %s8858_s9 = sld [smem:[%s9725_s0 + %s8625_s15]]  }
  0x3d   :  { %s8863_s21 = sld [smem:[%s9725_s0 + %s8626_s22]]  }
  0x3e   :  { %s8873_s13 = sld [smem:[%s9725_s0 + %s8628_s7]]  }
  0x3f   :  { %9764 = sst [smem:[#allocation97_spill]] %s8848_s4 }
  0x40   :  { %s8868_s4 = sld [smem:[%s9725_s0 + %s8627_s28]]  }
  0x41   :  { %82 = vsyncpa [#allocation3], 0 }
  0x42   :  { %83 = vsyncpa [#allocation6], 0 }
  0x43   :  { %84 = vsyncpa [#allocation9], 0 }
  0x44   :  { %85 = vsyncpa [#allocation12], 0 }
  0x45   :  { %86 = vsyncpa [#allocation15], 0 }
  0x46   :  { %87 = vsyncpa [#allocation18], 0 }
  0x47   :  { %88 = vsyncpa [#allocation21], 0 }
  0x48   :  { %89 = vsyncpa [#allocation24], 0 }
  0x49   :  { %90 = vsyncpa [#allocation27], 0 }
  0x4a   :  { %91 = vsyncpa [#allocation30], 0 }
  0x4b   :  { %92 = vsyncpa [#allocation33], 0 }
  0x4c   :  { %93 = vsyncpa [#allocation36], 0 }
  0x4d   :  { %94 = vsyncpa [#allocation39], 0 }
  0x4e   :  { %95 = vsyncpa [#allocation42], 0 }
  0x4f   :  { %96 = vsyncpa [#allocation45], 0 }
  0x50   :  { %97 = vsyncpa [#allocation48], 0 }
  0x51   :  { %98 = vsyncpa [#allocation51], 0 }
  0x52   :  { %99 = vsyncpa [#allocation54], 0 }
  0x53   :  { %100 = vsyncpa [#allocation4], 0 }
  0x54   :  { %102 = vsyncpa [#allocation4 + $0x1], 0  ;;  %s8875_s0 = smov 0   ;;  %s8877_s15 = smov 0  }
  0x55   :  { %s8879_s16 = smov 0   ;;  %s8881_s18 = smov 0  }
  0x56 LB: > { %9766 = sst [smem:[#allocation99_spill]] %s8577_s0  ;;  %s8896_s22 = sadd.s32 4294967295, %s8589_s18   ;;  %s8589_s18 = sphi %s8881_s18, %s9808_s18   ;;  %s8585_s16 = sphi %s8879_s16, %s9810_s16   ;;  %s8581_s15 = sphi %s8877_s15, %s9812_s15   ;;  %s8577_s0 = sphi %s8875_s0, %s9811_s0  }
  0x57   : > { %9767 = sst [smem:[#allocation100_spill]] %s8585_s16  ;;  %s6455_s23 = sadd.s32 4294967294, %s8589_s18  }
  0x58   : > { %s8900_s26 = sadd.s32 1, %s8589_s18   ;;  %s923_s28 = sadd.s32 1, %s8585_s16 }
  0x59   : > { %9768 = sst [smem:[#allocation101_spill]] %s8900_s26  ;;  %s920_s1 = ssub.s32 %s8589_s18, %s8900_s26 }
  0x5a   : > { %p933_p0 = scmp.ne.s32.totalorder %s8585_s16, %s8581_s15  ;;  %p921_p1 = scmp.eq.s32.totalorder %s920_s1, 0 }
  0x5b   : > { %p934_p2 = scmp.eq.s32.totalorder %s8896_s22, 1  ;;  %p939_p3 = scmp.ne.s32.totalorder %s8581_s15, %s8577_s0 }
  0x5c   : > { %p940_p4 = scmp.eq.s32.totalorder %s6455_s23, 1  ;;  %p6456_p7 = scmp.ge.s32.totalorder %s8589_s18, 1 }
  0x5d   : > { %s8911_s2 = scalar_select %p921_p1, %s8585_s16, %s923_s28  }
  0x5e   : > { %p8913_p5 = por %p934_p2, %p933_p0  ;;  %p8917_p6 = por %p940_p4, %p939_p3 }
  0x5f   : > { %9769 = sst [smem:[#allocation102_spill]] %s8911_s2  ;;  %p947_p8 = scmp.lt.s32.totalorder %s8589_s18, 3 }
  0x60   : > { %s9770_s7 = scalar_select %p8913_p5, 1, 0 }
  0x61   : > { %s9771_s10 = scalar_select %p8917_p6, 1, 0 }
  0x62   : > { %p8923_p9 = pnand %p6456_p7, %p947_p8 }
  0x63   : > { %9772 = sst [smem:[#allocation103_spill]] %s9771_s10  ;;  %p7399_p10 = scmp.eq.s32.totalorder (!%p8923_p9), %s8896_s22, 0 }
  0x64   : > { %951 = sbr.rel (%p8923_p9) target bundleno = 495 (0x1ef), region = 12  ;;  %s8629_s23 = smov (!%p8923_p9), [#allocation5]  }
  0x65   : > { %s973_s28 = sshll.u32 (!%p8923_p9), %s8629_s23, 4  ;;  %s974_s28 = int_to_ptr.vmem [resolvable:$true] %s973_s28 }
  0x66   : > { %s7651_s1 = scalar_lea.vmem (!%p8923_p9), %s974_s28, 16  ;;  %s7657_s2 = scalar_lea.vmem (!%p8923_p9), %s974_s28, 32 }
  0x67   : > { %p7652_p11 = scmp.ne.s32.totalorder (!%p8923_p9), %s974_s28, %s7651_s1  ;;  %p7658_p0 = scmp.lt.s32.totalorder (!%p8923_p9), %s974_s28, %s974_s28 }
  0x68   : > { %p7659_p1 = scmp.lt.s32.totalorder (!%p8923_p9), %s7657_s2, %s7651_s1 }
  0x69   : > { %p7653_p12 = pnand %p7652_p11, %p7399_p10 }
  0x6a   : > { %p7660_p2 = por %p7659_p1, %p7658_p0 }
  0x6b   : > { %p7654_p13 = pneg %p7653_p12 }
  0x6d   : > { %p7661_p3 = pnand %p7660_p2, %p7654_p13 }
  0x6f   : > { %7664 = shalt.err (!%p7661_p3)
}
  0x70   : > { %s9774_s17 = sld [smem:[#allocation78_spill]]  ;;  %s8630_s16 = smov [#allocation8]  }
  0x71   : > { %s999_s26 = sshll.u32 %s8630_s16, 4  ;;  %s8631_s23 = smov [#allocation11]   ;;  %s1000_s26 = int_to_ptr.vmem [resolvable:$true] %s999_s26 }
  0x72   : > { %s1024_s10 = sshll.u32 %s8631_s23, 4  ;;  %s7675_s0 = scalar_lea.vmem %s1000_s26, 2048  ;;  %s1025_s10 = int_to_ptr.vmem [resolvable:$true] %s1024_s10 }
  0x73   : > { %p7676_p4 = scmp.ne.s32.totalorder %s1000_s26, %s7675_s0  ;;  %p7682_p11 = scmp.lt.s32.totalorder %s1000_s26, %s1000_s26 }
  0x74   : > { %p7683_p12 = scmp.lt.s32.totalorder %s7675_s0, %s7675_s0 }
  0x75   : > { %p7677_p7 = pnand %p7676_p4, %p7399_p10 }
  0x76   : > { %7260 = dma.hbm_to_vmem [thread:$0]  (%p7399_p10), %s9774_s17, 16, %s974_s28, [#allocation6]  }
  0x77   : > { %p7678_p8 = pneg %p7677_p7  ;;  %p7684_p13 = por %p7683_p12, %p7682_p11 }
  0x79   : > { %p7685_p0 = pnand %p7684_p13, %p7678_p8 }
  0x7b   : > { %7688 = shalt.err (!%p7685_p0)
}
  0x7c   : > { %s9732_s2 = smov 128   ;;  %s9734_s28 = smov 8  }
  0x7d   : > { %7264 = dma.hbm_to_vmem [thread:$0]  (%p7399_p10), %s8713_s29, 2048, %s1000_s26, [#allocation9], %s9732_s2, %s9732_s2, %s9734_s28  }
  0x7e   : > { %s7699_s16 = scalar_lea.vmem %s1025_s10, 16  ;;  %s7705_s1 = scalar_lea.vmem %s1025_s10, 32 }
  0x7f   : > { %p7700_p1 = scmp.ne.s32.totalorder %s1025_s10, %s7699_s16  ;;  %p7706_p4 = scmp.lt.s32.totalorder %s1025_s10, %s1025_s10 }
  0x80   : > { %p7707_p7 = scmp.lt.s32.totalorder %s7705_s1, %s7699_s16 }
  0x81   : > { %p7701_p2 = pnand %p7700_p1, %p7399_p10 }
  0x82   : > { %p7708_p8 = por %p7707_p7, %p7706_p4 }
  0x83   : > { %p7702_p3 = pneg %p7701_p2 }
  0x85   : > { %p7709_p11 = pnand %p7708_p8, %p7702_p3 }
  0x87   : > { %7712 = shalt.err (!%p7709_p11)
}
  0x88   : > { %s9775_s8 = sld [smem:[#allocation82_spill]]  ;;  %s8634_s0 = smov [#allocation14]  }
  0x89   : > { %s1045_s23 = sshll.u32 %s8634_s0, 4  ;;  %s1046_s23 = int_to_ptr.vmem [resolvable:$true] %s1045_s23 }
  0x8a   : > { %s7723_s26 = scalar_lea.vmem %s1046_s23, 4096  ;;  %p7730_p1 = scmp.lt.s32.totalorder %s1046_s23, %s1046_s23 }
  0x8b   : > { %p7724_p12 = scmp.ne.s32.totalorder %s1046_s23, %s7723_s26  ;;  %p7731_p2 = scmp.lt.s32.totalorder %s7723_s26, %s7723_s26 }
  0x8d   : > { %p7725_p13 = pnand %p7724_p12, %p7399_p10  ;;  %p7732_p6 = por %p7731_p2, %p7730_p1 }
  0x8e   : > { %7268 = dma.hbm_to_vmem [thread:$0]  (%p7399_p10), %s9775_s8, 16, %s1025_s10, [#allocation12]  }
  0x8f   : > { %p7726_p0 = pneg %p7725_p13 }
  0x91   : > { %p7733_p5 = pnand %p7732_p6, %p7726_p0 }
  0x93   : > { %7736 = shalt.err (!%p7733_p5)
}
  0x94   : > { %s9736_s16 = smov 256   ;;  %s9738_s1 = smov 16  }
  0x95   : > { %7272 = dma.hbm_to_vmem [thread:$0]  (%p7399_p10), %s8733_s19, 4096, %s1046_s23, [#allocation15], %s9736_s16, %s9736_s16, %s9738_s1  }
  0x96   : > { %s8637_s10 = smov [#allocation17]   ;;  %s8638_s2 = smov [#allocation20]  }
  0x97   : > { %s1069_s0 = sshll.u32 %s8637_s10, 4  ;;  %s1094_s28 = sshll.u32 %s8638_s2, 4  ;;  %s1070_s0 = int_to_ptr.vmem [resolvable:$true] %s1069_s0  ;;  %s1095_s28 = int_to_ptr.vmem [resolvable:$true] %s1094_s28 }
  0x98   : > { %s7747_s8 = scalar_lea.vmem %s1070_s0, 4096  ;;  %p7754_p4 = scmp.lt.s32.totalorder %s1070_s0, %s1070_s0 }
  0x99   : > { %p7748_p3 = scmp.ne.s32.totalorder %s1070_s0, %s7747_s8  ;;  %p7755_p7 = scmp.lt.s32.totalorder %s7747_s8, %s7747_s8 }
  0x9b   : > { %p7749_p6 = pnand %p7748_p3, %p7399_p10  ;;  %p7756_p8 = por %p7755_p7, %p7754_p4 }
  0x9d   : > { %p7750_p5 = pneg %p7749_p6 }
  0x9f   : > { %p7757_p11 = pnand %p7756_p8, %p7750_p5 }
  0xa1   : > { %7760 = shalt.err (!%p7757_p11)
}
  0xa2   : > { %s9776_s26 = smov 8   ;;  %s9777_s17 = smov 128  }
  0xa3   : > { %7276 = dma.hbm_to_vmem [thread:$0]  (%p7399_p10), %s8743_s30, 4096, %s1070_s0, [#allocation18], %s9777_s17, %s9777_s17, %s9776_s26  }
  0xa4   : > { %s7771_s2 = scalar_lea.vmem %s1095_s28, 16  ;;  %s7777_s23 = scalar_lea.vmem %s1095_s28, 32 }
  0xa5   : > { %p7772_p12 = scmp.ne.s32.totalorder %s1095_s28, %s7771_s2  ;;  %p7778_p1 = scmp.lt.s32.totalorder %s1095_s28, %s1095_s28 }
  0xa6   : > { %p7779_p2 = scmp.lt.s32.totalorder %s7777_s23, %s7771_s2 }
  0xa7   : > { %p7773_p13 = pnand %p7772_p12, %p7399_p10 }
  0xa8   : > { %p7780_p3 = por %p7779_p2, %p7778_p1 }
  0xa9   : > { %p7774_p0 = pneg %p7773_p13 }
  0xab   : > { %p7781_p6 = pnand %p7780_p3, %p7774_p0 }
  0xad   : > { %7784 = shalt.err (!%p7781_p6)
}
  0xae   : > { %7280 = dma.hbm_to_vmem [thread:$0]  (%p7399_p10), %s8753_s12, 16, %s1095_s28, [#allocation21]  }
  0xaf   : > { %s8639_s8 = smov [#allocation23]   ;;  %s8640_s0 = smov [#allocation26]  }
  0xb0   : > { %s1115_s10 = sshll.u32 %s8639_s8, 4  ;;  %s1139_s16 = sshll.u32 %s8640_s0, 4  ;;  %s1116_s10 = int_to_ptr.vmem [resolvable:$true] %s1115_s10  ;;  %s1140_s16 = int_to_ptr.vmem [resolvable:$true] %s1139_s16 }
  0xb1   : > { %s7795_s1 = scalar_lea.vmem %s1116_s10, 6144  ;;  %p7802_p8 = scmp.lt.s32.totalorder %s1116_s10, %s1116_s10 }
  0xb2   : > { %p7796_p5 = scmp.ne.s32.totalorder %s1116_s10, %s7795_s1  ;;  %p7803_p11 = scmp.lt.s32.totalorder %s7795_s1, %s7795_s1 }
  0xb4   : > { %p7797_p4 = pnand %p7796_p5, %p7399_p10  ;;  %p7804_p12 = por %p7803_p11, %p7802_p8 }
  0xb6   : > { %p7798_p7 = pneg %p7797_p4 }
  0xb8   : > { %p7805_p13 = pnand %p7804_p12, %p7798_p7 }
  0xba   : > { %7808 = shalt.err (!%p7805_p13)
}
  0xbb   : > { %s9740_s2 = smov 384   ;;  %s9741_s28 = smov 24  }
  0xbc   : > { %7284 = dma.hbm_to_vmem [thread:$0]  (%p7399_p10), %s8763_s27, 6144, %s1116_s10, [#allocation24], %s9740_s2, %s9740_s2, %s9741_s28  }
  0xbd   : > { %s7819_s23 = scalar_lea.vmem %s1140_s16, 2048  ;;  %p7826_p3 = scmp.lt.s32.totalorder %s1140_s16, %s1140_s16 }
  0xbe   : > { %p7820_p0 = scmp.ne.s32.totalorder %s1140_s16, %s7819_s23  ;;  %p7827_p6 = scmp.lt.s32.totalorder %s7819_s23, %s7819_s23 }
  0xc0   : > { %p7821_p1 = pnand %p7820_p0, %p7399_p10  ;;  %p7828_p5 = por %p7827_p6, %p7826_p3 }
  0xc2   : > { %p7822_p2 = pneg %p7821_p1 }
  0xc4   : > { %p7829_p4 = pnand %p7828_p5, %p7822_p2 }
  0xc6   : > { %7832 = shalt.err (!%p7829_p4)
}
  0xc7   : > { %7288 = dma.hbm_to_vmem [thread:$0]  (%p7399_p10), %s8773_s25, 2048, %s1140_s16, [#allocation27], %s9777_s17, %s9777_s17, %s9776_s26  }
  0xc8   : > { %s8643_s1 = smov [#allocation29]   ;;  %s8644_s10 = smov [#allocation32]  }
  0xc9   : > { %s1164_s8 = sshll.u32 %s8643_s1, 4  ;;  %s1185_s0 = sshll.u32 %s8644_s10, 4  ;;  %s1165_s8 = int_to_ptr.vmem [resolvable:$true] %s1164_s8  ;;  %s1186_s0 = int_to_ptr.vmem [resolvable:$true] %s1185_s0 }
  0xca   : > { %s7843_s2 = scalar_lea.vmem %s1165_s8, 16  ;;  %s7849_s23 = scalar_lea.vmem %s1165_s8, 32 }
  0xcb   : > { %p7844_p7 = scmp.ne.s32.totalorder %s1165_s8, %s7843_s2  ;;  %p7850_p12 = scmp.lt.s32.totalorder %s1165_s8, %s1165_s8 }
  0xcc   : > { %p7851_p13 = scmp.lt.s32.totalorder %s7849_s23, %s7843_s2 }
  0xcd   : > { %p7845_p8 = pnand %p7844_p7, %p7399_p10 }
  0xce   : > { %p7852_p0 = por %p7851_p13, %p7850_p12 }
  0xcf   : > { %p7846_p11 = pneg %p7845_p8 }
  0xd1   : > { %p7853_p1 = pnand %p7852_p0, %p7846_p11 }
  0xd3   : > { %7856 = shalt.err (!%p7853_p1)
}
  0xd4   : > { %s9778_s5 = sld [smem:[#allocation89_spill]]  ;;  %s7867_s16 = scalar_lea.vmem %s1186_s0, 2048 }
  0xd5   : > { %p7868_p2 = scmp.ne.s32.totalorder %s1186_s0, %s7867_s16  ;;  %p7874_p5 = scmp.lt.s32.totalorder %s1186_s0, %s1186_s0 }
  0xd6   : > { %p7875_p4 = scmp.lt.s32.totalorder %s7867_s16, %s7867_s16 }
  0xd7   : > { %p7869_p3 = pnand %p7868_p2, %p7399_p10 }
  0xd8   : > { %p7876_p7 = por %p7875_p4, %p7874_p5 }
  0xd9   : > { %p7870_p6 = pneg %p7869_p3 }
  0xda   : > { %7292 = dma.hbm_to_vmem [thread:$0]  (%p7399_p10), %s9778_s5, 16, %s1165_s8, [#allocation30]  }
  0xdb   : > { %p7877_p8 = pnand %p7876_p7, %p7870_p6 }
  0xdd   : > { %7880 = shalt.err (!%p7877_p8)
}
  0xde   : > { %7296 = dma.hbm_to_vmem [thread:$0]  (%p7399_p10), %s8793_s20, 2048, %s1186_s0, [#allocation33], %s9777_s17, %s9777_s17, %s9776_s26  }
  0xdf   : > { %s8645_s2 = smov [#allocation35]   ;;  %s8646_s8 = smov [#allocation38]  }
  0xe0   : > { %s1209_s1 = sshll.u32 %s8645_s2, 4  ;;  %s1233_s10 = sshll.u32 %s8646_s8, 4  ;;  %s1210_s1 = int_to_ptr.vmem [resolvable:$true] %s1209_s1  ;;  %s1234_s10 = int_to_ptr.vmem [resolvable:$true] %s1233_s10 }
  0xe1   : > { %s7891_s23 = scalar_lea.vmem %s1210_s1, 4096  ;;  %p7898_p0 = scmp.lt.s32.totalorder %s1210_s1, %s1210_s1 }
  0xe2   : > { %p7892_p11 = scmp.ne.s32.totalorder %s1210_s1, %s7891_s23  ;;  %p7899_p1 = scmp.lt.s32.totalorder %s7891_s23, %s7891_s23 }
  0xe4   : > { %p7893_p12 = pnand %p7892_p11, %p7399_p10  ;;  %p7900_p2 = por %p7899_p1, %p7898_p0 }
  0xe6   : > { %p7894_p13 = pneg %p7893_p12 }
  0xe8   : > { %p7901_p3 = pnand %p7900_p2, %p7894_p13 }
  0xea   : > { %7904 = shalt.err (!%p7901_p3)
}
  0xeb   : > { %s9779_s16 = smov 16   ;;  %s9780_s28 = smov 256  }
  0xec   : > { %7300 = dma.hbm_to_vmem [thread:$0]  (%p7399_p10), %s8803_s6, 4096, %s1210_s1, [#allocation36], %s9780_s28, %s9780_s28, %s9779_s16  }
  0xed   : > { %s7915_s0 = scalar_lea.vmem %s1234_s10, 2048  ;;  %p7922_p7 = scmp.lt.s32.totalorder %s1234_s10, %s1234_s10 }
  0xee   : > { %p7916_p6 = scmp.ne.s32.totalorder %s1234_s10, %s7915_s0  ;;  %p7923_p8 = scmp.lt.s32.totalorder %s7915_s0, %s7915_s0 }
  0xf0   : > { %p7917_p5 = pnand %p7916_p6, %p7399_p10  ;;  %p7924_p11 = por %p7923_p8, %p7922_p7 }
  0xf2   : > { %p7918_p4 = pneg %p7917_p5 }
  0xf4   : > { %p7925_p12 = pnand %p7924_p11, %p7918_p4 }
  0xf6   : > { %7928 = shalt.err (!%p7925_p12)
}
  0xf7   : > { %7304 = dma.hbm_to_vmem [thread:$0]  (%p7399_p10), %s8813_s24, 2048, %s1234_s10, [#allocation39], %s9777_s17, %s9777_s17, %s9776_s26  }
  0xf8   : > { %s8647_s2 = smov [#allocation41]   ;;  %s8648_s8 = smov [#allocation44]  }
  0xf9   : > { %s1258_s1 = sshll.u32 %s8647_s2, 4  ;;  %s1279_s23 = sshll.u32 %s8648_s8, 4  ;;  %s1259_s1 = int_to_ptr.vmem [resolvable:$true] %s1258_s1  ;;  %s1280_s23 = int_to_ptr.vmem [resolvable:$true] %s1279_s23 }
  0xfa   : > { %s7939_s5 = scalar_lea.vmem %s1259_s1, 16  ;;  %s7945_s0 = scalar_lea.vmem %s1259_s1, 32 }
  0xfb   : > { %p7940_p13 = scmp.ne.s32.totalorder %s1259_s1, %s7939_s5  ;;  %p7946_p2 = scmp.lt.s32.totalorder %s1259_s1, %s1259_s1 }
  0xfc   : > { %p7947_p3 = scmp.lt.s32.totalorder %s7945_s0, %s7939_s5 }
  0xfd   : > { %p7941_p0 = pnand %p7940_p13, %p7399_p10 }
  0xfe   : > { %p7948_p6 = por %p7947_p3, %p7946_p2 }
  0xff   : > { %p7942_p1 = pneg %p7941_p0 }
 0x101   : > { %p7949_p5 = pnand %p7948_p6, %p7942_p1 }
 0x103   : > { %7952 = shalt.err (!%p7949_p5)
}
 0x104   : > { %7308 = dma.hbm_to_vmem [thread:$0]  (%p7399_p10), %s8823_s14, 16, %s1259_s1, [#allocation42]  }
 0x105   : > { %s7963_s10 = scalar_lea.vmem %s1280_s23, 4096  ;;  %p7970_p11 = scmp.lt.s32.totalorder %s1280_s23, %s1280_s23 }
 0x106   : > { %p7964_p4 = scmp.ne.s32.totalorder %s1280_s23, %s7963_s10  ;;  %p7971_p12 = scmp.lt.s32.totalorder %s7963_s10, %s7963_s10 }
 0x108   : > { %p7965_p7 = pnand %p7964_p4, %p7399_p10  ;;  %p7972_p13 = por %p7971_p12, %p7970_p11 }
 0x10a   : > { %p7966_p8 = pneg %p7965_p7 }
 0x10c   : > { %p7973_p0 = pnand %p7972_p13, %p7966_p8 }
 0x10e   : > { %7976 = shalt.err (!%p7973_p0)
}
 0x10f   : > { %7312 = dma.hbm_to_vmem [thread:$0]  (%p7399_p10), %s8833_s3, 4096, %s1280_s23, [#allocation45], %s9780_s28, %s9780_s28, %s9779_s16  }
 0x110   : > { %s8649_s5 = smov [#allocation47]   ;;  %s8650_s1 = smov [#allocation50]  }
 0x111   : > { %s1303_s2 = sshll.u32 %s8649_s5, 4  ;;  %s1328_s8 = sshll.u32 %s8650_s1, 4  ;;  %s1304_s2 = int_to_ptr.vmem [resolvable:$true] %s1303_s2  ;;  %s1329_s8 = int_to_ptr.vmem [resolvable:$true] %s1328_s8 }
 0x112   : > { %s7987_s0 = scalar_lea.vmem %s1304_s2, 4096  ;;  %p7994_p6 = scmp.lt.s32.totalorder %s1304_s2, %s1304_s2 }
 0x113   : > { %p7988_p1 = scmp.ne.s32.totalorder %s1304_s2, %s7987_s0  ;;  %p7995_p5 = scmp.lt.s32.totalorder %s7987_s0, %s7987_s0 }
 0x115   : > { %p7989_p2 = pnand %p7988_p1, %p7399_p10  ;;  %p7996_p4 = por %p7995_p5, %p7994_p6 }
 0x117   : > { %p7990_p3 = pneg %p7989_p2 }
 0x119   : > { %p7997_p7 = pnand %p7996_p4, %p7990_p3 }
 0x11b   : > { %8000 = shalt.err (!%p7997_p7)
}
 0x11c   : > { %s9781_s28 = sld [smem:[#allocation96_spill]]  ;;  %s8011_s16 = scalar_lea.vmem %s1329_s8, 16 }
 0x11d   : > { %p8012_p8 = scmp.ne.s32.totalorder %s1329_s8, %s8011_s16  ;;  %s8017_s23 = scalar_lea.vmem %s1329_s8, 32 }
 0x11e   : > { %p8018_p13 = scmp.lt.s32.totalorder %s1329_s8, %s1329_s8  ;;  %p8019_p0 = scmp.lt.s32.totalorder %s8017_s23, %s8011_s16 }
 0x11f   : > { %p8013_p11 = pnand %p8012_p8, %p7399_p10 }
 0x120   : > { %p8020_p1 = por %p8019_p0, %p8018_p13 }
 0x121   : > { %p8014_p12 = pneg %p8013_p11 }
 0x122   : > { %7316 = dma.hbm_to_vmem [thread:$0]  (%p7399_p10), %s9781_s28, 4096, %s1304_s2, [#allocation48], %s9777_s17, %s9777_s17, %s9776_s26  }
 0x123   : > { %p8021_p2 = pnand %p8020_p1, %p8014_p12 }
 0x125   : > { %8024 = shalt.err (!%p8021_p2)
}
 0x126   : > { %s9782_s10 = sld [smem:[#allocation98_spill]]  ;;  %s8651_s5 = smov [#allocation2]  }
 0x127   : > { %s959_s1 = sshll.u32 %s8651_s5, 4  ;;  %s8652_s2 = smov [#allocation7]   ;;  %s960_s1 = int_to_ptr.vmem [resolvable:$true] %s959_s1 }
 0x128   : > { %s983_s0 = sshll.u32 %s8652_s2, 4  ;;  %s8035_s28 = scalar_lea.vmem %s960_s1, 256  ;;  %s984_s0 = int_to_ptr.vmem [resolvable:$true] %s983_s0 }
 0x129   : > { %p8036_p3 = scmp.ne.s32.totalorder %s960_s1, %s8035_s28  ;;  %p8042_p4 = scmp.lt.s32.totalorder %s960_s1, %s960_s1 }
 0x12a   : > { %p8043_p7 = scmp.lt.s32.totalorder %s8035_s28, %s8035_s28 }
 0x12b   : > { %p8037_p6 = pnand %p8036_p3, %p7399_p10 }
 0x12c   : > { %7320 = dma.hbm_to_vmem [thread:$0]  (%p7399_p10), %s9782_s10, 16, %s1329_s8, [#allocation51]  }
 0x12d   : > { %p8038_p5 = pneg %p8037_p6  ;;  %p8044_p8 = por %p8043_p7, %p8042_p4 }
 0x12f   : > { %p8045_p11 = pnand %p8044_p8, %p8038_p5 }
 0x131   : > { %8048 = shalt.err (!%p8045_p11)
}
 0x132   : > { %s9783_s8 = sld [smem:[#allocation77_spill]]  ;;  %s8059_s16 = scalar_lea.vmem %s984_s0, 6144 }
 0x133   : > { %p8060_p12 = scmp.ne.s32.totalorder %s984_s0, %s8059_s16  ;;  %p8066_p1 = scmp.lt.s32.totalorder %s984_s0, %s984_s0 }
 0x134   : > { %p8067_p2 = scmp.lt.s32.totalorder %s8059_s16, %s8059_s16 }
 0x135   : > { %p8061_p13 = pnand %p8060_p12, %p7399_p10 }
 0x136   : > { %p8068_p3 = por %p8067_p2, %p8066_p1 }
 0x137   : > { %p8062_p0 = pneg %p8061_p13 }
 0x138   : > { %7258 = dma.hbm_to_vmem [thread:$0]  (%p7399_p10), %s9783_s8, 256, %s960_s1, [#allocation3], %s9777_s17, %s9777_s17, %s9776_s26  }
 0x139   : > { %p8069_p6 = pnand %p8068_p3, %p8062_p0 }
 0x13b   : > { %8072 = shalt.err (!%p8069_p6)
}
 0x13c   : > { %s9784_s23 = smov 24   ;;  %s9785_s10 = smov 384  }
 0x13d   : > { %s9786_s5 = sld [smem:[#allocation79_spill]]  ;;  %s8653_s2 = smov [#allocation10]  }
 0x13e   : > { %s1013_s17 = sshll.u32 %s8653_s2, 4  ;;  %s8654_s26 = smov [#allocation13]   ;;  %s1014_s17 = int_to_ptr.vmem [resolvable:$true] %s1013_s17 }
 0x13f   : > { %s1035_s1 = sshll.u32 %s8654_s26, 4  ;;  %s8083_s28 = scalar_lea.vmem %s1014_s17, 16  ;;  %s1036_s1 = int_to_ptr.vmem [resolvable:$true] %s1035_s1 }
 0x140   : > { %p8084_p5 = scmp.ne.s32.totalorder %s1014_s17, %s8083_s28  ;;  %s8089_s8 = scalar_lea.vmem %s1014_s17, 32 }
 0x141   : > { %p8090_p8 = scmp.lt.s32.totalorder %s1014_s17, %s1014_s17  ;;  %p8091_p11 = scmp.lt.s32.totalorder %s8089_s8, %s8083_s28 }
 0x142   : > { %p8085_p4 = pnand %p8084_p5, %p7399_p10 }
 0x143   : > { %7262 = dma.hbm_to_vmem [thread:$0]  (%p7399_p10), %s9786_s5, 6144, %s984_s0, [#allocation6], %s9785_s10, %s9785_s10, %s9784_s23  }
 0x144   : > { %p8086_p7 = pneg %p8085_p4  ;;  %p8092_p12 = por %p8091_p11, %p8090_p8 }
 0x146   : > { %p8093_p13 = pnand %p8092_p12, %p8086_p7 }
 0x148   : > { %8096 = shalt.err (!%p8093_p13)
}
 0x149   : > { %s9787_s0 = sld [smem:[#allocation81_spill]]  ;;  %s8107_s16 = scalar_lea.vmem %s1036_s1, 16 }
 0x14a   : > { %p8108_p0 = scmp.ne.s32.totalorder %s1036_s1, %s8107_s16  ;;  %s8113_s23 = scalar_lea.vmem %s1036_s1, 32 }
 0x14b   : > { %p8114_p3 = scmp.lt.s32.totalorder %s1036_s1, %s1036_s1  ;;  %p8115_p6 = scmp.lt.s32.totalorder %s8113_s23, %s8107_s16 }
 0x14c   : > { %p8109_p1 = pnand %p8108_p0, %p7399_p10 }
 0x14d   : > { %p8116_p5 = por %p8115_p6, %p8114_p3 }
 0x14e   : > { %p8110_p2 = pneg %p8109_p1 }
 0x14f   : > { %7266 = dma.hbm_to_vmem [thread:$0]  (%p7399_p10), %s9787_s0, 16, %s1014_s17, [#allocation9]  }
 0x150   : > { %p8117_p4 = pnand %p8116_p5, %p8110_p2 }
 0x152   : > { %8120 = shalt.err (!%p8117_p4)
}
 0x153   : > { %s9788_s10 = sld [smem:[#allocation83_spill]]  ;;  %s8655_s5 = smov [#allocation16]  }
 0x154   : > { %s1059_s2 = sshll.u32 %s8655_s5, 4  ;;  %s8656_s26 = smov [#allocation19]   ;;  %s1060_s2 = int_to_ptr.vmem [resolvable:$true] %s1059_s2 }
 0x155   : > { %s1083_s17 = sshll.u32 %s8656_s26, 4  ;;  %s8131_s28 = scalar_lea.vmem %s1060_s2, 32  ;;  %s1084_s17 = int_to_ptr.vmem [resolvable:$true] %s1083_s17 }
 0x156   : > { %p8132_p7 = scmp.ne.s32.totalorder %s1060_s2, %s8131_s28  ;;  %p8138_p12 = scmp.lt.s32.totalorder %s1060_s2, %s1060_s2 }
 0x157   : > { %p8139_p13 = scmp.lt.s32.totalorder %s8131_s28, %s8131_s28 }
 0x158   : > { %p8133_p8 = pnand %p8132_p7, %p7399_p10 }
 0x159   : > { %7270 = dma.hbm_to_vmem [thread:$0]  (%p7399_p10), %s9788_s10, 16, %s1036_s1, [#allocation12]  }
 0x15a   : > { %p8134_p11 = pneg %p8133_p8  ;;  %p8140_p0 = por %p8139_p13, %p8138_p12 }
 0x15c   : > { %p8141_p1 = pnand %p8140_p0, %p8134_p11 }
 0x15e   : > { %8144 = shalt.err (!%p8141_p1)
}
 0x15f   : > { %s9789_s8 = sld [smem:[#allocation84_spill]]  ;;  %s8155_s1 = scalar_lea.vmem %s1084_s17, 16 }
 0x160   : > { %p8156_p2 = scmp.ne.s32.totalorder %s1084_s17, %s8155_s1  ;;  %s8161_s0 = scalar_lea.vmem %s1084_s17, 32 }
 0x161   : > { %p8162_p5 = scmp.lt.s32.totalorder %s1084_s17, %s1084_s17  ;;  %p8163_p4 = scmp.lt.s32.totalorder %s8161_s0, %s8155_s1 }
 0x162   : > { %p8157_p3 = pnand %p8156_p2, %p7399_p10 }
 0x163   : > { %p8164_p7 = por %p8163_p4, %p8162_p5 }
 0x164   : > { %p8158_p6 = pneg %p8157_p3 }
 0x165   : > { %7274 = dma.hbm_to_vmem [thread:$0]  (%p7399_p10), %s9789_s8, 32, %s1060_s2, [#allocation15]  }
 0x166   : > { %p8165_p8 = pnand %p8164_p7, %p8158_p6 }
 0x168   : > { %8168 = shalt.err (!%p8165_p8)
}
 0x169   : > { %s9790_s16 = sld [smem:[#allocation85_spill]]  ;;  %s8657_s23 = smov [#allocation22]  }
 0x16a   : > { %s1105_s10 = sshll.u32 %s8657_s23, 4  ;;  %s8658_s5 = smov [#allocation25]   ;;  %s1106_s10 = int_to_ptr.vmem [resolvable:$true] %s1105_s10 }
 0x16b   : > { %s1129_s2 = sshll.u32 %s8658_s5, 4  ;;  %s8179_s26 = scalar_lea.vmem %s1106_s10, 16  ;;  %s1130_s2 = int_to_ptr.vmem [resolvable:$true] %s1129_s2 }
 0x16c   : > { %p8180_p11 = scmp.ne.s32.totalorder %s1106_s10, %s8179_s26  ;;  %s8185_s28 = scalar_lea.vmem %s1106_s10, 32 }
 0x16d   : > { %p8186_p0 = scmp.lt.s32.totalorder %s1106_s10, %s1106_s10  ;;  %p8187_p1 = scmp.lt.s32.totalorder %s8185_s28, %s8179_s26 }
 0x16e   : > { %p8181_p12 = pnand %p8180_p11, %p7399_p10 }
 0x16f   : > { %7278 = dma.hbm_to_vmem [thread:$0]  (%p7399_p10), %s9790_s16, 16, %s1084_s17, [#allocation18]  }
 0x170   : > { %p8182_p13 = pneg %p8181_p12  ;;  %p8188_p2 = por %p8187_p1, %p8186_p0 }
 0x172   : > { %p8189_p3 = pnand %p8188_p2, %p8182_p13 }
 0x174   : > { %8192 = shalt.err (!%p8189_p3)
}
 0x175   : > { %s9791_s17 = sld [smem:[#allocation86_spill]]  ;;  %s8203_s8 = scalar_lea.vmem %s1130_s2, 48 }
 0x176   : > { %p8204_p6 = scmp.ne.s32.totalorder %s1130_s2, %s8203_s8  ;;  %s8209_s1 = scalar_lea.vmem %s1130_s2, 64 }
 0x177   : > { %p8210_p7 = scmp.lt.s32.totalorder %s1130_s2, %s1130_s2  ;;  %p8211_p8 = scmp.lt.s32.totalorder %s8209_s1, %s8203_s8 }
 0x178   : > { %p8205_p5 = pnand %p8204_p6, %p7399_p10 }
 0x179   : > { %p8212_p11 = por %p8211_p8, %p8210_p7 }
 0x17a   : > { %p8206_p4 = pneg %p8205_p5 }
 0x17b   : > { %7282 = dma.hbm_to_vmem [thread:$0]  (%p7399_p10), %s9791_s17, 16, %s1106_s10, [#allocation21]  }
 0x17c   : > { %p8213_p12 = pnand %p8212_p11, %p8206_p4 }
 0x17e   : > { %8216 = shalt.err (!%p8213_p12)
}
 0x17f   : > { %s9792_s0 = sld [smem:[#allocation87_spill]]  ;;  %s8659_s16 = smov [#allocation28]  }
 0x180   : > { %s1153_s23 = sshll.u32 %s8659_s16, 4  ;;  %s8660_s5 = smov [#allocation31]   ;;  %s1154_s23 = int_to_ptr.vmem [resolvable:$true] %s1153_s23 }
 0x181   : > { %s1175_s10 = sshll.u32 %s8660_s5, 4  ;;  %s8227_s26 = scalar_lea.vmem %s1154_s23, 16  ;;  %s1176_s10 = int_to_ptr.vmem [resolvable:$true] %s1175_s10 }
 0x182   : > { %p8228_p13 = scmp.ne.s32.totalorder %s1154_s23, %s8227_s26  ;;  %s8233_s28 = scalar_lea.vmem %s1154_s23, 32 }
 0x183   : > { %p8234_p2 = scmp.lt.s32.totalorder %s1154_s23, %s1154_s23  ;;  %p8235_p3 = scmp.lt.s32.totalorder %s8233_s28, %s8227_s26 }
 0x184   : > { %p8229_p0 = pnand %p8228_p13, %p7399_p10 }
 0x185   : > { %7286 = dma.hbm_to_vmem [thread:$0]  (%p7399_p10), %s9792_s0, 48, %s1130_s2, [#allocation24]  }
 0x186   : > { %p8230_p1 = pneg %p8229_p0  ;;  %p8236_p6 = por %p8235_p3, %p8234_p2 }
 0x188   : > { %p8237_p5 = pnand %p8236_p6, %p8230_p1 }
 0x18a   : > { %8240 = shalt.err (!%p8237_p5)
}
 0x18b   : > { %s9793_s2 = sld [smem:[#allocation88_spill]]  ;;  %s8251_s17 = scalar_lea.vmem %s1176_s10, 16 }
 0x18c   : > { %p8252_p4 = scmp.ne.s32.totalorder %s1176_s10, %s8251_s17  ;;  %s8257_s8 = scalar_lea.vmem %s1176_s10, 32 }
 0x18d   : > { %p8258_p11 = scmp.lt.s32.totalorder %s1176_s10, %s1176_s10  ;;  %p8259_p12 = scmp.lt.s32.totalorder %s8257_s8, %s8251_s17 }
 0x18e   : > { %p8253_p7 = pnand %p8252_p4, %p7399_p10 }
 0x18f   : > { %p8260_p13 = por %p8259_p12, %p8258_p11 }
 0x190   : > { %p8254_p8 = pneg %p8253_p7 }
 0x191   : > { %7290 = dma.hbm_to_vmem [thread:$0]  (%p7399_p10), %s9793_s2, 16, %s1154_s23, [#allocation27]  }
 0x192   : > { %p8261_p0 = pnand %p8260_p13, %p8254_p8 }
 0x194   : > { %8264 = shalt.err (!%p8261_p0)
}
 0x195   : > { %s9794_s1 = sld [smem:[#allocation90_spill]]  ;;  %s8661_s0 = smov [#allocation34]  }
 0x196   : > { %s1199_s16 = sshll.u32 %s8661_s0, 4  ;;  %s8662_s5 = smov [#allocation37]   ;;  %s1200_s16 = int_to_ptr.vmem [resolvable:$true] %s1199_s16 }
 0x197   : > { %s1223_s23 = sshll.u32 %s8662_s5, 4  ;;  %s8275_s26 = scalar_lea.vmem %s1200_s16, 16  ;;  %s1224_s23 = int_to_ptr.vmem [resolvable:$true] %s1223_s23 }
 0x198   : > { %p8276_p1 = scmp.ne.s32.totalorder %s1200_s16, %s8275_s26  ;;  %s8281_s28 = scalar_lea.vmem %s1200_s16, 32 }
 0x199   : > { %p8282_p6 = scmp.lt.s32.totalorder %s1200_s16, %s1200_s16  ;;  %p8283_p5 = scmp.lt.s32.totalorder %s8281_s28, %s8275_s26 }
 0x19a   : > { %p8277_p2 = pnand %p8276_p1, %p7399_p10 }
 0x19b   : > { %7294 = dma.hbm_to_vmem [thread:$0]  (%p7399_p10), %s9794_s1, 16, %s1176_s10, [#allocation30]  }
 0x19c   : > { %p8278_p3 = pneg %p8277_p2  ;;  %p8284_p4 = por %p8283_p5, %p8282_p6 }
 0x19e   : > { %p8285_p7 = pnand %p8284_p4, %p8278_p3 }
 0x1a0   : > { %8288 = shalt.err (!%p8285_p7)
}
 0x1a1   : > { %s9795_s10 = sld [smem:[#allocation91_spill]]  ;;  %s8299_s2 = scalar_lea.vmem %s1224_s23, 32 }
 0x1a2   : > { %p8300_p8 = scmp.ne.s32.totalorder %s1224_s23, %s8299_s2  ;;  %p8306_p13 = scmp.lt.s32.totalorder %s1224_s23, %s1224_s23 }
 0x1a3   : > { %p8307_p0 = scmp.lt.s32.totalorder %s8299_s2, %s8299_s2 }
 0x1a4   : > { %p8301_p11 = pnand %p8300_p8, %p7399_p10 }
 0x1a5   : > { %p8308_p1 = por %p8307_p0, %p8306_p13 }
 0x1a6   : > { %p8302_p12 = pneg %p8301_p11 }
 0x1a7   : > { %7298 = dma.hbm_to_vmem [thread:$0]  (%p7399_p10), %s9795_s10, 16, %s1200_s16, [#allocation33]  }
 0x1a8   : > { %p8309_p2 = pnand %p8308_p1, %p8302_p12 }
 0x1aa   : > { %8312 = shalt.err (!%p8309_p2)
}
 0x1ab   : > { %s9796_s17 = sld [smem:[#allocation92_spill]]  ;;  %s8663_s8 = smov [#allocation40]  }
 0x1ac   : > { %s1247_s1 = sshll.u32 %s8663_s8, 4  ;;  %s8664_s0 = smov [#allocation43]   ;;  %s1248_s1 = int_to_ptr.vmem [resolvable:$true] %s1247_s1 }
 0x1ad   : > { %s1269_s5 = sshll.u32 %s8664_s0, 4  ;;  %s8323_s16 = scalar_lea.vmem %s1248_s1, 16  ;;  %s1270_s5 = int_to_ptr.vmem [resolvable:$true] %s1269_s5 }
 0x1ae   : > { %p8324_p3 = scmp.ne.s32.totalorder %s1248_s1, %s8323_s16  ;;  %s8329_s26 = scalar_lea.vmem %s1248_s1, 32 }
 0x1af   : > { %p8330_p4 = scmp.lt.s32.totalorder %s1248_s1, %s1248_s1  ;;  %p8331_p7 = scmp.lt.s32.totalorder %s8329_s26, %s8323_s16 }
 0x1b0   : > { %p8325_p6 = pnand %p8324_p3, %p7399_p10 }
 0x1b1   : > { %7302 = dma.hbm_to_vmem [thread:$0]  (%p7399_p10), %s9796_s17, 32, %s1224_s23, [#allocation36]  }
 0x1b2   : > { %p8326_p5 = pneg %p8325_p6  ;;  %p8332_p8 = por %p8331_p7, %p8330_p4 }
 0x1b4   : > { %p8333_p11 = pnand %p8332_p8, %p8326_p5 }
 0x1b6   : > { %8336 = shalt.err (!%p8333_p11)
}
 0x1b7   : > { %s9797_s23 = sld [smem:[#allocation93_spill]]  ;;  %s8347_s28 = scalar_lea.vmem %s1270_s5, 16 }
 0x1b8   : > { %p8348_p12 = scmp.ne.s32.totalorder %s1270_s5, %s8347_s28  ;;  %s8353_s10 = scalar_lea.vmem %s1270_s5, 32 }
 0x1b9   : > { %p8354_p1 = scmp.lt.s32.totalorder %s1270_s5, %s1270_s5  ;;  %p8355_p2 = scmp.lt.s32.totalorder %s8353_s10, %s8347_s28 }
 0x1ba   : > { %p8349_p13 = pnand %p8348_p12, %p7399_p10 }
 0x1bb   : > { %p8356_p3 = por %p8355_p2, %p8354_p1 }
 0x1bc   : > { %p8350_p0 = pneg %p8349_p13 }
 0x1bd   : > { %7306 = dma.hbm_to_vmem [thread:$0]  (%p7399_p10), %s9797_s23, 16, %s1248_s1, [#allocation39]  }
 0x1be   : > { %p8357_p6 = pnand %p8356_p3, %p8350_p0 }
 0x1c0   : > { %8360 = shalt.err (!%p8357_p6)
}
 0x1c1   : > { %s9798_s2 = sld [smem:[#allocation94_spill]]  ;;  %s8665_s17 = smov [#allocation46]  }
 0x1c2   : > { %s1293_s8 = sshll.u32 %s8665_s17, 4  ;;  %s8666_s0 = smov [#allocation49]   ;;  %s1294_s8 = int_to_ptr.vmem [resolvable:$true] %s1293_s8 }
 0x1c3   : > { %s1317_s1 = sshll.u32 %s8666_s0, 4  ;;  %s8371_s16 = scalar_lea.vmem %s1294_s8, 32  ;;  %s1318_s1 = int_to_ptr.vmem [resolvable:$true] %s1317_s1 }
 0x1c4   : > { %p8372_p5 = scmp.ne.s32.totalorder %s1294_s8, %s8371_s16  ;;  %p8378_p8 = scmp.lt.s32.totalorder %s1294_s8, %s1294_s8 }
 0x1c5   : > { %p8379_p11 = scmp.lt.s32.totalorder %s8371_s16, %s8371_s16 }
 0x1c6   : > { %p8373_p4 = pnand %p8372_p5, %p7399_p10 }
 0x1c7   : > { %7310 = dma.hbm_to_vmem [thread:$0]  (%p7399_p10), %s9798_s2, 16, %s1270_s5, [#allocation42]  }
 0x1c8   : > { %p8374_p7 = pneg %p8373_p4  ;;  %p8380_p12 = por %p8379_p11, %p8378_p8 }
 0x1ca   : > { %p8381_p13 = pnand %p8380_p12, %p8374_p7 }
 0x1cc   : > { %8384 = shalt.err (!%p8381_p13)
}
 0x1cd   : > { %s9799_s26 = sld [smem:[#allocation95_spill]]  ;;  %s8395_s5 = scalar_lea.vmem %s1318_s1, 16 }
 0x1ce   : > { %p8396_p0 = scmp.ne.s32.totalorder %s1318_s1, %s8395_s5  ;;  %s8401_s23 = scalar_lea.vmem %s1318_s1, 32 }
 0x1cf   : > { %p8402_p3 = scmp.lt.s32.totalorder %s1318_s1, %s1318_s1  ;;  %p8403_p6 = scmp.lt.s32.totalorder %s8401_s23, %s8395_s5 }
 0x1d0   : > { %p8397_p1 = pnand %p8396_p0, %p7399_p10 }
 0x1d1   : > { %p8404_p5 = por %p8403_p6, %p8402_p3 }
 0x1d2   : > { %p8398_p2 = pneg %p8397_p1 }
 0x1d3   : > { %7314 = dma.hbm_to_vmem [thread:$0]  (%p7399_p10), %s9799_s26, 32, %s1294_s8, [#allocation45]  }
 0x1d4   : > { %p8405_p4 = pnand %p8404_p5, %p8398_p2 }
 0x1d6   : > { %8408 = shalt.err (!%p8405_p4)
}
 0x1d7   : > { %s9800_s28 = sld [smem:[#allocation97_spill]]  ;;  %s8667_s10 = smov [#allocation52]  }
 0x1d8   : > { %s1339_s2 = sshll.u32 %s8667_s10, 4  ;;  %s8668_s17 = smov [#allocation53]   ;;  %s1340_s2 = int_to_ptr.vmem [resolvable:$true] %s1339_s2 }
 0x1d9   : > { %s1353_s8 = sshll.u32 %s8668_s17, 4  ;;  %s8419_s0 = scalar_lea.vmem %s1340_s2, 16  ;;  %s1354_s8 = int_to_ptr.vmem [resolvable:$true] %s1353_s8 }
 0x1da   : > { %p8420_p7 = scmp.ne.s32.totalorder %s1340_s2, %s8419_s0  ;;  %s8425_s16 = scalar_lea.vmem %s1340_s2, 32 }
 0x1db   : > { %p8426_p12 = scmp.lt.s32.totalorder %s1340_s2, %s1340_s2  ;;  %p8427_p13 = scmp.lt.s32.totalorder %s8425_s16, %s8419_s0 }
 0x1dc   : > { %p8421_p8 = pnand %p8420_p7, %p7399_p10 }
 0x1dd   : > { %7318 = dma.hbm_to_vmem [thread:$0]  (%p7399_p10), %s9800_s28, 16, %s1318_s1, [#allocation48]  }
 0x1de   : > { %p8422_p11 = pneg %p8421_p8  ;;  %p8428_p0 = por %p8427_p13, %p8426_p12 }
 0x1e0   : > { %p8429_p1 = pnand %p8428_p0, %p8422_p11 }
 0x1e2   : > { %8432 = shalt.err (!%p8429_p1)
}
 0x1e3   : > { %7322 = dma.hbm_to_vmem [thread:$0]  (%p7399_p10), %s8858_s9, 16, %s1340_s2, [#allocation51]  }
 0x1e4   : > { %s8443_s1 = scalar_lea.vmem %s1354_s8, 16  ;;  %s8449_s26 = scalar_lea.vmem %s1354_s8, 32 }
 0x1e5   : > { %p8444_p2 = scmp.ne.s32.totalorder %s1354_s8, %s8443_s1  ;;  %p8450_p5 = scmp.lt.s32.totalorder %s1354_s8, %s1354_s8 }
 0x1e6   : > { %p8451_p4 = scmp.lt.s32.totalorder %s8449_s26, %s8443_s1 }
 0x1e7   : > { %p8445_p3 = pnand %p8444_p2, %p7399_p10 }
 0x1e8   : > { %p8452_p7 = por %p8451_p4, %p8450_p5 }
 0x1e9   : > { %p8446_p6 = pneg %p8445_p3 }
 0x1eb   : > { %p8453_p8 = pnand %p8452_p7, %p8446_p6 }
 0x1ed   : > { %8456 = shalt.err (!%p8453_p8)
}
 0x1ee   : > { %7324 = dma.hbm_to_vmem [thread:$0]  (%p7399_p10), %s8868_s4, 16, %s1354_s8, [#allocation54]  }
 0x1ef PF: > { %1380 = sbr.rel (%p8923_p9) target bundleno = 9895 (0x26a7), region = 172  ;;  %p7433_p11 = scmp.eq.s32.totalorder (!%p8923_p9), %s8896_s22, 0 }
 0x1f4   : > { %8500 = dma.done.wait (%p7433_p11), [#allocation3], 256  }
 0x1f5   : > { %8502 = vsyncadd (%p7433_p11), [#allocation3], 4294967040 }
 0x1f6   : > { %8504 = dma.done.wait (%p7433_p11), [#allocation6], 6160  }
 0x1f7   : > { %8506 = vsyncadd (%p7433_p11), [#allocation6], 4294961136 }
 0x1f8   : > { %8508 = dma.done.wait (%p7433_p11), [#allocation9], 2064  }
 0x1f9   : > { %8510 = vsyncadd (%p7433_p11), [#allocation9], 4294965232 }
 0x1fa   : > { %8512 = dma.done.wait (%p7433_p11), [#allocation12], 32  }
 0x1fb   : > { %8514 = vsyncadd (%p7433_p11), [#allocation12], 4294967264 }
 0x1fc   : > { %8516 = dma.done.wait (%p7433_p11), [#allocation15], 4128  }
 0x1fd   : > { %8518 = vsyncadd (%p7433_p11), [#allocation15], 4294963168 }
 0x1fe   : > { %8520 = dma.done.wait (%p7433_p11), [#allocation18], 4112  }
 0x1ff   : > { %8522 = vsyncadd (%p7433_p11), [#allocation18], 4294963184 }
 0x200   : > { %8524 = dma.done.wait (%p7433_p11), [#allocation21], 32  }
 0x201   : > { %8526 = vsyncadd (%p7433_p11), [#allocation21], 4294967264 }
 0x202   : > { %8528 = dma.done.wait (%p7433_p11), [#allocation24], 6192  }
 0x203   : > { %8530 = vsyncadd (%p7433_p11), [#allocation24], 4294961104 }
 0x204   : > { %8532 = dma.done.wait (%p7433_p11), [#allocation27], 2064  }
 0x205   : > { %8534 = vsyncadd (%p7433_p11), [#allocation27], 4294965232 }
 0x206   : > { %8536 = dma.done.wait (%p7433_p11), [#allocation30], 32  }
 0x207   : > { %8538 = vsyncadd (%p7433_p11), [#allocation30], 4294967264 }
 0x208   : > { %8540 = dma.done.wait (%p7433_p11), [#allocation33], 2064  }
 0x209   : > { %8542 = vsyncadd (%p7433_p11), [#allocation33], 4294965232 }
 0x20a   : > { %8544 = dma.done.wait (%p7433_p11), [#allocation36], 4128  }
 0x20b   : > { %8546 = vsyncadd (%p7433_p11), [#allocation36], 4294963168 }
 0x20c   : > { %8548 = dma.done.wait (%p7433_p11), [#allocation39], 2064  }
 0x20d   : > { %8550 = vsyncadd (%p7433_p11), [#allocation39], 4294965232 }
 0x20e   : > { %8552 = dma.done.wait (%p7433_p11), [#allocation42], 32  }
 0x20f   : > { %8554 = vsyncadd (%p7433_p11), [#allocation42], 4294967264 }
 0x210   : > { %8556 = dma.done.wait (%p7433_p11), [#allocation45], 4128  }
 0x211   : > { %8558 = vsyncadd (%p7433_p11), [#allocation45], 4294963168 }
 0x212   : > { %8560 = dma.done.wait (%p7433_p11), [#allocation48], 4112  }
 0x213   : > { %8562 = vsyncadd (%p7433_p11), [#allocation48], 4294963184 }
 0x214   : > { %8564 = dma.done.wait (%p7433_p11), [#allocation51], 32  }
 0x215   : > { %8566 = vsyncadd (%p7433_p11), [#allocation51], 4294967264 }
 0x216   : > { %8568 = dma.done.wait (%p7433_p11), [#allocation54], 16  }
 0x217   : > { %8570 = vsyncadd (%p7433_p11), [#allocation54], 4294967280  ;;  %s9801_s11 = sld [smem:[#allocation75_spill]]  ;;  %p1608_p9 = scmp.lt.s32.totalorder %s8896_s22, 1  ;;  %v8669_v0 = vmov 0.0   ;;  %vm8670_vm0 = vmmov 0   ;;  %v1824_v60 = vlaneseq }
 0x218   : > { %s9802_s5 = sld [smem:[#allocation76_spill]]  ;;  %6851 = vmatprep.subr.mxu0 %v8669_v0  ;;  %6855 = vmatprep.mubr.msk.f32.mxu0 %vm8670_vm0, %v8669_v0  ;;  %v1618_v1 = vld [vmem:[#allocation2 + $0x8] sm:$0xff]  ;;  %v1617_v2 = vld [vmem:[#allocation2] sm:$0xff]  ;;  %vm1626_vm1 = vcmask 130048   ;;  %v1818_v5 = vld [vmem:[#allocation7 + $0x160] sm:$0xff]  ;;  %vm1980_vm2 = vcmask 261120  }
 0x219   : > { %s1609_s23 = scalar_select %p1608_p9, %s8896_s22, 1  ;;  %6865 = vmatprep.subr.mxu1 %v8669_v0  ;;  %6897 = vmatprep.mubr.msk.f32.mxu1 %vm8670_vm0, %v8669_v0  ;;  %v1821_v4 = vld [vmem:[#allocation7 + $0x178] sm:$0xff]  ;;  %v1820_v7 = vld [vmem:[#allocation7 + $0x170] sm:$0xff]  ;;  %v1819_v8 = vld [vmem:[#allocation7 + $0x168] sm:$0xff]  ;;  %v9256_v61 = vshrl.u32 %v1824_v60, 7  ;;  %vm2058_vm3 = vcmask 64512  }
 0x21a   : > { %6852 = vmatpush3.msra.mxu0 %v1618_v1  ;;  %6866 = vmatpush3.msra.mxu1 %v1821_v4  ;;  %v1817_v9 = vld [vmem:[#allocation7 + $0x158] sm:$0xff]  ;;  %v1815_v10 = vld [vmem:[#allocation7 + $0x148] sm:$0xff]  ;;  %v1816_v11 = vld [vmem:[#allocation7 + $0x150] sm:$0xff]  ;;  %s9803_s17 = sld [smem:[#allocation80_spill]]  ;;  %s8671_s8 = smov 96  }
 0x21b   : > { %s6527_s28 = sshll.u32 %s1609_s23, 3  ;;  %6853 = vmatprep.subr.mxu0 %v8669_v0  ;;  %6867 = vmatprep.subr.mxu1 %v8669_v0  ;;  %v1814_v12 = vld [vmem:[#allocation7 + $0x140] sm:$0xff]  ;;  %v1812_v13 = vld [vmem:[#allocation7 + $0x130] sm:$0xff]  ;;  %v1813_v14 = vld [vmem:[#allocation7 + $0x138] sm:$0xff]  ;;  %v1834_v62 = vsub.s32 2, %v9256_v61  ;;  %s8672_s0 = smov 64  }
 0x21c   : > { %6854 = vmatpush3.msra.mxu0 %v1617_v2  ;;  %6868 = vmatpush3.msra.mxu1 %v1818_v5  ;;  %v1811_v15 = vld [vmem:[#allocation7 + $0x128] sm:$0xff]  ;;  %v1809_v16 = vld [vmem:[#allocation7 + $0x118] sm:$0xff]  ;;  %v1810_v17 = vld [vmem:[#allocation7 + $0x120] sm:$0xff]  ;;  %s8673_s16 = smov 32   ;;  %s1606_s1 = sand.u32 1, %s8581_s15  }
 0x21d   : > { %s1611_s10 = scalar_lea.vmem %s9801_s11, %s6527_s28  ;;  %6858 = vmatprep.subr.mxu0 %v8669_v0  ;;  %6869 = vmatprep.subr.mxu1 %v8669_v0  ;;  %v1808_v18 = vld [vmem:[#allocation7 + $0x110] sm:$0xff]  ;;  %v1806_v19 = vld [vmem:[#allocation7 + $0x100] sm:$0xff]  ;;  %v1807_v20 = vld [vmem:[#allocation7 + $0x108] sm:$0xff]  ;;  %s6596_s26 = sshll.u32 %s8896_s22, 4 }
 0x21e   : > { %v1616_v3 = vld [vmem:[%s1611_s10] sm:$0xff]  ;;  %s1615_s2 = scalar_lea.vmem %s9802_s5, %s6527_s28  ;;  %6870 = vmatpush3.msra.mxu1 %v1815_v10  ;;  %v1805_v21 = vld [vmem:[#allocation7 + $0xf8] sm:$0xff]  ;;  %v1802_v24 = vld [vmem:[#allocation7 + $0xe0] sm:$0xff]  ;;  %s1607_s11 = scalar_lea.vmem [#allocation55], %s1606_s1 }
 0x21f   : > { %6856 = vmatmul.mubr.msk.f32.vlgmr.msra.gmra.mxu0 %vm1626_vm1, %v1616_v3  ;;  %v1700_v6 = vld [vmem:[%s1615_s2] sm:$0xff]  ;;  %6871 = vmatprep.subr.mxu1 %v8669_v0  ;;  %v1801_v26 = vld [vmem:[#allocation7 + $0xd8] sm:$0xff]  ;;  %v1798_v29 = vld [vmem:[#allocation7 + $0xc0] sm:$0xff]  ;;  %v9266_v3 = vsub.s32 0, %v9256_v61  ;;  %s6024_s5 = sshll.u32 %s1607_s11, 4  ;;  %s9694_s23 = scalar_lea.hbm %s8873_s13, %s6596_s26  ;;  %s6025_s5 = int_to_ptr.vmem [resolvable:$true] %s6024_s5 }
 0x220   : > { %6859 = vmatpush3.msra.mxu0 %v1618_v1  ;;  %6862 = vmatprep.mubr.msk.f32.mxu0 %vm8670_vm0, %v8669_v0  ;;  %v1803_v22 = vld [vmem:[#allocation7 + $0xe8] sm:$0xff]  ;;  %v1804_v23 = vld [vmem:[#allocation7 + $0xf0] sm:$0xff]  ;;  %v1797_v28 = vld [vmem:[#allocation7 + $0xb8] sm:$0xff]  ;;  %v9261_v1 = vsub.s32 1, %v9256_v61  ;;  %s6012_s28 = scalar_lea.sflag [#allocation4], %s1606_s1  ;;  %s8457_s10 = scalar_lea.vmem %s6025_s5, 16 }
 0x221   : > { %6860 = vmatprep.subr.mxu0 %v8669_v0  ;;  %6872 = vmatpush3.msra.mxu1 %v1812_v13  ;;  %v1800_v25 = vld [vmem:[#allocation7 + $0xd0] sm:$0xff]  ;;  %v1799_v27 = vld [vmem:[#allocation7 + $0xc8] sm:$0xff]  ;;  %v1794_v31 = vld [vmem:[#allocation7 + $0xa0] sm:$0xff]  ;;  %p8458_p10 = scmp.ne.s32.totalorder %s6025_s5, %s8457_s10  ;;  %p9804_p12 = scmp.ne.s32.totalorder %s9770_s7, 0 }
 0x222   : > { %6861 = vmatpush3.msra.mxu0 %v1617_v2  ;;  %6873 = vmatprep.subr.mxu1 %v8669_v0  ;;  %v1796_v30 = vld [vmem:[#allocation7 + $0xb0] sm:$0xff]  ;;  %v1795_v32 = vld [vmem:[#allocation7 + $0xa8] sm:$0xff]  ;;  %v1793_v33 = vld [vmem:[#allocation7 + $0x98] sm:$0xff]  ;;  %s8674_s2 = smov [#allocation55]  }
 0x223   : > { %6863 = vmatmul.mubr.msk.f32.vlgmr.msra.gmra.mxu0 %vm1626_vm1, %v1700_v6  ;;  %1839 = vmatprep.subr.mxu0 %v1820_v7  ;;  %v1791_v34 = vld [vmem:[#allocation7 + $0x88] sm:$0xff]  ;;  %v1792_v35 = vld [vmem:[#allocation7 + $0x90] sm:$0xff]  ;;  %v1790_v36 = vld [vmem:[#allocation7 + $0x80] sm:$0xff]  ;;  %p8459_p13 = pnand %p8458_p10, %p9804_p12 }
 0x224   : > { %1840 = vmatpush1.msra.mxu0 %v1819_v8  ;;  %6874 = vmatpush3.msra.mxu1 %v1809_v16  ;;  %v1788_v37 = vld [vmem:[#allocation7 + $0x70] sm:$0xff]  ;;  %v1789_v38 = vld [vmem:[#allocation7 + $0x78] sm:$0xff]  ;;  %v1787_v39 = vld [vmem:[#allocation7 + $0x68] sm:$0xff] }
 0x225   : > { %1841 = vmatprep.subr.mxu0 %v1817_v9  ;;  %6875 = vmatprep.subr.mxu1 %v8669_v0  ;;  %v1785_v40 = vld [vmem:[#allocation7 + $0x58] sm:$0xff]  ;;  %v1786_v41 = vld [vmem:[#allocation7 + $0x60] sm:$0xff]  ;;  %v1784_v42 = vld [vmem:[#allocation7 + $0x50] sm:$0xff]  ;;  %p8460_p0 = pneg %p8459_p13 }
 0x226   : > { %1842 = vmatpush1.msra.mxu0 %v1816_v11  ;;  %6876 = vmatpush3.msra.mxu1 %v1806_v19  ;;  %v1782_v43 = vld [vmem:[#allocation7 + $0x40] sm:$0xff]  ;;  %v1783_v44 = vld [vmem:[#allocation7 + $0x48] sm:$0xff]  ;;  %v1781_v45 = vld [vmem:[#allocation7 + $0x38] sm:$0xff] }
 0x227   : > { %1843 = vmatprep.subr.mxu0 %v1814_v12  ;;  %6877 = vmatprep.subr.mxu1 %v8669_v0  ;;  %v1780_v46 = vld [vmem:[#allocation7 + $0x30] sm:$0xff]  ;;  %v1778_v47 = vld [vmem:[#allocation7 + $0x20] sm:$0xff]  ;;  %v1777_v48 = vld [vmem:[#allocation7 + $0x18] sm:$0xff] }
 0x228   : > { %1844 = vmatpush1.msra.mxu0 %v1813_v14  ;;  %6878 = vmatpush3.msra.mxu1 %v1803_v22  ;;  %v1779_v49 = vld [vmem:[#allocation7 + $0x28] sm:$0xff]  ;;  %v1774_v51 = vld [vmem:[#allocation7] sm:$0xff]  ;;  %v1776_v52 = vld [vmem:[#allocation7 + $0x10] sm:$0xff] }
 0x229   : > { %1845 = vmatprep.subr.mxu0 %v1811_v15  ;;  %6879 = vmatprep.subr.mxu1 %v8669_v0  ;;  %v1775_v50 = vld [vmem:[#allocation7 + $0x8] sm:$0xff]  ;;  %v6529_v53 = vld [vmem:[#allocation5] ss:$0 sm:$0xff] }
 0x22a   : > { %1846 = vmatpush1.msra.mxu0 %v1810_v17  ;;  %6880 = vmatpush3.msra.mxu1 %v1800_v25  ;;  %v1822_v63 = vld [vmem:[%s9803_s17] sm:$0x7]  ;;  %s8461_s17 = sshll.u32 %s8674_s2, 4  ;;  %s8462_s17 = int_to_ptr.vmem [resolvable:$false] %s8461_s17 }
 0x22b   : > { %1847 = vmatprep.subr.mxu0 %v1808_v18  ;;  %6881 = vmatprep.subr.mxu1 %v8669_v0  ;;  %v1835_v2 = vrot.slane %v1822_v63, %v1834_v62  ;;  %v1831_v4 = vrot.slane %v1822_v63, %v9261_v1  ;;  %v1827_v8 = vrot.slane %v1822_v63, %v9266_v3  ;;  %p8464_p1 = scmp.lt.s32.totalorder %s6025_s5, %s8462_s17 }
 0x22c   : > { %1848 = vmatpush1.msra.mxu0 %v1807_v20  ;;  %6882 = vmatpush3.msra.mxu1 %v1797_v28 }
 0x22d   : > { %1849 = vmatprep.subr.mxu0 %v1805_v21  ;;  %6883 = vmatprep.subr.mxu1 %v8669_v0 }
 0x22e   : > { %1850 = vmatpush1.msra.mxu0 %v1804_v23  ;;  %6884 = vmatpush3.msra.mxu1 %v1794_v31 }
 0x22f   : > { %1851 = vmatprep.subr.mxu0 %v1802_v24  ;;  %6885 = vmatprep.subr.mxu1 %v8669_v0 }
 0x230   : > { %1852 = vmatpush1.msra.mxu0 %v1801_v26  ;;  %6886 = vmatpush3.msra.mxu1 %v1791_v34 }
 0x231   : > { %1853 = vmatprep.subr.mxu0 %v1799_v27  ;;  %6887 = vmatprep.subr.mxu1 %v8669_v0 }
 0x232   : > { %1854 = vmatpush1.msra.mxu0 %v1798_v29  ;;  %6888 = vmatpush3.msra.mxu1 %v1788_v37  ;;  %v2316_v37 = vld [vmem:[#allocation8 + $0x30] sm:$0xff] }
 0x233   : > { %1855 = vmatprep.subr.mxu0 %v1796_v30  ;;  %6889 = vmatprep.subr.mxu1 %v8669_v0 }
 0x234   : > { %1856 = vmatpush1.msra.mxu0 %v1795_v32  ;;  %6890 = vmatpush3.msra.mxu1 %v1785_v40 }
 0x235   : > { %1857 = vmatprep.subr.mxu0 %v1793_v33  ;;  %6891 = vmatprep.subr.mxu1 %v8669_v0 }
 0x236   : > { %1858 = vmatpush1.msra.mxu0 %v1792_v35  ;;  %6892 = vmatpush3.msra.mxu1 %v1782_v43 }
 0x237   : > { %1859 = vmatprep.subr.mxu0 %v1790_v36  ;;  %6893 = vmatprep.subr.mxu1 %v8669_v0  ;;  %v2317_v36 = vld [vmem:[#allocation8 + $0x38] sm:$0xff] }
 0x238   : > { %1860 = vmatpush1.msra.mxu0 %v1789_v38  ;;  %1903 = vmatprep.mubr.f32.mxu0 %v8669_v0  ;;  %v2315_v38 = vld [vmem:[#allocation8 + $0x28] sm:$0xff] }
 0x239   : > { %1861 = vmatprep.subr.mxu0 %v1787_v39  ;;  %6894 = vmatpush3.msra.mxu1 %v1779_v49  ;;  %v2314_v39 = vld [vmem:[#allocation8 + $0x20] sm:$0xff]  ;;  %v2145_v49 = vld [vmem:[#allocation8 + $0x10] sm:$0xff] }
 0x23a   : > { %1862 = vmatpush1.msra.mxu0 %v1786_v41  ;;  %6895 = vmatprep.subr.mxu1 %v8669_v0 }
 0x23b   : > { %1863 = vmatprep.subr.mxu0 %v1784_v42  ;;  %6896 = vmatpush3.msra.mxu1 %v1776_v52  ;;  %v2143_v52 = vld [vmem:[#allocation8] sm:$0xff] }
 0x23c   : > { %1864 = vmatpush1.msra.mxu0 %v1783_v44  ;;  %6905 = vmatprep.subr.mxu1 %v8669_v0 }
 0x23d   : > { %1865 = vmatprep.subr.mxu0 %v1781_v45 }
 0x23e   : > { %1866 = vmatpush1.msra.mxu0 %v1780_v46 }
 0x23f   : > { %1867 = vmatprep.subr.mxu0 %v1778_v47  ;;  %v2146_v47 = vld [vmem:[#allocation8 + $0x18] sm:$0xff] }
 0x240   : > { %1868 = vmatpush1.msra.mxu0 %v1777_v48 }
 0x241   : > { %1869 = vmatprep.subr.mxu0 %v1775_v50 }
 0x242   : > { %1870 = vmatpush1.msra.mxu0 %v1774_v51  ;;  %v2144_v51 = vld [vmem:[#allocation8 + $0x8] sm:$0xff] }
 0x243   : > { %6900 = vmatprep.subr.mxu0 %v8669_v0 }
 0x2df   : > { %v1696_v54 = vpop.f32.mrf.mxu0 }
 0x2e0   : > { %v9246_v55 = vadd.f32 %v6529_v53, %v1696_v54 }
 0x2e1   : > { %v6857_v56 = vpop.f32.mrf.mxu0 }
 0x2e2   : > { %1904 = vmatmul.mubr.f32.vlgmr.msra.gmra.mxu0 %v9246_v55  ;;  %6898 = vmatmul.mubr.f32.vlgmr.msra.gmra.mxu1 %v9246_v55 }
 0x2e3   : > { %v1770_v57 = vpop.f32.mrf.mxu0  ;;  %6902 = vmatprep.mubr.msk.f32.mxu0 %vm8670_vm0, %v8669_v0  ;;  %6907 = vmatprep.mubr.msk.f32.mxu1 %vm8670_vm0, %v8669_v0 }
 0x2e4   : > { %v9254_v58 = vadd.f32 %v6529_v53, %v1770_v57 }
 0x2e5   : > { %v6864_v59 = vpop.f32.mrf.mxu0 }
 0x3a2   : > { %v1905_v5 = vpop.f32.mrf.mxu0  ;;  %v1976_v6 = vpop.f32.mrf.mxu1 }
 0x3a3   : > { %v9269_v7 = vadd.f32 %v1976_v6, %v1835_v2  ;;  %v9280_v12 = vadd.f32 %v1905_v5, %v1827_v8 }
 0x3a4   : > { %v1907_v9 = vpop.f32.mrf.mxu0  ;;  %v6899_v10 = vpop.f32.mrf.mxu1 }
 0x3a5   : > { %v9272_v11 = vadd.f32 %v1907_v9, %v1831_v4  ;;  %6906 = vmatpush3.msra.mxu1 %v9269_v7 }
 0x3a6   : > { %6915 = vmatprep.subr.mxu1 %v8669_v0 }
 0x3a7   : > { %2149 = vrot.lane.b32.xlu0 %v9272_v11, %s8671_s8  ;;  %6901 = vmatpush3.xpose.msk.msra.mxu0 %vm1980_vm2, %v9272_v11 }
 0x3a8   : > { %6910 = vmatprep.subr.mxu0 %v8669_v0 }
 0x3aa   : > { %6903 = vmatmul.mubr.msk.f32.vlgmr.msra.gmra.mxu0 %vm1980_vm2, %v9280_v12 }
 0x3ab   : > { %2147 = vrot.lane.b32.xlu0 %v9280_v12, %s8671_s8  ;;  %6912 = vmatprep.mubr.msk.f32.mxu0 %vm8670_vm0, %v8669_v0 }
 0x419   : > { %v2150_v13 = vpop.permute.xlu0 %2149 }
 0x41a   : > { %6911 = vmatpush3.xpose.msk.msra.mxu0 %vm1980_vm2, %v2150_v13 }
 0x41b   : > { %6920 = vmatprep.subr.mxu0 %v8669_v0 }
 0x41d   : > { %v2148_v14 = vpop.permute.xlu0 %2147 }
 0x41e   : > { %6913 = vmatmul.mubr.msk.f32.vlgmr.msra.gmra.mxu0 %vm1980_vm2, %v2148_v14 }
 0x41f   : > { %6928 = vmatprep.mubr.msk.f32.mxu0 %vm8670_vm0, %v8669_v0  ;;  %6921 = vmatpush3.msra.mxu0 %v2317_v36  ;;  %v2875_v36 = vld [vmem:[#allocation8 + $0x68] sm:$0xff] }
 0x420   : > { %6922 = vmatprep.subr.mxu0 %v8669_v0 }
 0x421   : > { %6923 = vmatpush3.msra.mxu0 %v2316_v37 }
 0x422   : > { %6924 = vmatprep.subr.mxu0 %v8669_v0 }
 0x423   : > { %6925 = vmatpush3.msra.mxu0 %v2315_v38 }
 0x424   : > { %6926 = vmatprep.subr.mxu0 %v8669_v0 }
 0x425   : > { %6927 = vmatpush3.msra.mxu0 %v2314_v39 }
 0x426   : > { %6931 = vmatprep.subr.mxu0 %v8669_v0 }
 0x46a   : > { %v2053_v15 = vpop.f32.mrf.mxu0 }
 0x46b   : > { %v2057_v16 = vmul.f32 0.17677669, %v2053_v15  ;;  %v2633_v15 = vld [vmem:[#allocation8 + $0x58] sm:$0xff] }
 0x46c   : > { %v6904_v17 = vpop.f32.mrf.mxu0 }
 0x46d   : > { %v2059_v18 = vsel %vm2058_vm3, %v2057_v16, -inf  ;;  %v2631_v17 = vld [vmem:[#allocation8 + $0x48] sm:$0xff] }
 0x46e   : > { %2060 = vmax.xlane.f32.xlu1 %v2059_v18 }
 0x4de   : > { %v2221_v19 = vpop.f32.mrf.mxu0 }
 0x4df   : > { %v2225_v20 = vmul.f32 0.17677669, %v2221_v19 }
 0x4e0   : > { %v6914_v21 = vpop.f32.mrf.mxu0 }
 0x4e1   : > { %v2226_v22 = vsel %vm2058_vm3, %v2225_v20, -inf  ;;  %v2630_v21 = vld [vmem:[#allocation8 + $0x40] sm:$0xff] }
 0x4e2   : > { %2227 = vmax.xlane.f32.xlu1 %v2226_v22 }
 0x4f7   : > { %v2061_v23 = vpop.xlane.xlu1 %2060 }
 0x4f8   : > { %v2062_v24 = vsub.f32 %v2057_v16, %v2061_v23  ;;  %v2632_v16 = vld [vmem:[#allocation8 + $0x50] sm:$0xff] }
 0x4fa   : > { %v2063_v25 = vmul.f32 1.442695, %v2062_v24 }
 0x4fc   : > { %7583 = vpow2.f32 %v2063_v25 }
 0x509   : > { %v7584_v26 = vpop.eup %7583 }
 0x50a   : > { %v2065_v27 = vsel %vm2058_vm3, %v7584_v26, 0.0 }
 0x50b   : > { %2066 = vadd.xlane.f32.xlu0 %v2065_v27 }
 0x521   : > { %2554 = vrot.lane.b32.xlu0 %v9269_v7, %s8672_s0 }
 0x56b   : > { %v2228_v28 = vpop.xlane.xlu1 %2227 }
 0x56c   : > { %v2229_v29 = vsub.f32 %v2225_v20, %v2228_v28 }
 0x56e   : > { %v2230_v30 = vmul.f32 1.442695, %v2229_v29 }
 0x570   : > { %7585 = vpow2.f32 %v2230_v30 }
 0x57d   : > { %v7586_v31 = vpop.eup %7585 }
 0x57e   : > { %v2232_v32 = vsel %vm2058_vm3, %v7586_v31, 0.0 }
 0x57f   : > { %2233 = vadd.xlane.f32.xlu1 %v2232_v32 }
 0x590   : > { %2238 = vrot.lane.b32.xlu1 %v9269_v7, %s8671_s8 }
 0x594   : > { %v2067_v33 = vpop.xlane.xlu0 %2066  ;;  %2466 = vrot.lane.b32.xlu1 %v9272_v11, %s8672_s0 }
 0x595   : > { %7587 = vrcp.f32 %v2067_v33  ;;  %v2877_v33 = vld [vmem:[#allocation8 + $0x78] sm:$0xff] }
 0x598   : > { %2464 = vrot.lane.b32.xlu1 %v9280_v12, %s8672_s0  ;;  %v2555_v44 = vpop.permute.xlu0 %2554 }
 0x5a2   : > { %v7588_v34 = vpop.eup %7587 }
 0x5a3   : > { %v2069_v35 = vmul.f32 %v7588_v34, %v7584_v26  ;;  %v2876_v34 = vld [vmem:[#allocation8 + $0x70] sm:$0xff] }
 0x5a5   : > { %6908 = vmatmul.mubr.msk.f32.vlgmr.msra.gmra.mxu1 %vm2058_vm3, %v2069_v35 }
 0x5a6   : > { %6917 = vmatprep.mubr.msk.f32.mxu1 %vm8670_vm0, %v8669_v0 }
 0x608   : > { %v2234_v40 = vpop.xlane.xlu1 %2233 }
 0x609   : > { %7589 = vrcp.f32 %v2234_v40 }
 0x60c   : > { %v2239_v41 = vpop.permute.xlu1 %2238 }
 0x60d   : > { %6916 = vmatpush3.msra.mxu1 %v2239_v41 }
 0x60e   : > { %6947 = vmatprep.subr.mxu1 %v8669_v0 }
 0x610   : > { %v2467_v53 = vpop.permute.xlu1 %2466 }
 0x614   : > { %v2465_v54 = vpop.permute.xlu1 %2464 }
 0x616   : > { %v7590_v42 = vpop.eup %7589 }
 0x617   : > { %v2236_v43 = vmul.f32 %v7590_v42, %v7586_v31  ;;  %v2874_v42 = vld [vmem:[#allocation8 + $0x60] sm:$0xff] }
 0x619   : > { %6918 = vmatmul.mubr.msk.f32.vlgmr.msra.gmra.mxu1 %vm2058_vm3, %v2236_v43 }
 0x61a   : > { %6948 = vmatpush3.msra.mxu1 %v2555_v44  ;;  %6949 = vmatprep.mubr.msk.f32.mxu1 %vm8670_vm0, %v8669_v0 }
 0x61b   : > { %6963 = vmatprep.subr.mxu1 %v8669_v0 }
 0x665   : > { %v2139_v45 = vpop.f32.mrf.mxu1 }
 0x667   : > { %v6909_v46 = vpop.f32.mrf.mxu1 }
 0x668   : > { %v6548_v46 = vld [vmem:[#allocation10] ss:$0 sm:$0xff] }
 0x6d9   : > { %v2310_v48 = vpop.f32.mrf.mxu1 }
 0x6da   : > { %6929 = vmatmul.mubr.msk.f32.vlgmr.msra.gmra.mxu0 %vm1980_vm2, %v2310_v48 }
 0x6db   : > { %6932 = vmatpush3.msra.mxu0 %v2146_v47  ;;  %v6919_v50 = vpop.f32.mrf.mxu1  ;;  %6939 = vmatprep.mubr.msk.f32.mxu0 %vm8670_vm0, %v8669_v0 }
 0x6dc   : > { %6933 = vmatprep.subr.mxu0 %v8669_v0 }
 0x6dd   : > { %6934 = vmatpush3.msra.mxu0 %v2145_v49 }
 0x6de   : > { %6935 = vmatprep.subr.mxu0 %v8669_v0 }
 0x6df   : > { %6936 = vmatpush3.msra.mxu0 %v2144_v51  ;;  %v3020_v51 = vld [vmem:[#allocation14 + $0xf8] sm:$0xff] }
 0x6e0   : > { %6937 = vmatprep.subr.mxu0 %v8669_v0 }
 0x6e1   : > { %6938 = vmatpush3.msra.mxu0 %v2143_v52  ;;  %v3019_v52 = vld [vmem:[#allocation14 + $0xf0] sm:$0xff] }
 0x6e2   : > { %6940 = vmatmul.mubr.msk.f32.vlgmr.msra.gmra.mxu0 %vm1980_vm2, %v2139_v45  ;;  %6942 = vmatprep.subr.mxu0 %v8669_v0 }
 0x6e3   : > { %6943 = vmatpush3.xpose.msk.msra.mxu0 %vm1980_vm2, %v2467_v53  ;;  %6944 = vmatprep.mubr.msk.f32.mxu0 %vm8670_vm0, %v8669_v0  ;;  %v3018_v53 = vld [vmem:[#allocation14 + $0xe8] sm:$0xff] }
 0x6e4   : > { %6952 = vmatprep.subr.mxu0 %v8669_v0 }
 0x6e6   : > { %6945 = vmatmul.mubr.msk.f32.vlgmr.msra.gmra.mxu0 %vm1980_vm2, %v2465_v54  ;;  %v3017_v54 = vld [vmem:[#allocation14 + $0xe0] sm:$0xff] }
 0x6e7   : > { %6960 = vmatprep.mubr.msk.f32.mxu0 %vm8670_vm0, %v8669_v0  ;;  %6953 = vmatpush3.msra.mxu0 %v2633_v15  ;;  %v3005_v15 = vld [vmem:[#allocation14 + $0x80] sm:$0xff] }
 0x6e8   : > { %6954 = vmatprep.subr.mxu0 %v8669_v0 }
 0x6e9   : > { %6955 = vmatpush3.msra.mxu0 %v2632_v16  ;;  %v3004_v16 = vld [vmem:[#allocation14 + $0x78] sm:$0xff] }
 0x6ea   : > { %6956 = vmatprep.subr.mxu0 %v8669_v0 }
 0x6eb   : > { %6957 = vmatpush3.msra.mxu0 %v2631_v17  ;;  %v3003_v17 = vld [vmem:[#allocation14 + $0x70] sm:$0xff] }
 0x6ec   : > { %6958 = vmatprep.subr.mxu0 %v8669_v0 }
 0x6ed   : > { %6959 = vmatpush3.msra.mxu0 %v2630_v21  ;;  %v2997_v21 = vld [vmem:[#allocation14 + $0x40] sm:$0xff] }
 0x6ee   : > { %6973 = vmatprep.subr.mxu0 %v8669_v0 }
 0x79a   : > { %v2387_v56 = vpop.f32.mrf.mxu0 }
 0x79c   : > { %v6930_v57 = vpop.f32.mrf.mxu0 }
 0x79d   : > { %v3015_v57 = vld [vmem:[#allocation14 + $0xd0] sm:$0xff] }
 0x7a2   : > { %v2460_v59 = vpop.f32.mrf.mxu0 }
 0x7a3   : > { %v9333_v60 = vadd.f32 %v2460_v59, %v2387_v56  ;;  %v3016_v56 = vld [vmem:[#allocation14 + $0xd8] sm:$0xff]  ;;  %v3014_v59 = vld [vmem:[#allocation14 + $0xc8] sm:$0xff] }
 0x7a4   : > { %v6941_v63 = vpop.f32.mrf.mxu0 }
 0x7a5   : > { %v3012_v63 = vld [vmem:[#allocation14 + $0xb8] sm:$0xff] }
 0x7a6   : > { %v2538_v2 = vpop.f32.mrf.mxu0 }
 0x7a7   : > { %v2542_v4 = vmul.f32 0.17677669, %v2538_v2 }
 0x7a8   : > { %v6946_v5 = vpop.f32.mrf.mxu0 }
 0x7a9   : > { %v2543_v6 = vsel %vm2058_vm3, %v2542_v4, -inf }
 0x7aa   : > { %2544 = vmax.xlane.f32.xlu1 %v2543_v6  ;;  %v3011_v6 = vld [vmem:[#allocation14 + $0xb0] sm:$0xff] }
 0x833   : > { %v2545_v8 = vpop.xlane.xlu1 %2544 }
 0x834   : > { %v2546_v9 = vsub.f32 %v2542_v4, %v2545_v8  ;;  %v3010_v8 = vld [vmem:[#allocation14 + $0xa8] sm:$0xff] }
 0x836   : > { %v2547_v10 = vmul.f32 1.442695, %v2546_v9  ;;  %v3009_v9 = vld [vmem:[#allocation14 + $0xa0] sm:$0xff] }
 0x838   : > { %7591 = vpow2.f32 %v2547_v10  ;;  %v3008_v10 = vld [vmem:[#allocation14 + $0x98] sm:$0xff] }
 0x845   : > { %v7592_v13 = vpop.eup %7591 }
 0x846   : > { %v2549_v14 = vsel %vm2058_vm3, %v7592_v13, 0.0 }
 0x847   : > { %2550 = vadd.xlane.f32.xlu0 %v2549_v14  ;;  %v3006_v14 = vld [vmem:[#allocation14 + $0x88] sm:$0xff] }
 0x85d   : > { %2710 = vrot.lane.b32.xlu0 %v9272_v11, %s8673_s16 }
 0x861   : > { %2708 = vrot.lane.b32.xlu0 %v9280_v12, %s8673_s16 }
 0x8d0   : > { %v2551_v18 = vpop.xlane.xlu0 %2550 }
 0x8d1   : > { %7593 = vrcp.f32 %v2551_v18  ;;  %v3002_v18 = vld [vmem:[#allocation14 + $0x68] sm:$0xff] }
 0x8d4   : > { %v2711_v20 = vpop.permute.xlu0 %2710 }
 0x8d8   : > { %v2709_v12 = vpop.permute.xlu0 %2708 }
 0x8de   : > { %v7594_v19 = vpop.eup %7593 }
 0x8df   : > { %v2553_v11 = vmul.f32 %v7594_v19, %v7592_v13  ;;  %v3007_v13 = vld [vmem:[#allocation14 + $0x90] sm:$0xff]  ;;  %v3001_v19 = vld [vmem:[#allocation14 + $0x60] sm:$0xff] }
 0x8e1   : > { %6950 = vmatmul.mubr.msk.f32.vlgmr.msra.gmra.mxu1 %vm2058_vm3, %v2553_v11  ;;  %v2999_v11 = vld [vmem:[#allocation14 + $0x50] sm:$0xff] }
 0x8e2   : > { %6964 = vmatpush3.xpose.msk.msra.mxu1 %vm1980_vm2, %v2711_v20  ;;  %6965 = vmatprep.mubr.msk.f32.mxu1 %vm8670_vm0, %v8669_v0  ;;  %v3000_v20 = vld [vmem:[#allocation14 + $0x58] sm:$0xff] }
 0x8e3   : > { %6968 = vmatprep.subr.mxu1 %v8669_v0 }
 0x8e5   : > { %6966 = vmatmul.mubr.msk.f32.vlgmr.msra.gmra.mxu1 %vm1980_vm2, %v2709_v12  ;;  %v2998_v12 = vld [vmem:[#allocation14 + $0x48] sm:$0xff] }
 0x8e6   : > { %6970 = vmatprep.mubr.msk.f32.mxu1 %vm8670_vm0, %v8669_v0 }
 0x9a1   : > { %v2626_v22 = vpop.f32.mrf.mxu1 }
 0x9a2   : > { %6961 = vmatmul.mubr.msk.f32.vlgmr.msra.gmra.mxu0 %vm1980_vm2, %v2626_v22  ;;  %v2996_v22 = vld [vmem:[#allocation14 + $0x38] sm:$0xff] }
 0x9a3   : > { %v6951_v23 = vpop.f32.mrf.mxu1  ;;  %6981 = vmatprep.mubr.msk.f32.mxu0 %vm8670_vm0, %v8669_v0  ;;  %6974 = vmatpush3.msra.mxu0 %v2877_v33  ;;  %v3136_v33 = vld [vmem:[#allocation17 + $0xf0] sm:$0xff] }
 0x9a4   : > { %6975 = vmatprep.subr.mxu0 %v8669_v0  ;;  %v2995_v23 = vld [vmem:[#allocation14 + $0x30] sm:$0xff] }
 0x9a5   : > { %v2782_v24 = vpop.f32.mrf.mxu1  ;;  %6976 = vmatpush3.msra.mxu0 %v2876_v34  ;;  %v3120_v34 = vld [vmem:[#allocation17 + $0x70] sm:$0xff] }
 0x9a6   : > { %v2786_v25 = vmul.f32 0.17677669, %v2782_v24  ;;  %6977 = vmatprep.subr.mxu0 %v8669_v0  ;;  %v2994_v24 = vld [vmem:[#allocation14 + $0x28] sm:$0xff] }
 0x9a7   : > { %v6967_v26 = vpop.f32.mrf.mxu1  ;;  %6978 = vmatpush3.msra.mxu0 %v2875_v36  ;;  %v3119_v36 = vld [vmem:[#allocation17 + $0x68] sm:$0xff] }
 0x9a8   : > { %v2787_v27 = vsel %vm2058_vm3, %v2786_v25, -inf  ;;  %6979 = vmatprep.subr.mxu0 %v8669_v0  ;;  %v2992_v26 = vld [vmem:[#allocation14 + $0x18] sm:$0xff] }
 0x9a9   : > { %2788 = vmax.xlane.f32.xlu0 %v2787_v27  ;;  %6980 = vmatpush3.msra.mxu0 %v2874_v42  ;;  %v2991_v27 = vld [vmem:[#allocation14 + $0x10] sm:$0xff] }
 0x9aa   : > { %v3131_v42 = vld [vmem:[#allocation17 + $0xc8] sm:$0xff] }
 0xa32   : > { %v2789_v28 = vpop.xlane.xlu0 %2788 }
 0xa33   : > { %v2790_v29 = vsub.f32 %v2786_v25, %v2789_v28  ;;  %v2993_v25 = vld [vmem:[#allocation14 + $0x20] sm:$0xff]  ;;  %v2990_v28 = vld [vmem:[#allocation14 + $0x8] sm:$0xff] }
 0xa35   : > { %v2791_v30 = vmul.f32 1.442695, %v2790_v29  ;;  %v2989_v29 = vld [vmem:[#allocation14] sm:$0xff] }
 0xa37   : > { %7595 = vpow2.f32 %v2791_v30  ;;  %v3289_v30 = vld [vmem:[#allocation23 + $0x170] sm:$0xff] }
 0xa44   : > { %v7596_v31 = vpop.eup %7595 }
 0xa45   : > { %v2793_v32 = vsel %vm2058_vm3, %v7596_v31, 0.0 }
 0xa46   : > { %2794 = vadd.xlane.f32.xlu1 %v2793_v32  ;;  %v3121_v32 = vld [vmem:[#allocation17 + $0x78] sm:$0xff] }
 0xa57   : > { %2798 = vrot.lane.b32.xlu1 %v9269_v7, %s8673_s16 }
 0xa62   : > { %v2703_v35 = vpop.f32.mrf.mxu0 }
 0xa63   : > { %v2707_v37 = vadd.f32 %v2703_v35, %v9333_v60  ;;  %v3013_v60 = vld [vmem:[#allocation14 + $0xc0] sm:$0xff]  ;;  %v3135_v35 = vld [vmem:[#allocation17 + $0xe8] sm:$0xff] }
 0xa64   : > { %v6962_v38 = vpop.f32.mrf.mxu0 }
 0xa65   : > { %v3118_v38 = vld [vmem:[#allocation17 + $0x60] sm:$0xff] }
 0xacf   : > { %v2795_v39 = vpop.xlane.xlu1 %2794 }
 0xad0   : > { %7597 = vrcp.f32 %v2795_v39  ;;  %v3133_v39 = vld [vmem:[#allocation17 + $0xd8] sm:$0xff] }
 0xad3   : > { %v2799_v40 = vpop.permute.xlu1 %2798 }
 0xad4   : > { %6969 = vmatpush3.msra.mxu1 %v2799_v40  ;;  %v3117_v40 = vld [vmem:[#allocation17 + $0x58] sm:$0xff] }
 0xad5   : > { %3033 = vmatprep.subr.mxu1 %v3020_v51  ;;  %v3111_v51 = vld [vmem:[#allocation17 + $0x28] sm:$0xff] }
 0xadd   : > { %v7598_v7 = vpop.eup %7597 }
 0xade   : > { %v2797_v41 = vmul.f32 %v7598_v7, %v7596_v31  ;;  %v3137_v31 = vld [vmem:[#allocation17 + $0xf8] sm:$0xff]  ;;  %v3132_v7 = vld [vmem:[#allocation17 + $0xd0] sm:$0xff] }
 0xadf   : > { %6658 = vmatprep.subr.mxu0 %v3137_v31  ;;  %v3252_v31 = vld [vmem:[#allocation23 + $0x48] sm:$0xff] }
 0xae0   : > { %6971 = vmatmul.mubr.msk.f32.vlgmr.msra.gmra.mxu1 %vm2058_vm3, %v2797_v41  ;;  %v3116_v41 = vld [vmem:[#allocation17 + $0x50] sm:$0xff] }
 0xae1   : > { %3097 = vmatprep.mubr.f32.mxu1 %v8669_v0  ;;  %3034 = vmatpush1.msra.mxu1 %v3019_v52  ;;  %v3126_v52 = vld [vmem:[#allocation17 + $0xa0] sm:$0xff] }
 0xae2   : > { %3035 = vmatprep.subr.mxu1 %v3018_v53  ;;  %v3110_v53 = vld [vmem:[#allocation17 + $0x20] sm:$0xff] }
 0xae3   : > { %3036 = vmatpush1.msra.mxu1 %v3017_v54  ;;  %v3125_v54 = vld [vmem:[#allocation17 + $0x98] sm:$0xff] }
 0xae4   : > { %3037 = vmatprep.subr.mxu1 %v3016_v56 }
 0xae5   : > { %3038 = vmatpush1.msra.mxu1 %v3015_v57 }
 0xae6   : > { %3039 = vmatprep.subr.mxu1 %v3014_v59 }
 0xae7   : > { %3040 = vmatpush1.msra.mxu1 %v3013_v60 }
 0xae8   : > { %3041 = vmatprep.subr.mxu1 %v3012_v63  ;;  %v6549_v63 = vld [vmem:[#allocation11] ss:$0 sm:$0xff] }
 0xae9   : > { %3042 = vmatpush1.msra.mxu1 %v3011_v6 }
 0xaea   : > { %3043 = vmatprep.subr.mxu1 %v3010_v8  ;;  %v3288_v8 = vld [vmem:[#allocation23 + $0x168] sm:$0xff] }
 0xaeb   : > { %3044 = vmatpush1.msra.mxu1 %v3009_v9  ;;  %v3286_v9 = vld [vmem:[#allocation23 + $0x158] sm:$0xff] }
 0xaec   : > { %3045 = vmatprep.subr.mxu1 %v3008_v10  ;;  %v3285_v10 = vld [vmem:[#allocation23 + $0x150] sm:$0xff] }
 0xaed   : > { %3046 = vmatpush1.msra.mxu1 %v3007_v13  ;;  %v3283_v13 = vld [vmem:[#allocation23 + $0x140] sm:$0xff] }
 0xaee   : > { %3047 = vmatprep.subr.mxu1 %v3006_v14  ;;  %v3282_v14 = vld [vmem:[#allocation23 + $0x138] sm:$0xff] }
 0xaef   : > { %3048 = vmatpush1.msra.mxu1 %v3005_v15  ;;  %v3280_v15 = vld [vmem:[#allocation23 + $0x128] sm:$0xff] }
 0xaf0   : > { %3049 = vmatprep.subr.mxu1 %v3004_v16  ;;  %v3279_v16 = vld [vmem:[#allocation23 + $0x120] sm:$0xff] }
 0xaf1   : > { %3050 = vmatpush1.msra.mxu1 %v3003_v17  ;;  %v3276_v17 = vld [vmem:[#allocation23 + $0x108] sm:$0xff] }
 0xaf2   : > { %3051 = vmatprep.subr.mxu1 %v3002_v18  ;;  %v3274_v18 = vld [vmem:[#allocation23 + $0xf8] sm:$0xff] }
 0xaf3   : > { %3052 = vmatpush1.msra.mxu1 %v3001_v19  ;;  %v3273_v19 = vld [vmem:[#allocation23 + $0xf0] sm:$0xff] }
 0xaf4   : > { %3053 = vmatprep.subr.mxu1 %v3000_v20  ;;  %v3271_v20 = vld [vmem:[#allocation23 + $0xe0] sm:$0xff] }
 0xaf5   : > { %3054 = vmatpush1.msra.mxu1 %v2999_v11  ;;  %v3270_v11 = vld [vmem:[#allocation23 + $0xd8] sm:$0xff] }
 0xaf6   : > { %3055 = vmatprep.subr.mxu1 %v2998_v12  ;;  %v3268_v12 = vld [vmem:[#allocation23 + $0xc8] sm:$0xff] }
 0xaf7   : > { %3056 = vmatpush1.msra.mxu1 %v2997_v21  ;;  %v3267_v21 = vld [vmem:[#allocation23 + $0xc0] sm:$0xff] }
 0xaf8   : > { %3057 = vmatprep.subr.mxu1 %v2996_v22  ;;  %v3265_v22 = vld [vmem:[#allocation23 + $0xb0] sm:$0xff] }
 0xaf9   : > { %3058 = vmatpush1.msra.mxu1 %v2995_v23  ;;  %v3264_v23 = vld [vmem:[#allocation23 + $0xa8] sm:$0xff] }
 0xafa   : > { %3059 = vmatprep.subr.mxu1 %v2994_v24  ;;  %v3262_v24 = vld [vmem:[#allocation23 + $0x98] sm:$0xff] }
 0xafb   : > { %3060 = vmatpush1.msra.mxu1 %v2993_v25  ;;  %v3261_v25 = vld [vmem:[#allocation23 + $0x90] sm:$0xff] }
 0xafc   : > { %3061 = vmatprep.subr.mxu1 %v2992_v26  ;;  %v3259_v26 = vld [vmem:[#allocation23 + $0x80] sm:$0xff] }
 0xafd   : > { %3062 = vmatpush1.msra.mxu1 %v2991_v27  ;;  %v3258_v27 = vld [vmem:[#allocation23 + $0x78] sm:$0xff] }
 0xafe   : > { %3063 = vmatprep.subr.mxu1 %v2990_v28  ;;  %v3256_v28 = vld [vmem:[#allocation23 + $0x68] sm:$0xff] }
 0xaff   : > { %3064 = vmatpush1.msra.mxu1 %v2989_v29  ;;  %v3255_v29 = vld [vmem:[#allocation23 + $0x60] sm:$0xff] }
 0xb00   : > { %3308 = vmatprep.subr.mxu1 %v3289_v30  ;;  %v3253_v30 = vld [vmem:[#allocation23 + $0x50] sm:$0xff] }
 0xba0   : > { %v2870_v43 = vpop.f32.mrf.mxu1 }
 0xba1   : > { %6982 = vmatmul.mubr.msk.f32.vlgmr.msra.gmra.mxu0 %vm1980_vm2, %v2870_v43  ;;  %v3115_v43 = vld [vmem:[#allocation17 + $0x48] sm:$0xff] }
 0xba2   : > { %v6972_v44 = vpop.f32.mrf.mxu1  ;;  %6659 = vmatpush3.msra.mxu0 %v3121_v32  ;;  %v3250_v32 = vld [vmem:[#allocation23 + $0x38] sm:$0xff] }
 0xba3   : > { %6660 = vmatprep.subr.mxu0 %v3136_v33  ;;  %v3130_v44 = vld [vmem:[#allocation17 + $0xc0] sm:$0xff]  ;;  %v3249_v33 = vld [vmem:[#allocation23 + $0x30] sm:$0xff] }
 0xba4   : > { %6661 = vmatpush3.msra.mxu0 %v3120_v34  ;;  %v3247_v34 = vld [vmem:[#allocation23 + $0x20] sm:$0xff] }
 0xba5   : > { %6662 = vmatprep.subr.mxu0 %v3135_v35  ;;  %v3246_v35 = vld [vmem:[#allocation23 + $0x18] sm:$0xff] }
 0xba6   : > { %6663 = vmatpush3.msra.mxu0 %v3119_v36  ;;  %v3244_v36 = vld [vmem:[#allocation23 + $0x8] sm:$0xff] }
 0xc61   : > { %v2947_v45 = vpop.f32.mrf.mxu0 }
 0xc62   : > { %v2951_v47 = vadd.f32 %v2947_v45, %v2707_v37  ;;  %v3134_v37 = vld [vmem:[#allocation17 + $0xe0] sm:$0xff] }
 0xc63   : > { %v6983_v48 = vpop.f32.mrf.mxu0  ;;  %6664 = vmatprep.subr.mxu0 %v3134_v37  ;;  %v3114_v45 = vld [vmem:[#allocation17 + $0x40] sm:$0xff] }
 0xc64   : > { %v2959_v49 = vadd.f32 %v6548_v46, %v2951_v47  ;;  %6665 = vmatpush3.msra.mxu0 %v3118_v38  ;;  %v3129_v46 = vld [vmem:[#allocation17 + $0xb8] sm:$0xff]  ;;  %v3128_v48 = vld [vmem:[#allocation17 + $0xb0] sm:$0xff]  ;;  %v3243_v37 = vld [vmem:[#allocation23] sm:$0xff] }
 0xc65   : > { %6666 = vmatprep.subr.mxu0 %v3133_v39  ;;  %v3113_v47 = vld [vmem:[#allocation17 + $0x38] sm:$0xff]  ;;  %v3124_v39 = vld [vmem:[#allocation17 + $0x90] sm:$0xff] }
 0xc66   : > { %v2960_v50 = vadd.f32 %v2959_v49, %v9246_v55  ;;  %6667 = vmatpush3.msra.mxu0 %v3117_v40  ;;  %v3112_v49 = vld [vmem:[#allocation17 + $0x30] sm:$0xff]  ;;  %v3109_v38 = vld [vmem:[#allocation17 + $0x18] sm:$0xff] }
 0xc67   : > { %6668 = vmatprep.subr.mxu0 %v3132_v7  ;;  %v3108_v40 = vld [vmem:[#allocation17 + $0x10] sm:$0xff]  ;;  %v3123_v7 = vld [vmem:[#allocation17 + $0x88] sm:$0xff] }
 0xc68   : > { %2961 = vadd.xlane.f32.xlu1 %v2960_v50  ;;  %6669 = vmatpush3.msra.mxu0 %v3116_v41  ;;  %v3107_v41 = vld [vmem:[#allocation17 + $0x8] sm:$0xff] }
 0xc69   : > { %6670 = vmatprep.subr.mxu0 %v3131_v42  ;;  %v3122_v42 = vld [vmem:[#allocation17 + $0x80] sm:$0xff] }
 0xc6a   : > { %6671 = vmatpush3.msra.mxu0 %v3115_v43  ;;  %v3106_v43 = vld [vmem:[#allocation17] sm:$0xff] }
 0xc6b   : > { %6672 = vmatprep.subr.mxu0 %v3130_v44  ;;  %v3021_v44 = vld [vmem:[#allocation16] sm:$0x3] }
 0xc6c   : > { %6673 = vmatpush3.msra.mxu0 %v3114_v45  ;;  %v3026_v45 = vrot.slane %v3021_v44, %v9266_v3 }
 0xc6d   : > { %6674 = vmatprep.subr.mxu0 %v3129_v46  ;;  %v3030_v46 = vrot.slane %v3021_v44, %v9261_v1 }
 0xc6e   : > { %6675 = vmatpush3.msra.mxu0 %v3113_v47 }
 0xc6f   : > { %6676 = vmatprep.subr.mxu0 %v3128_v48 }
 0xc70   : > { %6677 = vmatpush3.msra.mxu0 %v3112_v49 }
 0xcf1   : > { %v2962_v55 = vpop.xlane.xlu1 %2961 }
 0xcf2   : > { %v2964_v2 = vmul.f32 0.0078125, %v2962_v55 }
 0xcf4   : > { %v9368_v4 = vsub.f32 %v2960_v50, %v2964_v2  ;;  %v3127_v50 = vld [vmem:[#allocation17 + $0xa8] sm:$0xff]  ;;  %v6550_v2 = vld [vmem:[#allocation13] ss:$0 sm:$0xff] }
 0xcf5   : > { %6678 = vmatprep.subr.mxu0 %v3127_v50 }
 0xcf6   : > { %v2966_v5 = vmul.f32 %v9368_v4, %v9368_v4  ;;  %6679 = vmatpush3.msra.mxu0 %v3111_v51 }
 0xcf7   : > { %6680 = vmatprep.subr.mxu0 %v3126_v52 }
 0xcf8   : > { %2967 = vadd.xlane.f32.xlu0 %v2966_v5  ;;  %6681 = vmatpush3.msra.mxu0 %v3110_v53  ;;  %v3290_v53 = vld [vmem:[#allocation23 + $0x178] sm:$0xff] }
 0xcf9   : > { %6682 = vmatprep.subr.mxu0 %v3125_v54  ;;  %v3287_v54 = vld [vmem:[#allocation23 + $0x160] sm:$0xff] }
 0xcfa   : > { %6683 = vmatpush3.msra.mxu0 %v3109_v38 }
 0xcfb   : > { %6684 = vmatprep.subr.mxu0 %v3124_v39 }
 0xcfc   : > { %6685 = vmatpush3.msra.mxu0 %v3108_v40 }
 0xcfd   : > { %6686 = vmatprep.subr.mxu0 %v3123_v7 }
 0xcfe   : > { %6687 = vmatpush3.msra.mxu0 %v3107_v41 }
 0xcff   : > { %6688 = vmatprep.subr.mxu0 %v3122_v42 }
 0xd00   : > { %6689 = vmatpush3.msra.mxu0 %v3106_v43 }
 0xd01   : > { %6984 = vmatprep.subr.mxu0 %v8669_v0 }
 0xd81   : > { %v2968_v56 = vpop.xlane.xlu0 %2967 }
 0xd82   : > { %v2969_v57 = vmul.f32 0.0078125, %v2968_v56  ;;  %v3284_v56 = vld [vmem:[#allocation23 + $0x148] sm:$0xff] }
 0xd84   : > { %v2970_v59 = vadd.f32 1e-05, %v2969_v57  ;;  %v3281_v57 = vld [vmem:[#allocation23 + $0x130] sm:$0xff] }
 0xd86   : > { %7599 = vrsqrt.f32 %v2970_v59  ;;  %v3278_v59 = vld [vmem:[#allocation23 + $0x118] sm:$0xff] }
 0xd93   : > { %v7600_v60 = vpop.eup %7599 }
 0xd94   : > { %v2972_v55 = vmul.f32 %v7600_v60, %v9368_v4  ;;  %v3277_v4 = vld [vmem:[#allocation23 + $0x110] sm:$0xff]  ;;  %v3275_v60 = vld [vmem:[#allocation23 + $0x100] sm:$0xff] }
 0xd96   : > { %v2980_v5 = vmul.f32 %v6549_v63, %v2972_v55  ;;  %v3272_v63 = vld [vmem:[#allocation23 + $0xe8] sm:$0xff]  ;;  %v3269_v55 = vld [vmem:[#allocation23 + $0xd0] sm:$0xff] }
 0xd98   : > { %v9373_v6 = vadd.f32 %v6550_v2, %v2980_v5  ;;  %v3266_v2 = vld [vmem:[#allocation23 + $0xb8] sm:$0xff]  ;;  %v3263_v5 = vld [vmem:[#allocation23 + $0xa0] sm:$0xff] }
 0xd9a   : > { %3098 = vmatmul.mubr.f32.vlgmr.msra.gmra.mxu1 %v9373_v6 }
 0xd9b   : > { %3309 = vmatpush1.msra.mxu1 %v3288_v8  ;;  %3372 = vmatprep.mubr.f32.mxu1 %v8669_v0  ;;  %v3260_v8 = vld [vmem:[#allocation23 + $0x88] sm:$0xff] }
 0xd9c   : > { %3310 = vmatprep.subr.mxu1 %v3286_v9  ;;  %v3257_v9 = vld [vmem:[#allocation23 + $0x70] sm:$0xff] }
 0xd9d   : > { %3311 = vmatpush1.msra.mxu1 %v3285_v10  ;;  %v3291_v10 = vld [vmem:[#allocation25] sm:$0x7] }
 0xd9e   : > { %3312 = vmatprep.subr.mxu1 %v3283_v13  ;;  %v3254_v13 = vld [vmem:[#allocation23 + $0x58] sm:$0xff] }
 0xd9f   : > { %3313 = vmatpush1.msra.mxu1 %v3282_v14  ;;  %v3300_v14 = vrot.slane %v3291_v10, %v9261_v1 }
 0xda0   : > { %3314 = vmatprep.subr.mxu1 %v3280_v15 }
 0xda1   : > { %3315 = vmatpush1.msra.mxu1 %v3279_v16  ;;  %v3251_v16 = vld [vmem:[#allocation23 + $0x40] sm:$0xff] }
 0xda2   : > { %3316 = vmatprep.subr.mxu1 %v3277_v4 }
 0xda3   : > { %3317 = vmatpush1.msra.mxu1 %v3276_v17  ;;  %v3248_v17 = vld [vmem:[#allocation23 + $0x28] sm:$0xff] }
 0xda4   : > { %3318 = vmatprep.subr.mxu1 %v3274_v18  ;;  %v3296_v18 = vrot.slane %v3291_v10, %v9266_v3 }
 0xda5   : > { %3319 = vmatpush1.msra.mxu1 %v3273_v19 }
 0xda6   : > { %3320 = vmatprep.subr.mxu1 %v3271_v20  ;;  %v3245_v20 = vld [vmem:[#allocation23 + $0x10] sm:$0xff] }
 0xda7   : > { %3321 = vmatpush1.msra.mxu1 %v3270_v11 }
 0xda8   : > { %3322 = vmatprep.subr.mxu1 %v3268_v12 }
 0xda9   : > { %3323 = vmatpush1.msra.mxu1 %v3267_v21 }
 0xdaa   : > { %3324 = vmatprep.subr.mxu1 %v3265_v22 }
 0xdab   : > { %3325 = vmatpush1.msra.mxu1 %v3264_v23 }
 0xdac   : > { %3326 = vmatprep.subr.mxu1 %v3262_v24 }
 0xdad   : > { %3327 = vmatpush1.msra.mxu1 %v3261_v25  ;;  %v3304_v25 = vrot.slane %v3291_v10, %v1834_v62 }
 0xdae   : > { %3328 = vmatprep.subr.mxu1 %v3259_v26 }
 0xdaf   : > { %3329 = vmatpush1.msra.mxu1 %v3258_v27 }
 0xdb0   : > { %3330 = vmatprep.subr.mxu1 %v3256_v28 }
 0xdb1   : > { %3331 = vmatpush1.msra.mxu1 %v3255_v29 }
 0xdb2   : > { %3332 = vmatprep.subr.mxu1 %v3253_v30 }
 0xdb3   : > { %3333 = vmatpush1.msra.mxu1 %v3252_v31 }
 0xdb4   : > { %3334 = vmatprep.subr.mxu1 %v3250_v32 }
 0xdb5   : > { %3335 = vmatpush1.msra.mxu1 %v3249_v33 }
 0xdb6   : > { %3336 = vmatprep.subr.mxu1 %v3247_v34 }
 0xdb7   : > { %3337 = vmatpush1.msra.mxu1 %v3246_v35 }
 0xdb8   : > { %3338 = vmatprep.subr.mxu1 %v3244_v36 }
 0xdb9   : > { %3339 = vmatpush1.msra.mxu1 %v3243_v37 }
 0xdba   : > { %3373 = vmatmul.mubr.f32.vlgmr.msra.gmra.mxu1 %v9254_v58  ;;  %7019 = vmatprep.subr.mxu1 %v8669_v0 }
 0xdbb   : > { %7021 = vmatprep.mubr.msk.f32.mxu1 %vm8670_vm0, %v8669_v0 }
 0xe5a   : > { %v3099_v47 = vpop.f32.mrf.mxu1 }
 0xe5b   : > { %v3100_v48 = vadd.f32 %v3099_v47, %v3026_v45  ;;  %v3784_v47 = vld [vmem:[#allocation26 + $0x38] sm:$0xff] }
 0xe5c   : > { %v3101_v49 = vpop.f32.mrf.mxu1 }
 0xe5d   : > { %v3102_v50 = vadd.f32 %v3101_v49, %v3030_v46  ;;  %v3104_v52 = vmax.f32 %v3100_v48, 0.0  ;;  %v3783_v48 = vld [vmem:[#allocation26 + $0x30] sm:$0xff]  ;;  %v3782_v49 = vld [vmem:[#allocation26 + $0x28] sm:$0xff] }
 0xe5f   : > { %v3105_v51 = vmax.f32 %v3102_v50, 0.0  ;;  %v3781_v50 = vld [vmem:[#allocation26 + $0x20] sm:$0xff] }
 0xe61   : > { %3209 = vmatprep.mubr.f32.mxu0 %v3105_v51 }
 0xe62   : > { %3210 = vmatmul.mubr.f32.vlgmr.msra.gmra.mxu0 %v3104_v52 }
 0xe63   : > { %6985 = vmatpush3.msra.mxu0 %v3290_v53  ;;  %7016 = vmatprep.mubr.msk.f32.mxu0 %vm8670_vm0, %v8669_v0 }
 0xe64   : > { %6986 = vmatprep.subr.mxu0 %v8669_v0 }
 0xe65   : > { %6987 = vmatpush3.msra.mxu0 %v3287_v54 }
 0xe66   : > { %6988 = vmatprep.subr.mxu0 %v8669_v0 }
 0xe67   : > { %6989 = vmatpush3.msra.mxu0 %v3284_v56  ;;  %v3613_v56 = vld [vmem:[#allocation26 + $0x18] sm:$0xff] }
 0xe68   : > { %6990 = vmatprep.subr.mxu0 %v8669_v0 }
 0xe69   : > { %6991 = vmatpush3.msra.mxu0 %v3281_v57  ;;  %v3612_v57 = vld [vmem:[#allocation26 + $0x10] sm:$0xff] }
 0xe6a   : > { %6992 = vmatprep.subr.mxu0 %v8669_v0 }
 0xe6b   : > { %6993 = vmatpush3.msra.mxu0 %v3278_v59  ;;  %v3611_v59 = vld [vmem:[#allocation26 + $0x8] sm:$0xff] }
 0xe6c   : > { %6994 = vmatprep.subr.mxu0 %v8669_v0 }
 0xe6d   : > { %6995 = vmatpush3.msra.mxu0 %v3275_v60  ;;  %v3610_v60 = vld [vmem:[#allocation26] sm:$0xff] }
 0xe6e   : > { %6996 = vmatprep.subr.mxu0 %v8669_v0 }
 0xe6f   : > { %6997 = vmatpush3.msra.mxu0 %v3272_v63 }
 0xe70   : > { %6998 = vmatprep.subr.mxu0 %v8669_v0 }
 0xe71   : > { %6999 = vmatpush3.msra.mxu0 %v3269_v55 }
 0xe72   : > { %7000 = vmatprep.subr.mxu0 %v8669_v0 }
 0xe73   : > { %7001 = vmatpush3.msra.mxu0 %v3266_v2 }
 0xe74   : > { %7002 = vmatprep.subr.mxu0 %v8669_v0 }
 0xe75   : > { %7003 = vmatpush3.msra.mxu0 %v3263_v5 }
 0xe76   : > { %7004 = vmatprep.subr.mxu0 %v8669_v0 }
 0xe77   : > { %7005 = vmatpush3.msra.mxu0 %v3260_v8 }
 0xe78   : > { %7006 = vmatprep.subr.mxu0 %v8669_v0 }
 0xe79   : > { %7007 = vmatpush3.msra.mxu0 %v3257_v9 }
 0xe7a   : > { %v3374_v15 = vpop.f32.mrf.mxu1  ;;  %7008 = vmatprep.subr.mxu0 %v8669_v0 }
 0xe7b   : > { %7009 = vmatpush3.msra.mxu0 %v3254_v13  ;;  %v9409_v11 = vadd.f32 %v3374_v15, %v3296_v18 }
 0xe7c   : > { %v3376_v4 = vpop.f32.mrf.mxu1  ;;  %7010 = vmatprep.subr.mxu0 %v8669_v0 }
 0xe7d   : > { %v9401_v19 = vadd.f32 %v3376_v4, %v3300_v14  ;;  %7011 = vmatpush3.msra.mxu0 %v3251_v16 }
 0xe7e   : > { %7012 = vmatprep.subr.mxu0 %v8669_v0 }
 0xe7f   : > { %3616 = vrot.lane.b32.xlu0 %v9401_v19, %s8671_s8  ;;  %7013 = vmatpush3.msra.mxu0 %v3248_v17 }
 0xe80   : > { %7020 = vmatpush3.xpose.msk.msra.mxu1 %vm1980_vm2, %v9401_v19  ;;  %7014 = vmatprep.subr.mxu0 %v8669_v0 }
 0xe81   : > { %7015 = vmatpush3.msra.mxu0 %v3245_v20  ;;  %7024 = vmatprep.subr.mxu1 %v8669_v0 }
 0xe82   : > { %7017 = vmatmul.mubr.f32.vlgmr.msra.gmra.mxu0 %v9254_v58  ;;  %7029 = vmatprep.subr.mxu0 %v8669_v0 }
 0xe83   : > { %7022 = vmatmul.mubr.msk.f32.vlgmr.msra.gmra.mxu1 %vm1980_vm2, %v9409_v11  ;;  %3614 = vrot.lane.b32.xlu0 %v9409_v11, %s8671_s8 }
 0xe84   : > { %7031 = vmatprep.mubr.msk.f32.mxu0 %vm8670_vm0, %v8669_v0  ;;  %7026 = vmatprep.mubr.msk.f32.mxu1 %vm8670_vm0, %v8669_v0 }
 0xef1   : > { %v3617_v12 = vpop.permute.xlu0 %3616 }
 0xef2   : > { %7030 = vmatpush3.xpose.msk.msra.mxu0 %vm1980_vm2, %v3617_v12 }
 0xef3   : > { %7039 = vmatprep.subr.mxu0 %v8669_v0 }
 0xef5   : > { %v3615_v21 = vpop.permute.xlu0 %3614 }
 0xef6   : > { %7032 = vmatmul.mubr.msk.f32.vlgmr.msra.gmra.mxu0 %vm1980_vm2, %v3615_v21 }
 0xef7   : > { %7047 = vmatprep.mubr.msk.f32.mxu0 %vm8670_vm0, %v8669_v0  ;;  %7040 = vmatpush3.msra.mxu0 %v3784_v47 }
 0xef8   : > { %7041 = vmatprep.subr.mxu0 %v8669_v0 }
 0xef9   : > { %7042 = vmatpush3.msra.mxu0 %v3783_v48 }
 0xefa   : > { %7043 = vmatprep.subr.mxu0 %v8669_v0 }
 0xefb   : > { %7044 = vmatpush3.msra.mxu0 %v3782_v49  ;;  %v4344_v49 = vld [vmem:[#allocation26 + $0x78] sm:$0xff] }
 0xefc   : > { %7045 = vmatprep.subr.mxu0 %v8669_v0 }
 0xefd   : > { %7046 = vmatpush3.msra.mxu0 %v3781_v50  ;;  %v4343_v50 = vld [vmem:[#allocation26 + $0x70] sm:$0xff] }
 0xefe   : > { %7061 = vmatprep.subr.mxu0 %v8669_v0 }
 0xf22   : > { %v6690_v22 = vpop.f32.mrf.mxu0 }
 0xf24   : > { %v6691_v23 = vpop.f32.mrf.mxu0 }
 0xf25   : > { %v9427_v24 = vadd.f32 %v6691_v23, %v6690_v22 }
 0xf42   : > { %v3445_v26 = vpop.f32.mrf.mxu0 }
 0xf43   : > { %v9431_v27 = vadd.f32 %v3445_v26, %v3304_v25  ;;  %v3521_v28 = vpop.f32.mrf.mxu1  ;;  %v4100_v26 = vld [vmem:[#allocation26 + $0x58] sm:$0xff] }
 0xf44   : > { %v3525_v29 = vmul.f32 0.17677669, %v3521_v28  ;;  %v7018_v30 = vpop.f32.mrf.mxu0  ;;  %v4099_v28 = vld [vmem:[#allocation26 + $0x50] sm:$0xff] }
 0xf45   : > { %v7023_v31 = vpop.f32.mrf.mxu1  ;;  %7025 = vmatpush3.msra.mxu1 %v9431_v27 }
 0xf46   : > { %v3526_v32 = vsel %vm2058_vm3, %v3525_v29, -inf  ;;  %7034 = vmatprep.subr.mxu1 %v8669_v0 }
 0xf47   : > { %3527 = vmax.xlane.f32.xlu1 %v3526_v32 }
 0xfb6   : > { %v3688_v33 = vpop.f32.mrf.mxu0 }
 0xfb7   : > { %v3692_v34 = vmul.f32 0.17677669, %v3688_v33  ;;  %v4097_v33 = vld [vmem:[#allocation26 + $0x40] sm:$0xff] }
 0xfb8   : > { %v7033_v35 = vpop.f32.mrf.mxu0 }
 0xfb9   : > { %v3693_v61 = vsel %vm2058_vm3, %v3692_v34, -inf }
 0xfba   : > { %3694 = vmax.xlane.f32.xlu0 %v3693_v61 }
 0xfd0   : > { %v3528_v62 = vpop.xlane.xlu1 %3527 }
 0xfd1   : > { %v3529_v36 = vsub.f32 %v3525_v29, %v3528_v62 }
 0xfd3   : > { %v3530_v37 = vmul.f32 1.442695, %v3529_v36 }
 0xfd5   : > { %7601 = vpow2.f32 %v3530_v37 }
 0xfe2   : > { %v7602_v38 = vpop.eup %7601 }
 0xfe3   : > { %v3532_v39 = vsel %vm2058_vm3, %v7602_v38, 0.0 }
 0xfe4   : > { %3533 = vadd.xlane.f32.xlu1 %v3532_v39 }
0x1043   : > { %v3695_v40 = vpop.xlane.xlu0 %3694 }
0x1044   : > { %v3696_v7 = vsub.f32 %v3692_v34, %v3695_v40 }
0x1046   : > { %v3697_v41 = vmul.f32 1.442695, %v3696_v7 }
0x1048   : > { %7603 = vpow2.f32 %v3697_v41 }
0x1055   : > { %v7604_v42 = vpop.eup %7603 }
0x1056   : > { %v3699_v43 = vsel %vm2058_vm3, %v7604_v42, 0.0 }
0x1057   : > { %3700 = vadd.xlane.f32.xlu1 %v3699_v43 }
0x1068   : > { %3705 = vrot.lane.b32.xlu1 %v9431_v27, %s8671_s8 }
0x106c   : > { %3933 = vrot.lane.b32.xlu1 %v9401_v19, %s8672_s0 }
0x106d   : > { %v3534_v44 = vpop.xlane.xlu1 %3533 }
0x106e   : > { %7605 = vrcp.f32 %v3534_v44 }
0x1070   : > { %3931 = vrot.lane.b32.xlu1 %v9409_v11, %s8672_s0 }
0x107b   : > { %v7606_v45 = vpop.eup %7605 }
0x107c   : > { %v3536_v46 = vmul.f32 %v7606_v45, %v7602_v38 }
0x107e   : > { %7027 = vmatmul.mubr.msk.f32.vlgmr.msra.gmra.mxu1 %vm2058_vm3, %v3536_v46  ;;  %v6551_v46 = vld [vmem:[#allocation19] ss:$0 sm:$0xff] }
0x107f   : > { %7036 = vmatprep.mubr.msk.f32.mxu1 %vm8670_vm0, %v8669_v0  ;;  %v3212_v47 = vadd.f32 %v9427_v24, %v6551_v46 }
0x1081   : > { %v3215_v48 = vadd.f32 %v3212_v47, %v9373_v6 }
0x10e0   : > { %v3701_v51 = vpop.xlane.xlu1 %3700 }
0x10e1   : > { %7607 = vrcp.f32 %v3701_v51  ;;  %v4342_v51 = vld [vmem:[#allocation26 + $0x68] sm:$0xff] }
0x10e4   : > { %v3706_v52 = vpop.permute.xlu1 %3705 }
0x10e5   : > { %7035 = vmatpush3.msra.mxu1 %v3706_v52 }
0x10e6   : > { %7050 = vmatprep.subr.mxu1 %v8669_v0 }
0x10e8   : > { %v3934_v2 = vpop.permute.xlu1 %3933 }
0x10ec   : > { %v3932_v9 = vpop.permute.xlu1 %3931 }
0x10ee   : > { %v7608_v53 = vpop.eup %7607 }
0x10ef   : > { %v3703_v54 = vmul.f32 %v7608_v53, %v7604_v42  ;;  %v4341_v53 = vld [vmem:[#allocation26 + $0x60] sm:$0xff] }
0x10f1   : > { %7037 = vmatmul.mubr.msk.f32.vlgmr.msra.gmra.mxu1 %vm2058_vm3, %v3703_v54 }
0x10f2   : > { %7051 = vmatpush3.msra.mxu1 %v3613_v56  ;;  %7058 = vmatprep.mubr.msk.f32.mxu1 %vm8670_vm0, %v8669_v0 }
0x10f3   : > { %7052 = vmatprep.subr.mxu1 %v8669_v0 }
0x10f4   : > { %7053 = vmatpush3.msra.mxu1 %v3612_v57  ;;  %v4579_v57 = vld [vmem:[#allocation35 + $0xf8] sm:$0xff] }
0x10f5   : > { %7054 = vmatprep.subr.mxu1 %v8669_v0 }
0x10f6   : > { %7055 = vmatpush3.msra.mxu1 %v3611_v59  ;;  %v4578_v59 = vld [vmem:[#allocation35 + $0xf0] sm:$0xff] }
0x10f7   : > { %7056 = vmatprep.subr.mxu1 %v8669_v0 }
0x10f8   : > { %7057 = vmatpush3.msra.mxu1 %v3610_v60  ;;  %v4577_v60 = vld [vmem:[#allocation35 + $0xe8] sm:$0xff] }
0x10f9   : > { %7066 = vmatprep.subr.mxu1 %v8669_v0 }
0x113e   : > { %v3606_v63 = vpop.f32.mrf.mxu1 }
0x113f   : > { %7059 = vmatmul.mubr.msk.f32.vlgmr.msra.gmra.mxu1 %vm1980_vm2, %v3606_v63  ;;  %v4576_v63 = vld [vmem:[#allocation35 + $0xe0] sm:$0xff] }
0x1140   : > { %v7028_v55 = vpop.f32.mrf.mxu1  ;;  %7068 = vmatprep.mubr.msk.f32.mxu1 %vm8670_vm0, %v8669_v0 }
0x11b1   : > { %v3777_v5 = vpop.f32.mrf.mxu1 }
0x11b2   : > { %7048 = vmatmul.mubr.msk.f32.vlgmr.msra.gmra.mxu0 %vm1980_vm2, %v3777_v5  ;;  %v6570_v5 = vld [vmem:[#allocation28] ss:$0 sm:$0xff] }
0x11b3   : > { %7062 = vmatpush3.xpose.msk.msra.mxu0 %vm1980_vm2, %v3934_v2  ;;  %v7038_v8 = vpop.f32.mrf.mxu1  ;;  %7063 = vmatprep.mubr.msk.f32.mxu0 %vm8670_vm0, %v8669_v0 }
0x11b4   : > { %7071 = vmatprep.subr.mxu0 %v8669_v0 }
0x11b6   : > { %7064 = vmatmul.mubr.msk.f32.vlgmr.msra.gmra.mxu0 %vm1980_vm2, %v3932_v9 }
0x11b7   : > { %7079 = vmatprep.mubr.msk.f32.mxu0 %vm8670_vm0, %v8669_v0  ;;  %7072 = vmatpush3.msra.mxu0 %v4100_v26  ;;  %v4565_v26 = vld [vmem:[#allocation35 + $0x88] sm:$0xff] }
0x11b8   : > { %7073 = vmatprep.subr.mxu0 %v8669_v0 }
0x11b9   : > { %7074 = vmatpush3.msra.mxu0 %v4099_v28  ;;  %v4564_v28 = vld [vmem:[#allocation35 + $0x80] sm:$0xff] }
0x11ba   : > { %7075 = vmatprep.subr.mxu0 %v8669_v0 }
0x11ff   : > { %v9471_v10 = vpop.f32.mrf.mxu1 }
0x1201   : > { %v7060_v13 = vpop.f32.mrf.mxu1 }
0x1272   : > { %v3854_v14 = vpop.f32.mrf.mxu0 }
0x1273   : > { %v3928_v42 = vadd.f32 %v9471_v10, %v3854_v14 }
0x1274   : > { %v7049_v15 = vpop.f32.mrf.mxu0 }
0x1276   : > { %v4005_v16 = vpop.f32.mrf.mxu0 }
0x1277   : > { %v4009_v4 = vmul.f32 0.17677669, %v4005_v16 }
0x1278   : > { %v7065_v17 = vpop.f32.mrf.mxu0 }
0x1279   : > { %v4010_v18 = vsel %vm2058_vm3, %v4009_v4, -inf  ;;  %v4574_v17 = vld [vmem:[#allocation35 + $0xd0] sm:$0xff] }
0x127a   : > { %4011 = vmax.xlane.f32.xlu0 %v4010_v18  ;;  %v4573_v18 = vld [vmem:[#allocation35 + $0xc8] sm:$0xff] }
0x1290   : > { %4021 = vrot.lane.b32.xlu0 %v9431_v27, %s8672_s0 }
0x1294   : > { %4177 = vrot.lane.b32.xlu0 %v9401_v19, %s8673_s16  ;;  %v4098_v19 = vld [vmem:[#allocation26 + $0x48] sm:$0xff] }
0x1295   : > { %7076 = vmatpush3.msra.mxu0 %v4098_v19  ;;  %v4563_v19 = vld [vmem:[#allocation35 + $0x78] sm:$0xff] }
0x1296   : > { %7077 = vmatprep.subr.mxu0 %v8669_v0 }
0x1297   : > { %7078 = vmatpush3.msra.mxu0 %v4097_v33  ;;  %v4557_v33 = vld [vmem:[#allocation35 + $0x48] sm:$0xff] }
0x1298   : > { %4175 = vrot.lane.b32.xlu0 %v9409_v11, %s8673_s16  ;;  %7092 = vmatprep.subr.mxu0 %v8669_v0 }
0x1303   : > { %v4012_v20 = vpop.xlane.xlu0 %4011 }
0x1304   : > { %v4013_v12 = vsub.f32 %v4009_v4, %v4012_v20  ;;  %v4575_v4 = vld [vmem:[#allocation35 + $0xd8] sm:$0xff]  ;;  %v4572_v20 = vld [vmem:[#allocation35 + $0xc0] sm:$0xff] }
0x1306   : > { %v4014_v21 = vmul.f32 1.442695, %v4013_v12  ;;  %v4571_v12 = vld [vmem:[#allocation35 + $0xb8] sm:$0xff] }
0x1307   : > { %v4022_v22 = vpop.permute.xlu0 %4021 }
0x1308   : > { %7609 = vpow2.f32 %v4014_v21  ;;  %7067 = vmatpush3.msra.mxu1 %v4022_v22  ;;  %v4570_v21 = vld [vmem:[#allocation35 + $0xb0] sm:$0xff]  ;;  %v4568_v22 = vld [vmem:[#allocation35 + $0xa0] sm:$0xff] }
0x1309   : > { %7082 = vmatprep.subr.mxu1 %v8669_v0 }
0x130b   : > { %v4178_v30 = vpop.permute.xlu0 %4177 }
0x130f   : > { %v4176_v32 = vpop.permute.xlu0 %4175 }
0x1315   : > { %v7610_v23 = vpop.eup %7609 }
0x1316   : > { %v4016_v25 = vsel %vm2058_vm3, %v7610_v23, 0.0 }
0x1317   : > { %4017 = vadd.xlane.f32.xlu1 %v4016_v25  ;;  %v4566_v25 = vld [vmem:[#allocation35 + $0x90] sm:$0xff] }
0x13a0   : > { %v4018_v11 = vpop.xlane.xlu1 %4017 }
0x13a1   : > { %7611 = vrcp.f32 %v4018_v11  ;;  %v4562_v11 = vld [vmem:[#allocation35 + $0x70] sm:$0xff] }
0x13ae   : > { %v7612_v29 = vpop.eup %7611 }
0x13af   : > { %v4020_v31 = vmul.f32 %v7612_v29, %v7610_v23  ;;  %v4567_v23 = vld [vmem:[#allocation35 + $0x98] sm:$0xff]  ;;  %v4561_v29 = vld [vmem:[#allocation35 + $0x68] sm:$0xff] }
0x13b1   : > { %7069 = vmatmul.mubr.msk.f32.vlgmr.msra.gmra.mxu1 %vm2058_vm3, %v4020_v31  ;;  %v4559_v31 = vld [vmem:[#allocation35 + $0x58] sm:$0xff] }
0x13b2   : > { %7083 = vmatpush3.xpose.msk.msra.mxu1 %vm1980_vm2, %v4178_v30  ;;  %7084 = vmatprep.mubr.msk.f32.mxu1 %vm8670_vm0, %v8669_v0  ;;  %v4560_v30 = vld [vmem:[#allocation35 + $0x60] sm:$0xff] }
0x13b3   : > { %7087 = vmatprep.subr.mxu1 %v8669_v0 }
0x13b5   : > { %7085 = vmatmul.mubr.msk.f32.vlgmr.msra.gmra.mxu1 %vm1980_vm2, %v4176_v32  ;;  %v4558_v32 = vld [vmem:[#allocation35 + $0x50] sm:$0xff] }
0x13b6   : > { %7089 = vmatprep.mubr.msk.f32.mxu1 %vm8670_vm0, %v8669_v0 }
0x1471   : > { %v4093_v34 = vpop.f32.mrf.mxu1 }
0x1472   : > { %7080 = vmatmul.mubr.msk.f32.vlgmr.msra.gmra.mxu0 %vm1980_vm2, %v4093_v34  ;;  %v4556_v34 = vld [vmem:[#allocation35 + $0x40] sm:$0xff] }
0x1473   : > { %v7070_v35 = vpop.f32.mrf.mxu1  ;;  %7100 = vmatprep.mubr.msk.f32.mxu0 %vm8670_vm0, %v8669_v0  ;;  %7093 = vmatpush3.msra.mxu0 %v4344_v49 }
0x1474   : > { %7094 = vmatprep.subr.mxu0 %v8669_v0  ;;  %v4555_v35 = vld [vmem:[#allocation35 + $0x38] sm:$0xff] }
0x1475   : > { %v4249_v61 = vpop.f32.mrf.mxu1  ;;  %7095 = vmatpush3.msra.mxu0 %v4343_v50 }
0x1476   : > { %v4253_v62 = vmul.f32 0.17677669, %v4249_v61  ;;  %7096 = vmatprep.subr.mxu0 %v8669_v0  ;;  %v4554_v61 = vld [vmem:[#allocation35 + $0x30] sm:$0xff] }
0x1477   : > { %v7086_v36 = vpop.f32.mrf.mxu1  ;;  %7097 = vmatpush3.msra.mxu0 %v4342_v51  ;;  %v4466_v51 = vld [vmem:[#allocation32 + $0x58] sm:$0xff] }
0x1478   : > { %v4254_v37 = vsel %vm2058_vm3, %v4253_v62, -inf  ;;  %7098 = vmatprep.subr.mxu0 %v8669_v0  ;;  %v4552_v36 = vld [vmem:[#allocation35 + $0x20] sm:$0xff] }
0x1479   : > { %4255 = vmax.xlane.f32.xlu0 %v4254_v37  ;;  %7099 = vmatpush3.msra.mxu0 %v4341_v53  ;;  %v4551_v37 = vld [vmem:[#allocation35 + $0x18] sm:$0xff] }
0x147a   : > { %4592 = vmatprep.subr.mxu0 %v4579_v57  ;;  %v4463_v53 = vld [vmem:[#allocation32 + $0x40] sm:$0xff]  ;;  %v4462_v57 = vld [vmem:[#allocation32 + $0x38] sm:$0xff] }
0x1502   : > { %v4256_v38 = vpop.xlane.xlu0 %4255 }
0x1503   : > { %v4257_v39 = vsub.f32 %v4253_v62, %v4256_v38  ;;  %v4553_v62 = vld [vmem:[#allocation35 + $0x28] sm:$0xff]  ;;  %v4550_v38 = vld [vmem:[#allocation35 + $0x10] sm:$0xff] }
0x1505   : > { %v4258_v40 = vmul.f32 1.442695, %v4257_v39  ;;  %v4549_v39 = vld [vmem:[#allocation35 + $0x8] sm:$0xff] }
0x1507   : > { %7613 = vpow2.f32 %v4258_v40  ;;  %v4548_v40 = vld [vmem:[#allocation35] sm:$0xff] }
0x1514   : > { %v7614_v7 = vpop.eup %7613 }
0x1515   : > { %v4260_v41 = vsel %vm2058_vm3, %v7614_v7, 0.0 }
0x1516   : > { %4261 = vadd.xlane.f32.xlu1 %v4260_v41  ;;  %v4469_v41 = vld [vmem:[#allocation32 + $0x70] sm:$0xff] }
0x1527   : > { %4265 = vrot.lane.b32.xlu1 %v9431_v27, %s8673_s16 }
0x1532   : > { %v4170_v43 = vpop.f32.mrf.mxu0 }
0x1533   : > { %v4174_v44 = vadd.f32 %v4170_v43, %v3928_v42  ;;  %v4468_v42 = vld [vmem:[#allocation32 + $0x68] sm:$0xff]  ;;  %v4467_v43 = vld [vmem:[#allocation32 + $0x60] sm:$0xff] }
0x1534   : > { %v7081_v45 = vpop.f32.mrf.mxu0 }
0x154b   : > { %3216 = vadd.xlane.f32.xlu1 %v3215_v48 }
0x159f   : > { %v4262_v27 = vpop.xlane.xlu1 %4261 }
0x15a0   : > { %7615 = vrcp.f32 %v4262_v27  ;;  %v4465_v27 = vld [vmem:[#allocation32 + $0x50] sm:$0xff] }
0x15a3   : > { %v4266_v52 = vpop.permute.xlu1 %4265 }
0x15a4   : > { %7088 = vmatpush3.msra.mxu1 %v4266_v52  ;;  %v4464_v52 = vld [vmem:[#allocation32 + $0x48] sm:$0xff] }
0x15a5   : > { %7103 = vmatprep.subr.mxu1 %v8669_v0 }
0x15ad   : > { %v7616_v6 = vpop.eup %7615 }
0x15ae   : > { %v4264_v24 = vmul.f32 %v7616_v6, %v7614_v7  ;;  %v4470_v7 = vld [vmem:[#allocation32 + $0x78] sm:$0xff] }
0x15b0   : > { %7090 = vmatmul.mubr.msk.f32.vlgmr.msra.gmra.mxu1 %vm2058_vm3, %v4264_v24  ;;  %v6552_v24 = vld [vmem:[#allocation20] ss:$0 sm:$0xff] }
0x15b1   : > { %7135 = vmatprep.mubr.msk.f32.mxu1 %vm8670_vm0, %v8669_v0  ;;  %7104 = vmatpush3.msra.mxu1 %v4470_v7 }
0x15b2   : > { %7105 = vmatprep.subr.mxu1 %v8669_v0 }
0x15b3   : > { %7106 = vmatpush3.msra.mxu1 %v4469_v41 }
0x15b4   : > { %7107 = vmatprep.subr.mxu1 %v8669_v0 }
0x15b5   : > { %7108 = vmatpush3.msra.mxu1 %v4468_v42 }
0x15b6   : > { %7109 = vmatprep.subr.mxu1 %v8669_v0 }
0x15b7   : > { %7110 = vmatpush3.msra.mxu1 %v4467_v43 }
0x15b8   : > { %7111 = vmatprep.subr.mxu1 %v8669_v0 }
0x15b9   : > { %7112 = vmatpush3.msra.mxu1 %v4466_v51  ;;  %v4998_v51 = vld [vmem:[#allocation38 + $0x38] sm:$0xff] }
0x15ba   : > { %7113 = vmatprep.subr.mxu1 %v8669_v0 }
0x15bb   : > { %7114 = vmatpush3.msra.mxu1 %v4465_v27  ;;  %v4997_v27 = vld [vmem:[#allocation38 + $0x30] sm:$0xff] }
0x15bc   : > { %7115 = vmatprep.subr.mxu1 %v8669_v0 }
0x15bd   : > { %7116 = vmatpush3.msra.mxu1 %v4464_v52  ;;  %v4996_v52 = vld [vmem:[#allocation38 + $0x28] sm:$0xff] }
0x15be   : > { %7117 = vmatprep.subr.mxu1 %v8669_v0 }
0x15bf   : > { %7118 = vmatpush3.msra.mxu1 %v4463_v53 }
0x15c0   : > { %7119 = vmatprep.subr.mxu1 %v8669_v0 }
0x15c1   : > { %7120 = vmatpush3.msra.mxu1 %v4462_v57  ;;  %v4827_v57 = vld [vmem:[#allocation38 + $0x18] sm:$0xff] }
0x15c2   : > { %7121 = vmatprep.subr.mxu1 %v8669_v0 }
0x15d4   : > { %v3217_v55 = vpop.xlane.xlu1 %3216 }
0x15d5   : > { %v3218_v8 = vmul.f32 0.0078125, %v3217_v55  ;;  %v4460_v55 = vld [vmem:[#allocation32 + $0x28] sm:$0xff] }
0x15d7   : > { %v9513_v14 = vsub.f32 %v3215_v48, %v3218_v8  ;;  %v4457_v8 = vld [vmem:[#allocation32 + $0x10] sm:$0xff] }
0x15d9   : > { %v3220_v16 = vmul.f32 %v9513_v14, %v9513_v14 }
0x1670   : > { %v4337_v54 = vpop.f32.mrf.mxu1 }
0x1671   : > { %7101 = vmatmul.mubr.msk.f32.vlgmr.msra.gmra.mxu0 %vm1980_vm2, %v4337_v54 }
0x1672   : > { %v7091_v56 = vpop.f32.mrf.mxu1  ;;  %4656 = vmatprep.mubr.f32.mxu0 %v8669_v0  ;;  %4593 = vmatpush1.msra.mxu0 %v4578_v59 }
0x1673   : > { %4594 = vmatprep.subr.mxu0 %v4577_v60  ;;  %v6553_v56 = vld [vmem:[#allocation22] ss:$0 sm:$0xff] }
0x1674   : > { %4595 = vmatpush1.msra.mxu0 %v4576_v63  ;;  %v4461_v60 = vld [vmem:[#allocation32 + $0x30] sm:$0xff] }
0x1675   : > { %4596 = vmatprep.subr.mxu0 %v4575_v4  ;;  %7122 = vmatpush3.msra.mxu1 %v4461_v60  ;;  %v6571_v4 = vld [vmem:[#allocation29] ss:$0 sm:$0xff]  ;;  %v4825_v60 = vld [vmem:[#allocation38 + $0x8] sm:$0xff] }
0x1676   : > { %4597 = vmatpush1.msra.mxu0 %v4574_v17  ;;  %7123 = vmatprep.subr.mxu1 %v8669_v0 }
0x1677   : > { %4598 = vmatprep.subr.mxu0 %v4573_v18  ;;  %7124 = vmatpush3.msra.mxu1 %v4460_v55  ;;  %v6572_v18 = vld [vmem:[#allocation31] ss:$0 sm:$0xff] }
0x1678   : > { %4599 = vmatpush1.msra.mxu0 %v4572_v20  ;;  %7125 = vmatprep.subr.mxu1 %v8669_v0 }
0x1679   : > { %4600 = vmatprep.subr.mxu0 %v4571_v12 }
0x167a   : > { %4601 = vmatpush1.msra.mxu0 %v4570_v21  ;;  %v4580_v21 = vld [vmem:[#allocation37] sm:$0x3] }
0x1731   : > { %v4414_v2 = vpop.f32.mrf.mxu0 }
0x1732   : > { %v4418_v9 = vadd.f32 %v4414_v2, %v4174_v44  ;;  %v4459_v2 = vld [vmem:[#allocation32 + $0x20] sm:$0xff] }
0x1733   : > { %v7102_v10 = vpop.f32.mrf.mxu0  ;;  %7126 = vmatpush3.msra.mxu1 %v4459_v2 }
0x1734   : > { %v4426_v13 = vadd.f32 %v6570_v5, %v4418_v9  ;;  %v4458_v5 = vld [vmem:[#allocation32 + $0x18] sm:$0xff]  ;;  %7127 = vmatprep.subr.mxu1 %v8669_v0  ;;  %v4456_v9 = vld [vmem:[#allocation32 + $0x8] sm:$0xff]  ;;  %v4455_v10 = vld [vmem:[#allocation32] sm:$0xff] }
0x1735   : > { %7128 = vmatpush3.msra.mxu1 %v4458_v5 }
0x1736   : > { %v9516_v15 = vadd.f32 %v4426_v13, %v9254_v58  ;;  %v4569_v58 = vld [vmem:[#allocation35 + $0xa8] sm:$0xff]  ;;  %7129 = vmatprep.subr.mxu1 %v8669_v0 }
0x1737   : > { %4602 = vmatprep.subr.mxu0 %v4569_v58  ;;  %7130 = vmatpush3.msra.mxu1 %v4457_v8  ;;  %v4585_v58 = vrot.slane %v4580_v21, %v9266_v3 }
0x1738   : > { %4428 = vadd.xlane.f32.xlu0 %v9516_v15  ;;  %4603 = vmatpush1.msra.mxu0 %v4568_v22 }
0x1739   : > { %4604 = vmatprep.subr.mxu0 %v4567_v23  ;;  %7131 = vmatprep.subr.mxu1 %v8669_v0 }
0x173a   : > { %4605 = vmatpush1.msra.mxu0 %v4566_v25  ;;  %7132 = vmatpush3.msra.mxu1 %v4456_v9 }
0x173b   : > { %4606 = vmatprep.subr.mxu0 %v4565_v26  ;;  %7133 = vmatprep.subr.mxu1 %v8669_v0  ;;  %v4589_v26 = vrot.slane %v4580_v21, %v9261_v1 }
0x173c   : > { %3221 = vadd.xlane.f32.xlu0 %v3220_v16  ;;  %4607 = vmatpush1.msra.mxu0 %v4564_v28  ;;  %v6573_v28 = vld [vmem:[#allocation34] ss:$0 sm:$0xff] }
0x173d   : > { %4608 = vmatprep.subr.mxu0 %v4563_v19  ;;  %7134 = vmatpush3.msra.mxu1 %v4455_v10 }
0x173e   : > { %4609 = vmatpush1.msra.mxu0 %v4562_v11  ;;  %7138 = vmatprep.subr.mxu1 %v8669_v0 }
0x173f   : > { %4610 = vmatprep.subr.mxu0 %v4561_v29 }
0x1740   : > { %4611 = vmatpush1.msra.mxu0 %v4560_v30 }
0x1741   : > { %4612 = vmatprep.subr.mxu0 %v4559_v31 }
0x1742   : > { %4613 = vmatpush1.msra.mxu0 %v4558_v32 }
0x1743   : > { %4614 = vmatprep.subr.mxu0 %v4557_v33 }
0x1744   : > { %4615 = vmatpush1.msra.mxu0 %v4556_v34 }
0x1745   : > { %4616 = vmatprep.subr.mxu0 %v4555_v35 }
0x1746   : > { %4617 = vmatpush1.msra.mxu0 %v4554_v61 }
0x1747   : > { %4618 = vmatprep.subr.mxu0 %v4553_v62 }
0x1748   : > { %4619 = vmatpush1.msra.mxu0 %v4552_v36 }
0x1749   : > { %4620 = vmatprep.subr.mxu0 %v4551_v37 }
0x174a   : > { %4621 = vmatpush1.msra.mxu0 %v4550_v38 }
0x174b   : > { %4622 = vmatprep.subr.mxu0 %v4549_v39 }
0x174c   : > { %4623 = vmatpush1.msra.mxu0 %v4548_v40 }
0x174d   : > { %7148 = vmatprep.subr.mxu0 %v8669_v0 }
0x17c1   : > { %v4429_v44 = vpop.xlane.xlu0 %4428 }
0x17c2   : > { %v4430_v45 = vmul.f32 0.0078125, %v4429_v44 }
0x17c4   : > { %v4431_v46 = vsub.f32 %v9516_v15, %v4430_v45 }
0x17c5   : > { %v3222_v47 = vpop.xlane.xlu0 %3221 }
0x17c6   : > { %v3223_v48 = vmul.f32 0.0078125, %v3222_v47  ;;  %v4432_v49 = vmul.f32 %v4431_v46, %v4431_v46 }
0x17c8   : > { %v3224_v50 = vadd.f32 1e-05, %v3223_v48  ;;  %4433 = vadd.xlane.f32.xlu0 %v4432_v49 }
0x17ca   : > { %7617 = vrsqrt.f32 %v3224_v50 }
0x17d7   : > { %v7618_v6 = vpop.eup %7617 }
0x17d8   : > { %v3226_v54 = vmul.f32 %v7618_v6, %v9513_v14  ;;  %v4995_v6 = vld [vmem:[#allocation38 + $0x20] sm:$0xff] }
0x17da   : > { %v3234_v59 = vmul.f32 %v6552_v24, %v3226_v54 }
0x17dc   : > { %v3242_v63 = vadd.f32 %v6553_v56, %v3234_v59  ;;  %v4826_v59 = vld [vmem:[#allocation38 + $0x10] sm:$0xff] }
0x17de   : > { %4657 = vmatmul.mubr.f32.vlgmr.msra.gmra.mxu0 %v3242_v63  ;;  %v4824_v63 = vld [vmem:[#allocation38] sm:$0xff] }
0x17df   : > { %7150 = vmatprep.mubr.msk.f32.mxu0 %vm8670_vm0, %v8669_v0 }
0x1851   : > { %v4434_v13 = vpop.xlane.xlu0 %4433 }
0x1852   : > { %v4435_v14 = vmul.f32 0.0078125, %v4434_v13 }
0x1854   : > { %v4436_v15 = vadd.f32 1e-05, %v4435_v14 }
0x1856   : > { %7619 = vrsqrt.f32 %v4436_v15 }
0x1863   : > { %v7620_v16 = vpop.eup %7619 }
0x1864   : > { %v4438_v17 = vmul.f32 %v7620_v16, %v4431_v46 }
0x1866   : > { %v4446_v20 = vmul.f32 %v6571_v4, %v4438_v17 }
0x1868   : > { %v9542_v12 = vadd.f32 %v6572_v18, %v4446_v20 }
0x186a   : > { %7136 = vmatmul.mubr.f32.vlgmr.msra.gmra.mxu1 %v9542_v12 }
0x186b   : > { %7140 = vmatprep.mubr.msk.f32.mxu1 %vm8670_vm0, %v8669_v0 }
0x189e   : > { %v4658_v22 = vpop.f32.mrf.mxu0 }
0x189f   : > { %v9548_v23 = vadd.f32 %v4658_v22, %v4585_v58 }
0x18a0   : > { %v4660_v19 = vpop.f32.mrf.mxu0 }
0x18a1   : > { %4830 = vrot.lane.b32.xlu0 %v9548_v23, %s8671_s8  ;;  %7139 = vmatpush3.xpose.msk.msra.mxu1 %vm1980_vm2, %v9548_v23  ;;  %v9560_v30 = vadd.f32 %v4660_v19, %v4589_v26  ;;  %v5314_v19 = vld [vmem:[#allocation38 + $0x58] sm:$0xff] }
0x18a2   : > { %7143 = vmatprep.subr.mxu1 %v8669_v0 }
0x1913   : > { %v4831_v25 = vpop.permute.xlu0 %4830 }
0x1914   : > { %7149 = vmatpush3.xpose.msk.msra.mxu0 %vm1980_vm2, %v4831_v25 }
0x1915   : > { %7158 = vmatprep.subr.mxu0 %v8669_v0 }
0x192a   : > { %v4544_v11 = vpop.f32.mrf.mxu1 }
0x192b   : > { %v9558_v29 = vadd.f32 %v6573_v28, %v4544_v11  ;;  %v5313_v11 = vld [vmem:[#allocation38 + $0x50] sm:$0xff] }
0x192c   : > { %v7137_v31 = vpop.f32.mrf.mxu1 }
0x192d   : > { %4828 = vrot.lane.b32.xlu1 %v9558_v29, %s8671_s8  ;;  %7141 = vmatmul.mubr.msk.f32.vlgmr.msra.gmra.mxu1 %vm1980_vm2, %v9558_v29 }
0x192e   : > { %7144 = vmatpush3.msra.mxu1 %v9560_v30  ;;  %7145 = vmatprep.mubr.msk.f32.mxu1 %vm8670_vm0, %v8669_v0 }
0x192f   : > { %7153 = vmatprep.subr.mxu1 %v8669_v0 }
0x199f   : > { %v4829_v32 = vpop.permute.xlu1 %4828 }
0x19a0   : > { %7151 = vmatmul.mubr.msk.f32.vlgmr.msra.gmra.mxu0 %vm1980_vm2, %v4829_v32 }
0x19a1   : > { %7166 = vmatprep.mubr.msk.f32.mxu0 %vm8670_vm0, %v8669_v0  ;;  %7159 = vmatpush3.msra.mxu0 %v4998_v51 }
0x19a2   : > { %7160 = vmatprep.subr.mxu0 %v8669_v0 }
0x19a3   : > { %7161 = vmatpush3.msra.mxu0 %v4997_v27 }
0x19a4   : > { %7162 = vmatprep.subr.mxu0 %v8669_v0 }
0x19a5   : > { %7163 = vmatpush3.msra.mxu0 %v4996_v52 }
0x19a6   : > { %7164 = vmatprep.subr.mxu0 %v8669_v0 }
0x19a7   : > { %7165 = vmatpush3.msra.mxu0 %v4995_v6  ;;  %v5555_v6 = vld [vmem:[#allocation38 + $0x60] sm:$0xff] }
0x19a8   : > { %7180 = vmatprep.subr.mxu0 %v8669_v0 }
0x19ed   : > { %v4735_v33 = vpop.f32.mrf.mxu1 }
0x19ee   : > { %v4739_v34 = vmul.f32 0.17677669, %v4735_v33 }
0x19ef   : > { %v7142_v35 = vpop.f32.mrf.mxu1 }
0x19f0   : > { %v4740_v61 = vsel %vm2058_vm3, %v4739_v34, -inf  ;;  %v5311_v35 = vld [vmem:[#allocation38 + $0x40] sm:$0xff] }
0x19f1   : > { %4741 = vmax.xlane.f32.xlu0 %v4740_v61 }
0x1a60   : > { %v4902_v62 = vpop.f32.mrf.mxu0 }
0x1a61   : > { %v4906_v36 = vmul.f32 0.17677669, %v4902_v62 }
0x1a62   : > { %v7152_v37 = vpop.f32.mrf.mxu0 }
0x1a63   : > { %v4907_v38 = vsel %vm2058_vm3, %v4906_v36, -inf }
0x1a64   : > { %4908 = vmax.xlane.f32.xlu1 %v4907_v38 }
0x1a75   : > { %5147 = vrot.lane.b32.xlu1 %v9548_v23, %s8672_s0 }
0x1a7a   : > { %v4742_v39 = vpop.xlane.xlu0 %4741 }
0x1a7b   : > { %v4743_v40 = vsub.f32 %v4739_v34, %v4742_v39 }
0x1a7d   : > { %v4744_v7 = vmul.f32 1.442695, %v4743_v40 }
0x1a7f   : > { %7621 = vpow2.f32 %v4744_v7 }
0x1a8c   : > { %v7622_v41 = vpop.eup %7621 }
0x1a8d   : > { %v4746_v42 = vsel %vm2058_vm3, %v7622_v41, 0.0 }
0x1a8e   : > { %4747 = vadd.xlane.f32.xlu0 %v4746_v42 }
0x1aed   : > { %v4909_v43 = vpop.xlane.xlu1 %4908 }
0x1aee   : > { %v4910_v44 = vsub.f32 %v4906_v36, %v4909_v43 }
0x1af0   : > { %v4911_v45 = vmul.f32 1.442695, %v4910_v44  ;;  %v5558_v44 = vld [vmem:[#allocation38 + $0x78] sm:$0xff] }
0x1af1   : > { %v5148_v8 = vpop.permute.xlu1 %5147 }
0x1af2   : > { %7623 = vpow2.f32 %v4911_v45  ;;  %v5557_v45 = vld [vmem:[#allocation38 + $0x70] sm:$0xff] }
0x1aff   : > { %v7624_v46 = vpop.eup %7623 }
0x1b00   : > { %v4913_v47 = vsel %vm2058_vm3, %v7624_v46, 0.0 }
0x1b01   : > { %4914 = vadd.xlane.f32.xlu0 %v4913_v47 }
0x1b17   : > { %4919 = vrot.lane.b32.xlu0 %v9560_v30, %s8671_s8  ;;  %v4748_v48 = vpop.xlane.xlu0 %4747  ;;  %s8463_s8 = scalar_lea.vmem %s8462_s17, 32 }
0x1b18   : > { %7625 = vrcp.f32 %v4748_v48  ;;  %v5556_v48 = vld [vmem:[#allocation38 + $0x68] sm:$0xff]  ;;  %p8465_p2 = scmp.lt.s32.totalorder %s8463_s8, %s8457_s10 }
0x1b1a   : > { %p8466_p3 = por %p8465_p2, %p8464_p1 }
0x1b1b   : > { %5145 = vrot.lane.b32.xlu0 %v9558_v29, %s8672_s0 }
0x1b1c   : > { %p8467_p6 = pnand %p8466_p3, %p8460_p0 }
0x1b25   : > { %v7626_v49 = vpop.eup %7625 }
0x1b26   : > { %v4750_v50 = vmul.f32 %v7626_v49, %v7622_v41 }
0x1b28   : > { %7146 = vmatmul.mubr.msk.f32.vlgmr.msra.gmra.mxu1 %vm2058_vm3, %v4750_v50 }
0x1b29   : > { %7155 = vmatprep.mubr.msk.f32.mxu1 %vm8670_vm0, %v8669_v0 }
0x1b8a   : > { %v4915_v24 = vpop.xlane.xlu0 %4914 }
0x1b8b   : > { %7627 = vrcp.f32 %v4915_v24 }
0x1b8e   : > { %v4920_v53 = vpop.permute.xlu0 %4919 }
0x1b8f   : > { %7154 = vmatpush3.msra.mxu1 %v4920_v53 }
0x1b90   : > { %7169 = vmatprep.subr.mxu1 %v8669_v0 }
0x1b92   : > { %v5146_v10 = vpop.permute.xlu0 %5145 }
0x1b98   : > { %v7628_v54 = vpop.eup %7627 }
0x1b99   : > { %v4917_v56 = vmul.f32 %v7628_v54, %v7624_v46 }
0x1b9b   : > { %7156 = vmatmul.mubr.msk.f32.vlgmr.msra.gmra.mxu1 %vm2058_vm3, %v4917_v56  ;;  %v6590_v56 = vld [vmem:[#allocation40] ss:$0 sm:$0xff] }
0x1b9c   : > { %7170 = vmatpush3.msra.mxu1 %v4827_v57  ;;  %7177 = vmatprep.mubr.msk.f32.mxu1 %vm8670_vm0, %v8669_v0 }
0x1b9d   : > { %7171 = vmatprep.subr.mxu1 %v8669_v0 }
0x1b9e   : > { %7172 = vmatpush3.msra.mxu1 %v4826_v59 }
0x1b9f   : > { %7173 = vmatprep.subr.mxu1 %v8669_v0 }
0x1ba0   : > { %7174 = vmatpush3.msra.mxu1 %v4825_v60 }
0x1ba1   : > { %7175 = vmatprep.subr.mxu1 %v8669_v0 }
0x1ba2   : > { %7176 = vmatpush3.msra.mxu1 %v4824_v63 }
0x1ba3   : > { %7185 = vmatprep.subr.mxu1 %v8669_v0 }
0x1be8   : > { %v4820_v55 = vpop.f32.mrf.mxu1 }
0x1be9   : > { %7178 = vmatmul.mubr.msk.f32.vlgmr.msra.gmra.mxu1 %vm1980_vm2, %v4820_v55  ;;  %v5700_v55 = vld [vmem:[#allocation44 + $0xf8] sm:$0xff] }
0x1bea   : > { %v7147_v2 = vpop.f32.mrf.mxu1  ;;  %7187 = vmatprep.mubr.msk.f32.mxu1 %vm8670_vm0, %v8669_v0 }
0x1beb   : > { %v5699_v2 = vld [vmem:[#allocation44 + $0xf0] sm:$0xff] }
0x1c5b   : > { %v4991_v5 = vpop.f32.mrf.mxu1 }
0x1c5c   : > { %7167 = vmatmul.mubr.msk.f32.vlgmr.msra.gmra.mxu0 %vm1980_vm2, %v4991_v5  ;;  %v5698_v5 = vld [vmem:[#allocation44 + $0xe8] sm:$0xff] }
0x1c5d   : > { %7181 = vmatpush3.xpose.msk.msra.mxu0 %vm1980_vm2, %v5148_v8  ;;  %v7157_v9 = vpop.f32.mrf.mxu1  ;;  %7182 = vmatprep.mubr.msk.f32.mxu0 %vm8670_vm0, %v8669_v0  ;;  %v5697_v8 = vld [vmem:[#allocation44 + $0xe0] sm:$0xff] }
0x1c5e   : > { %7190 = vmatprep.subr.mxu0 %v8669_v0  ;;  %v5696_v9 = vld [vmem:[#allocation44 + $0xd8] sm:$0xff] }
0x1c60   : > { %7183 = vmatmul.mubr.msk.f32.vlgmr.msra.gmra.mxu0 %vm1980_vm2, %v5146_v10  ;;  %v5695_v10 = vld [vmem:[#allocation44 + $0xd0] sm:$0xff] }
0x1c61   : > { %7198 = vmatprep.mubr.msk.f32.mxu0 %vm8670_vm0, %v8669_v0  ;;  %7191 = vmatpush3.msra.mxu0 %v5314_v19  ;;  %v5683_v19 = vld [vmem:[#allocation44 + $0x70] sm:$0xff] }
0x1c62   : > { %7192 = vmatprep.subr.mxu0 %v8669_v0 }
0x1c63   : > { %7193 = vmatpush3.msra.mxu0 %v5313_v11  ;;  %v5682_v11 = vld [vmem:[#allocation44 + $0x68] sm:$0xff] }
0x1c64   : > { %7194 = vmatprep.subr.mxu0 %v8669_v0 }
0x1ca9   : > { %v9609_v13 = vpop.f32.mrf.mxu1 }
0x1cab   : > { %v7179_v14 = vpop.f32.mrf.mxu1 }
0x1cac   : > { %v5693_v14 = vld [vmem:[#allocation44 + $0xc0] sm:$0xff] }
0x1d1c   : > { %v9611_v15 = vpop.f32.mrf.mxu0 }
0x1d1d   : > { %v5142_v46 = vadd.f32 %v9609_v13, %v9611_v15  ;;  %v5694_v13 = vld [vmem:[#allocation44 + $0xc8] sm:$0xff] }
0x1d1e   : > { %v7168_v16 = vpop.f32.mrf.mxu0 }
0x1d20   : > { %v5219_v4 = vpop.f32.mrf.mxu0 }
0x1d21   : > { %v5223_v17 = vmul.f32 0.17677669, %v5219_v4 }
0x1d22   : > { %v7184_v18 = vpop.f32.mrf.mxu0 }
0x1d23   : > { %v5224_v20 = vsel %vm2058_vm3, %v5223_v17, -inf  ;;  %v5691_v18 = vld [vmem:[#allocation44 + $0xb0] sm:$0xff] }
0x1d24   : > { %5225 = vmax.xlane.f32.xlu0 %v5224_v20  ;;  %v5690_v20 = vld [vmem:[#allocation44 + $0xa8] sm:$0xff] }
0x1d3a   : > { %5235 = vrot.lane.b32.xlu0 %v9560_v30, %s8672_s0 }
0x1d3e   : > { %5389 = vrot.lane.b32.xlu0 %v9558_v29, %s8673_s16  ;;  %v5312_v29 = vld [vmem:[#allocation38 + $0x48] sm:$0xff] }
0x1d3f   : > { %7195 = vmatpush3.msra.mxu0 %v5312_v29  ;;  %v5681_v29 = vld [vmem:[#allocation44 + $0x60] sm:$0xff] }
0x1d40   : > { %7196 = vmatprep.subr.mxu0 %v8669_v0 }
0x1d41   : > { %7197 = vmatpush3.msra.mxu0 %v5311_v35  ;;  %v5675_v35 = vld [vmem:[#allocation44 + $0x30] sm:$0xff] }
0x1d42   : > { %7211 = vmatprep.subr.mxu0 %v8669_v0 }
0x1dad   : > { %v5226_v21 = vpop.xlane.xlu0 %5225 }
0x1dae   : > { %v5227_v58 = vsub.f32 %v5223_v17, %v5226_v21  ;;  %v5692_v17 = vld [vmem:[#allocation44 + $0xb8] sm:$0xff]  ;;  %v5689_v21 = vld [vmem:[#allocation44 + $0xa0] sm:$0xff] }
0x1db0   : > { %v5228_v22 = vmul.f32 1.442695, %v5227_v58  ;;  %v5688_v58 = vld [vmem:[#allocation44 + $0x98] sm:$0xff] }
0x1db1   : > { %v5236_v25 = vpop.permute.xlu0 %5235 }
0x1db2   : > { %7629 = vpow2.f32 %v5228_v22  ;;  %7186 = vmatpush3.msra.mxu1 %v5236_v25  ;;  %v5687_v22 = vld [vmem:[#allocation44 + $0x90] sm:$0xff]  ;;  %v5686_v25 = vld [vmem:[#allocation44 + $0x88] sm:$0xff] }
0x1db3   : > { %7201 = vmatprep.subr.mxu1 %v8669_v0 }
0x1dbf   : > { %v7630_v26 = vpop.eup %7629 }
0x1dc0   : > { %v5230_v28 = vsel %vm2058_vm3, %v7630_v26, 0.0 }
0x1dc1   : > { %5231 = vadd.xlane.f32.xlu1 %v5230_v28  ;;  %v5684_v28 = vld [vmem:[#allocation44 + $0x78] sm:$0xff] }
0x1dd2   : > { %5391 = vrot.lane.b32.xlu1 %v9548_v23, %s8673_s16  ;;  %v5390_v23 = vpop.permute.xlu0 %5389 }
0x1e4a   : > { %v5232_v31 = vpop.xlane.xlu1 %5231 }
0x1e4b   : > { %7631 = vrcp.f32 %v5232_v31  ;;  %v5680_v31 = vld [vmem:[#allocation44 + $0x58] sm:$0xff] }
0x1e4e   : > { %v5392_v34 = vpop.permute.xlu1 %5391 }
0x1e58   : > { %v7632_v32 = vpop.eup %7631 }
0x1e59   : > { %v5234_v33 = vmul.f32 %v7632_v32, %v7630_v26  ;;  %v5685_v26 = vld [vmem:[#allocation44 + $0x80] sm:$0xff]  ;;  %v5679_v32 = vld [vmem:[#allocation44 + $0x50] sm:$0xff] }
0x1e5b   : > { %7188 = vmatmul.mubr.msk.f32.vlgmr.msra.gmra.mxu1 %vm2058_vm3, %v5234_v33  ;;  %v5678_v33 = vld [vmem:[#allocation44 + $0x48] sm:$0xff] }
0x1e5c   : > { %7202 = vmatpush3.xpose.msk.msra.mxu1 %vm1980_vm2, %v5392_v34  ;;  %7203 = vmatprep.mubr.msk.f32.mxu1 %vm8670_vm0, %v8669_v0  ;;  %v5677_v34 = vld [vmem:[#allocation44 + $0x40] sm:$0xff] }
0x1e5d   : > { %7206 = vmatprep.subr.mxu1 %v8669_v0 }
0x1e5f   : > { %7204 = vmatmul.mubr.msk.f32.vlgmr.msra.gmra.mxu1 %vm1980_vm2, %v5390_v23  ;;  %v5676_v23 = vld [vmem:[#allocation44 + $0x38] sm:$0xff] }
0x1e60   : > { %7208 = vmatprep.mubr.msk.f32.mxu1 %vm8670_vm0, %v8669_v0 }
0x1f1b   : > { %v5307_v61 = vpop.f32.mrf.mxu1 }
0x1f1c   : > { %7199 = vmatmul.mubr.msk.f32.vlgmr.msra.gmra.mxu0 %vm1980_vm2, %v5307_v61  ;;  %v5674_v61 = vld [vmem:[#allocation44 + $0x28] sm:$0xff] }
0x1f1d   : > { %v7189_v62 = vpop.f32.mrf.mxu1  ;;  %7219 = vmatprep.mubr.msk.f32.mxu0 %vm8670_vm0, %v8669_v0  ;;  %7212 = vmatpush3.msra.mxu0 %v5558_v44  ;;  %v5799_v44 = vld [vmem:[#allocation47 + $0x68] sm:$0xff] }
0x1f1e   : > { %7213 = vmatprep.subr.mxu0 %v8669_v0  ;;  %v5673_v62 = vld [vmem:[#allocation44 + $0x20] sm:$0xff] }
0x1f1f   : > { %v5463_v36 = vpop.f32.mrf.mxu1  ;;  %7214 = vmatpush3.msra.mxu0 %v5557_v45  ;;  %v5814_v45 = vld [vmem:[#allocation47 + $0xe0] sm:$0xff] }
0x1f20   : > { %v5467_v37 = vmul.f32 0.17677669, %v5463_v36  ;;  %7215 = vmatprep.subr.mxu0 %v8669_v0  ;;  %v5672_v36 = vld [vmem:[#allocation44 + $0x18] sm:$0xff] }
0x1f21   : > { %v7205_v38 = vpop.f32.mrf.mxu1  ;;  %7216 = vmatpush3.msra.mxu0 %v5556_v48  ;;  %v5797_v48 = vld [vmem:[#allocation47 + $0x58] sm:$0xff] }
0x1f22   : > { %v5468_v39 = vsel %vm2058_vm3, %v5467_v37, -inf  ;;  %7217 = vmatprep.subr.mxu0 %v8669_v0  ;;  %v5670_v38 = vld [vmem:[#allocation44 + $0x8] sm:$0xff] }
0x1f23   : > { %5469 = vmax.xlane.f32.xlu1 %v5468_v39  ;;  %7218 = vmatpush3.msra.mxu0 %v5555_v6  ;;  %v5669_v39 = vld [vmem:[#allocation44] sm:$0xff] }
0x1f24   : > { %v5809_v6 = vld [vmem:[#allocation47 + $0xb8] sm:$0xff] }
0x1fac   : > { %v5470_v40 = vpop.xlane.xlu1 %5469 }
0x1fad   : > { %v5471_v7 = vsub.f32 %v5467_v37, %v5470_v40  ;;  %v5671_v37 = vld [vmem:[#allocation44 + $0x10] sm:$0xff]  ;;  %v5817_v40 = vld [vmem:[#allocation47 + $0xf8] sm:$0xff] }
0x1fae   : > { %6799 = vmatprep.subr.mxu0 %v5817_v40 }
0x1faf   : > { %v5472_v41 = vmul.f32 1.442695, %v5471_v7  ;;  %v5801_v7 = vld [vmem:[#allocation47 + $0x78] sm:$0xff] }
0x1fb1   : > { %7633 = vpow2.f32 %v5472_v41  ;;  %v5816_v41 = vld [vmem:[#allocation47 + $0xf0] sm:$0xff] }
0x1fbe   : > { %v7634_v42 = vpop.eup %7633 }
0x1fbf   : > { %v5474_v43 = vsel %vm2058_vm3, %v7634_v42, 0.0 }
0x1fc0   : > { %5475 = vadd.xlane.f32.xlu0 %v5474_v43  ;;  %v5815_v43 = vld [vmem:[#allocation47 + $0xe8] sm:$0xff] }
0x1fd6   : > { %5479 = vrot.lane.b32.xlu0 %v9560_v30, %s8673_s16 }
0x1fdc   : > { %v5384_v47 = vpop.f32.mrf.mxu0 }
0x1fdd   : > { %v5388_v49 = vadd.f32 %v5384_v47, %v5142_v46  ;;  %v5798_v46 = vld [vmem:[#allocation47 + $0x60] sm:$0xff]  ;;  %v5813_v47 = vld [vmem:[#allocation47 + $0xd8] sm:$0xff] }
0x1fde   : > { %v7200_v50 = vpop.f32.mrf.mxu0 }
0x1fdf   : > { %v5796_v50 = vld [vmem:[#allocation47 + $0x50] sm:$0xff] }
0x2049   : > { %v5476_v51 = vpop.xlane.xlu0 %5475 }
0x204a   : > { %7635 = vrcp.f32 %v5476_v51  ;;  %v5811_v51 = vld [vmem:[#allocation47 + $0xc8] sm:$0xff] }
0x204d   : > { %v5480_v30 = vpop.permute.xlu0 %5479 }
0x204e   : > { %7207 = vmatpush3.msra.mxu1 %v5480_v30  ;;  %v5795_v30 = vld [vmem:[#allocation47 + $0x48] sm:$0xff] }
0x204f   : > { %5713 = vmatprep.subr.mxu1 %v5700_v55 }
0x2057   : > { %v7636_v27 = vpop.eup %7635 }
0x2058   : > { %v5478_v52 = vmul.f32 %v7636_v27, %v7634_v42  ;;  %v5800_v42 = vld [vmem:[#allocation47 + $0x70] sm:$0xff]  ;;  %v5810_v27 = vld [vmem:[#allocation47 + $0xc0] sm:$0xff] }
0x205a   : > { %7209 = vmatmul.mubr.msk.f32.vlgmr.msra.gmra.mxu1 %vm2058_vm3, %v5478_v52  ;;  %v5794_v52 = vld [vmem:[#allocation47 + $0x40] sm:$0xff] }
0x205b   : > { %5777 = vmatprep.mubr.f32.mxu1 %v8669_v0  ;;  %5714 = vmatpush1.msra.mxu1 %v5699_v2 }
0x205c   : > { %5715 = vmatprep.subr.mxu1 %v5698_v5 }
0x205d   : > { %5716 = vmatpush1.msra.mxu1 %v5697_v8  ;;  %v6591_v8 = vld [vmem:[#allocation41] ss:$0 sm:$0xff] }
0x205e   : > { %5717 = vmatprep.subr.mxu1 %v5696_v9 }
0x205f   : > { %5718 = vmatpush1.msra.mxu1 %v5695_v10  ;;  %v6592_v10 = vld [vmem:[#allocation43] ss:$0 sm:$0xff] }
0x2060   : > { %5719 = vmatprep.subr.mxu1 %v5694_v13 }
0x2061   : > { %5720 = vmatpush1.msra.mxu1 %v5693_v14 }
0x2062   : > { %5721 = vmatprep.subr.mxu1 %v5692_v17  ;;  %v5788_v17 = vld [vmem:[#allocation47 + $0x10] sm:$0xff] }
0x2063   : > { %5722 = vmatpush1.msra.mxu1 %v5691_v18  ;;  %v5803_v18 = vld [vmem:[#allocation47 + $0x88] sm:$0xff] }
0x2064   : > { %5723 = vmatprep.subr.mxu1 %v5690_v20  ;;  %v5787_v20 = vld [vmem:[#allocation47 + $0x8] sm:$0xff] }
0x2065   : > { %5724 = vmatpush1.msra.mxu1 %v5689_v21  ;;  %v5802_v21 = vld [vmem:[#allocation47 + $0x80] sm:$0xff] }
0x2066   : > { %5725 = vmatprep.subr.mxu1 %v5688_v58  ;;  %v5701_v58 = vld [vmem:[#allocation46] sm:$0x3] }
0x2067   : > { %5726 = vmatpush1.msra.mxu1 %v5687_v22  ;;  %v5706_v22 = vrot.slane %v5701_v58, %v9266_v3 }
0x2068   : > { %5727 = vmatprep.subr.mxu1 %v5686_v25  ;;  %v5710_v25 = vrot.slane %v5701_v58, %v9261_v1  ;;  %v5938_v1 = vld [vmem:[%s8863_s21 + $0x78] sm:$0xff] }
0x2069   : > { %5728 = vmatpush1.msra.mxu1 %v5685_v26 }
0x206a   : > { %5729 = vmatprep.subr.mxu1 %v5684_v28 }
0x206b   : > { %5730 = vmatpush1.msra.mxu1 %v5683_v19 }
0x206c   : > { %5731 = vmatprep.subr.mxu1 %v5682_v11 }
0x206d   : > { %5732 = vmatpush1.msra.mxu1 %v5681_v29 }
0x206e   : > { %5733 = vmatprep.subr.mxu1 %v5680_v31 }
0x206f   : > { %5734 = vmatpush1.msra.mxu1 %v5679_v32 }
0x2070   : > { %5735 = vmatprep.subr.mxu1 %v5678_v33  ;;  %v6593_v33 = vld [vmem:[#allocation49] ss:$0 sm:$0xff] }
0x2071   : > { %5736 = vmatpush1.msra.mxu1 %v5677_v34 }
0x2072   : > { %5737 = vmatprep.subr.mxu1 %v5676_v23 }
0x2073   : > { %5738 = vmatpush1.msra.mxu1 %v5675_v35 }
0x2074   : > { %5739 = vmatprep.subr.mxu1 %v5674_v61  ;;  %v5937_v61 = vld [vmem:[%s8863_s21 + $0x70] sm:$0xff] }
0x2075   : > { %5740 = vmatpush1.msra.mxu1 %v5673_v62  ;;  %v5936_v62 = vld [vmem:[%s8863_s21 + $0x68] sm:$0xff] }
0x2076   : > { %5741 = vmatprep.subr.mxu1 %v5672_v36  ;;  %v5935_v36 = vld [vmem:[%s8863_s21 + $0x60] sm:$0xff] }
0x2077   : > { %5742 = vmatpush1.msra.mxu1 %v5671_v37 }
0x2078   : > { %5743 = vmatprep.subr.mxu1 %v5670_v38 }
0x2079   : > { %5744 = vmatpush1.msra.mxu1 %v5669_v39 }
0x207a   : > { %7222 = vmatprep.subr.mxu1 %v8669_v0 }
0x211a   : > { %v5551_v24 = vpop.f32.mrf.mxu1 }
0x211b   : > { %7220 = vmatmul.mubr.msk.f32.vlgmr.msra.gmra.mxu0 %vm1980_vm2, %v5551_v24  ;;  %v5793_v24 = vld [vmem:[#allocation47 + $0x38] sm:$0xff] }
0x211c   : > { %v7210_v53 = vpop.f32.mrf.mxu1  ;;  %6800 = vmatpush3.msra.mxu0 %v5801_v7  ;;  %v5934_v7 = vld [vmem:[%s8863_s21 + $0x58] sm:$0xff] }
0x211d   : > { %6801 = vmatprep.subr.mxu0 %v5816_v41  ;;  %v5808_v53 = vld [vmem:[#allocation47 + $0xb0] sm:$0xff]  ;;  %v5933_v41 = vld [vmem:[%s8863_s21 + $0x50] sm:$0xff] }
0x211e   : > { %6802 = vmatpush3.msra.mxu0 %v5800_v42  ;;  %v5932_v42 = vld [vmem:[%s8863_s21 + $0x48] sm:$0xff] }
0x211f   : > { %6803 = vmatprep.subr.mxu0 %v5815_v43  ;;  %v5931_v43 = vld [vmem:[%s8863_s21 + $0x40] sm:$0xff] }
0x2120   : > { %6804 = vmatpush3.msra.mxu0 %v5799_v44  ;;  %v5930_v44 = vld [vmem:[%s8863_s21 + $0x38] sm:$0xff] }
0x2121   : > { %6805 = vmatprep.subr.mxu0 %v5814_v45  ;;  %v5929_v45 = vld [vmem:[%s8863_s21 + $0x30] sm:$0xff] }
0x2122   : > { %6806 = vmatpush3.msra.mxu0 %v5798_v46  ;;  %v5928_v46 = vld [vmem:[%s8863_s21 + $0x28] sm:$0xff] }
0x2123   : > { %6807 = vmatprep.subr.mxu0 %v5813_v47  ;;  %v5927_v47 = vld [vmem:[%s8863_s21 + $0x20] sm:$0xff] }
0x2124   : > { %6808 = vmatpush3.msra.mxu0 %v5797_v48  ;;  %v5926_v48 = vld [vmem:[%s8863_s21 + $0x18] sm:$0xff] }
0x21db   : > { %v5628_v54 = vpop.f32.mrf.mxu0 }
0x21dc   : > { %v5632_v57 = vadd.f32 %v5628_v54, %v5388_v49  ;;  %v5812_v49 = vld [vmem:[#allocation47 + $0xd0] sm:$0xff] }
0x21dd   : > { %v7221_v59 = vpop.f32.mrf.mxu0  ;;  %6809 = vmatprep.subr.mxu0 %v5812_v49  ;;  %v5792_v54 = vld [vmem:[#allocation47 + $0x30] sm:$0xff]  ;;  %v5925_v49 = vld [vmem:[%s8863_s21 + $0x10] sm:$0xff] }
0x21de   : > { %v5640_v60 = vadd.f32 %v6590_v56, %v5632_v57  ;;  %6810 = vmatpush3.msra.mxu0 %v5796_v50  ;;  %v5807_v56 = vld [vmem:[#allocation47 + $0xa8] sm:$0xff]  ;;  %v5806_v59 = vld [vmem:[#allocation47 + $0xa0] sm:$0xff]  ;;  %v5924_v50 = vld [vmem:[%s8863_s21 + $0x8] sm:$0xff] }
0x21df   : > { %6811 = vmatprep.subr.mxu0 %v5811_v51  ;;  %v5791_v57 = vld [vmem:[#allocation47 + $0x28] sm:$0xff] }
0x21e0   : > { %v5641_v63 = vadd.f32 %v5640_v60, %v9542_v12  ;;  %6812 = vmatpush3.msra.mxu0 %v5795_v30  ;;  %v5790_v60 = vld [vmem:[#allocation47 + $0x20] sm:$0xff]  ;;  %v5923_v51 = vld [vmem:[%s8863_s21] sm:$0xff] }
0x21e1   : > { %6813 = vmatprep.subr.mxu0 %v5810_v27 }
0x21e2   : > { %5642 = vadd.xlane.f32.xlu1 %v5641_v63  ;;  %6814 = vmatpush3.msra.mxu0 %v5794_v52 }
0x21e3   : > { %6815 = vmatprep.subr.mxu0 %v5809_v6 }
0x21e4   : > { %6816 = vmatpush3.msra.mxu0 %v5793_v24  ;;  %v6594_v24 = vld [vmem:[#allocation50] ss:$0 sm:$0xff] }
0x21e5   : > { %6817 = vmatprep.subr.mxu0 %v5808_v53 }
0x21e6   : > { %6818 = vmatpush3.msra.mxu0 %v5792_v54  ;;  %v6595_v54 = vld [vmem:[#allocation52] ss:$0 sm:$0xff] }
0x21e7   : > { %6819 = vmatprep.subr.mxu0 %v5807_v56 }
0x21e8   : > { %6820 = vmatpush3.msra.mxu0 %v5791_v57 }
0x21e9   : > { %6821 = vmatprep.subr.mxu0 %v5806_v59  ;;  %v5939_v59 = vld [vmem:[#allocation53] sm:$0x1] }
0x21ea   : > { %6822 = vmatpush3.msra.mxu0 %v5790_v60 }
0x226b   : > { %v5643_v15 = vpop.xlane.xlu1 %5642 }
0x226c   : > { %v5644_v16 = vmul.f32 0.0078125, %v5643_v15  ;;  %v5805_v15 = vld [vmem:[#allocation47 + $0x98] sm:$0xff] }
0x226d   : > { %6823 = vmatprep.subr.mxu0 %v5805_v15 }
0x226e   : > { %v9650_v12 = vsub.f32 %v5641_v63, %v5644_v16  ;;  %v5789_v16 = vld [vmem:[#allocation47 + $0x18] sm:$0xff] }
0x226f   : > { %6824 = vmatpush3.msra.mxu0 %v5789_v16 }
0x2270   : > { %v5646_v4 = vmul.f32 %v9650_v12, %v9650_v12 }
0x2272   : > { %5647 = vadd.xlane.f32.xlu1 %v5646_v4  ;;  %v5804_v4 = vld [vmem:[#allocation47 + $0x90] sm:$0xff] }
0x2273   : > { %6825 = vmatprep.subr.mxu0 %v5804_v4 }
0x2274   : > { %6826 = vmatpush3.msra.mxu0 %v5788_v17 }
0x2275   : > { %6827 = vmatprep.subr.mxu0 %v5803_v18 }
0x2276   : > { %6828 = vmatpush3.msra.mxu0 %v5787_v20 }
0x2277   : > { %6829 = vmatprep.subr.mxu0 %v5802_v21 }
0x22fb   : > { %v5648_v63 = vpop.xlane.xlu1 %5647 }
0x22fc   : > { %v5649_v55 = vmul.f32 0.0078125, %v5648_v63 }
0x22fe   : > { %v5650_v2 = vadd.f32 1e-05, %v5649_v55 }
0x2300   : > { %7637 = vrsqrt.f32 %v5650_v2 }
0x230d   : > { %v7638_v5 = vpop.eup %7637 }
0x230e   : > { %v5652_v9 = vmul.f32 %v7638_v5, %v9650_v12  ;;  %v5786_v12 = vld [vmem:[#allocation47] sm:$0xff] }
0x230f   : > { %6830 = vmatpush3.msra.mxu0 %v5786_v12 }
0x2310   : > { %v5660_v13 = vmul.f32 %v6591_v8, %v5652_v9 }
0x2312   : > { %v5668_v14 = vadd.f32 %v6592_v10, %v5660_v13 }
0x2314   : > { %5778 = vmatmul.mubr.f32.vlgmr.msra.gmra.mxu1 %v5668_v14 }
0x2315   : > { %7254 = vmatprep.mubr.msk.f32.mxu1 %vm8670_vm0, %v8669_v0  ;;  %7223 = vmatpush3.msra.mxu1 %v5938_v1 }
0x2316   : > { %7224 = vmatprep.subr.mxu1 %v8669_v0 }
0x2317   : > { %7225 = vmatpush3.msra.mxu1 %v5937_v61 }
0x2318   : > { %7226 = vmatprep.subr.mxu1 %v8669_v0 }
0x2319   : > { %7227 = vmatpush3.msra.mxu1 %v5936_v62 }
0x231a   : > { %7228 = vmatprep.subr.mxu1 %v8669_v0 }
0x231b   : > { %7229 = vmatpush3.msra.mxu1 %v5935_v36 }
0x231c   : > { %7230 = vmatprep.subr.mxu1 %v8669_v0 }
0x231d   : > { %7231 = vmatpush3.msra.mxu1 %v5934_v7 }
0x231e   : > { %7232 = vmatprep.subr.mxu1 %v8669_v0 }
0x231f   : > { %7233 = vmatpush3.msra.mxu1 %v5933_v41 }
0x2320   : > { %7234 = vmatprep.subr.mxu1 %v8669_v0 }
0x2321   : > { %7235 = vmatpush3.msra.mxu1 %v5932_v42 }
0x2322   : > { %7236 = vmatprep.subr.mxu1 %v8669_v0 }
0x2323   : > { %7237 = vmatpush3.msra.mxu1 %v5931_v43 }
0x2324   : > { %7238 = vmatprep.subr.mxu1 %v8669_v0 }
0x2325   : > { %7239 = vmatpush3.msra.mxu1 %v5930_v44 }
0x2326   : > { %7240 = vmatprep.subr.mxu1 %v8669_v0 }
0x2327   : > { %7241 = vmatpush3.msra.mxu1 %v5929_v45 }
0x2328   : > { %7242 = vmatprep.subr.mxu1 %v8669_v0 }
0x2329   : > { %7243 = vmatpush3.msra.mxu1 %v5928_v46 }
0x232a   : > { %7244 = vmatprep.subr.mxu1 %v8669_v0 }
0x232b   : > { %7245 = vmatpush3.msra.mxu1 %v5927_v47 }
0x232c   : > { %7246 = vmatprep.subr.mxu1 %v8669_v0 }
0x232d   : > { %7247 = vmatpush3.msra.mxu1 %v5926_v48 }
0x232e   : > { %7248 = vmatprep.subr.mxu1 %v8669_v0 }
0x232f   : > { %7249 = vmatpush3.msra.mxu1 %v5925_v49 }
0x2330   : > { %7250 = vmatprep.subr.mxu1 %v8669_v0 }
0x2331   : > { %7251 = vmatpush3.msra.mxu1 %v5924_v50 }
0x2332   : > { %7252 = vmatprep.subr.mxu1 %v8669_v0 }
0x2333   : > { %7253 = vmatpush3.msra.mxu1 %v5923_v51 }
0x23d4   : > { %v5779_v26 = vpop.f32.mrf.mxu1 }
0x23d5   : > { %v5780_v28 = vadd.f32 %v5779_v26, %v5706_v22 }
0x23d6   : > { %v5781_v19 = vpop.f32.mrf.mxu1 }
0x23d7   : > { %v5782_v11 = vadd.f32 %v5781_v19, %v5710_v25  ;;  %v5784_v31 = vmax.f32 %v5780_v28, 0.0 }
0x23d9   : > { %v5785_v29 = vmax.f32 %v5782_v11, 0.0 }
0x23db   : > { %5889 = vmatprep.mubr.f32.mxu0 %v5785_v29 }
0x23dc   : > { %5890 = vmatmul.mubr.f32.vlgmr.msra.gmra.mxu0 %v5784_v31 }
0x249c   : > { %v6831_v32 = vpop.f32.mrf.mxu0 }
0x249e   : > { %v6832_v34 = vpop.f32.mrf.mxu0 }
0x249f   : > { %v6833_v23 = vadd.f32 %v6832_v34, %v6831_v32 }
0x24a1   : > { %v5892_v35 = vadd.f32 %v6833_v23, %v6593_v33 }
0x24a3   : > { %v5895_v3 = vadd.f32 %v5892_v35, %v5668_v14 }
0x24a5   : > { %5896 = vadd.xlane.f32.xlu1 %v5895_v3 }
0x252e   : > { %v5897_v37 = vpop.xlane.xlu1 %5896 }
0x252f   : > { %v5898_v38 = vmul.f32 0.0078125, %v5897_v37 }
0x2531   : > { %v5899_v39 = vsub.f32 %v5895_v3, %v5898_v38 }
0x2533   : > { %v5900_v40 = vmul.f32 %v5899_v39, %v5899_v39 }
0x2535   : > { %5901 = vadd.xlane.f32.xlu1 %v5900_v40 }
0x25be   : > { %v5902_v30 = vpop.xlane.xlu1 %5901 }
0x25bf   : > { %v5903_v27 = vmul.f32 0.0078125, %v5902_v30 }
0x25c1   : > { %v5904_v52 = vadd.f32 1e-05, %v5903_v27 }
0x25c3   : > { %7639 = vrsqrt.f32 %v5904_v52 }
0x25d0   : > { %v7640_v6 = vpop.eup %7639 }
0x25d1   : > { %v5906_v53 = vmul.f32 %v7640_v6, %v5899_v39 }
0x25d3   : > { %v5914_v56 = vmul.f32 %v6594_v24, %v5906_v53 }
0x25d5   : > { %v5922_v57 = vadd.f32 %v6595_v54, %v5914_v56 }
0x25d7   : > { %7255 = vmatmul.mubr.f32.vlgmr.msra.gmra.mxu1 %v5922_v57 }
0x2697   : > { %v6006_v0 = vpop.f32.mrf.mxu1 }
0x2698   : > { %v6007_v60 = vadd.f32 %v6006_v0, %v5939_v59 }
0x2699   : > { %v7256_v63 = vpop.f32.mrf.mxu1 }
0x269a   : > { %6010 = vst [vmem:[%s1607_s11] sm:$0x1] %v6007_v60 }
0x269b   : > { %8470 = shalt.err (!%p8467_p6)
}
0x269c   : > { %s8471_s22 = scalar_lea.hbm %s9694_s23, 16  ;;  %s8475_s0 = scalar_lea.hbm %s8873_s13, 32 }
0x269d   : > { %p8472_p5 = scmp.ne.s32.totalorder %s9694_s23, %s8471_s22  ;;  %p8476_p8 = scmp.lt.s32.totalorder %s9694_s23, %s8873_s13 }
0x269e   : > { %p8477_p11 = scmp.lt.s32.totalorder %s8475_s0, %s8471_s22 }
0x269f   : > { %p8473_p4 = pnand %p8472_p5, %p9804_p12 }
0x26a0   : > { %p8478_p9 = por %p8477_p11, %p8476_p8 }
0x26a1   : > { %p8474_p7 = pneg %p8473_p4 }
0x26a3   : > { %p8479_p10 = pnand %p8478_p9, %p8474_p7 }
0x26a5   : > { %8482 = shalt.err (!%p8479_p10)
}
0x26a6   : > { %7393 = dma.vmem_to_hbm [thread:$0]  (%p9804_p12), %s6025_s5, 16, %s9694_s23, %s6012_s28  }
0x26a7 PF: > { %s9805_s16 = sld [smem:[#allocation99_spill]]  ;;  %p7467_p13 = scmp.ge.s32.totalorder %s8589_s18, 2 }
0x26a8   : > { %s9806_s1 = sld [smem:[#allocation103_spill]] }
0x26ad   : > { %s6036_s26 = sand.u32 1, %s9805_s16  }
0x26ae   : > { %p9807_p0 = scmp.ne.s32.totalorder %s9806_s1, 0  ;;  %s6037_s11 = scalar_lea.sflag [#allocation4], %s6036_s26 }
0x26b0   : > { %p7396_p1 = pnand %p7467_p13, %p9807_p0 }
0x26b2   : > { %p7397_p2 = pneg %p7396_p1 }
0x26b4   : > { %8572 = dma.done.wait (%p7397_p2), %s6037_s11, 16  }
0x26b5   : > { %8574 = vsyncadd (%p7397_p2), %s6037_s11, 4294967280  ;;  %s9808_s18 = sld [smem:[#allocation101_spill]]  ;;  %s9811_s0 = smov %s8581_s15 }
0x26b6   : > { %s9809_s10 = sld [smem:[#allocation100_spill]] }
0x26b7   : > { %s9810_s16 = sld [smem:[#allocation102_spill]] }
0x26bb   : > { %p105_p3 = scmp.ge.s32.totalorder %s9808_s18, 4  }
0x26bc   : > { %s9812_s15 = smov %s9809_s10 }
0x26bd   :  { %107 = sbr.rel (!%p105_p3) target bundleno = 86 (0x56), region = 385 }
0x26c2   :  { %6041 = vsyncpa [#allocation3], 1 }
0x26c3   :  { %6043 = vsyncpa [#allocation3 + $0x1], 1 }
0x26c4   :  { %6044 = vsyncpa [#allocation6], 1 }
0x26c5   :  { %6045 = vsyncpa [#allocation9], 1 }
0x26c6   :  { %6046 = vsyncpa [#allocation12], 1 }
0x26c7   :  { %6047 = vsyncpa [#allocation15], 1 }
0x26c8   :  { %6048 = vsyncpa [#allocation18], 1 }
0x26c9   :  { %6049 = vsyncpa [#allocation21], 1 }
0x26ca   :  { %6050 = vsyncpa [#allocation24], 1 }
0x26cb   :  { %6051 = vsyncpa [#allocation27], 1 }
0x26cc   :  { %6052 = vsyncpa [#allocation30], 1 }
0x26cd   :  { %6053 = vsyncpa [#allocation33], 1 }
0x26ce   :  { %6054 = vsyncpa [#allocation36], 1 }
0x26cf   :  { %6055 = vsyncpa [#allocation39], 1 }
0x26d0   :  { %6056 = vsyncpa [#allocation42], 1 }
0x26d1   :  { %6057 = vsyncpa [#allocation45], 1 }
0x26d2   :  { %6058 = vsyncpa [#allocation48], 1 }
0x26d3   :  { %6059 = vsyncpa [#allocation51], 1 }
0x26d4   :  { %6060 = vsyncpa [#allocation54], 1 }
0x26d5   :  { %6061 = vsyncpa [#allocation4], 1 }
0x26d6   :  { %6063 = vsyncpa [#allocation4 + $0x1], 1 }

</bundles_post_ra>
